<compile_context>
chip_gen: v7x
topology: tpu7x:2x2x1
jax: 0.10.0
libtpu: 0.0.40
codegen_flags: <defaults>
</compile_context>

<pallas_src>
import functools
import math

import jax
import jax.numpy as jnp
from jax.experimental import pallas as pl
from jax.experimental.pallas import tpu as pltpu

PAD_ID = 1                    # RoBERTa pad token id (attention_mask = input_ids.ne(1))


@functools.lru_cache(maxsize=None)
def _vmem_limit_bytes():
    """Generation-aware scoped-VMEM limit (<=50% of per-core VMEM; v7x has 64 MiB)."""
    cap = 128 * 1024 * 1024
    try:
        cap = int(getattr(pltpu.get_tpu_info(), "vmem_capacity_bytes", cap))
    except Exception:
        pass
    return max(16 * 1024 * 1024, min(64 * 1024 * 1024, cap // 2))


def _cparams(sems):
    return pltpu.CompilerParams(dimension_semantics=sems,
                                vmem_limit_bytes=_vmem_limit_bytes())


def _tile(dim, target, align):
    """Largest divisor of `dim` <= target that is a multiple of `align`
    (full dim if it's already small or no aligned divisor exists)."""
    if dim <= target:
        return dim
    for t in range(target, 0, -1):
        if dim % t == 0 and t % align == 0:
            return t
    return dim


def _pick_hp(nH, dh, S, B):
    """Heads packed per attention block.

    Prefer 128-lane-aligned Q/K/V column windows (hp*dh % 128 == 0) into the
    fused QKV buffer, enough grid steps for v7x megacore (B * nH/hp >= 4 when
    that much work exists), and the largest window that fits the VMEM budget.
    """
    budget = 8 * 1024 * 1024
    cands = []
    for c in range(1, nH + 1):
        if nH % c:
            continue
        if (c * dh) % 128 != 0:
            continue                       # keep HBM<->VMEM DMA windows lane-dense
        if 16 * S * c * dh > budget:       # q/k/v/out windows, double buffered, bf16
            continue
        cands.append(c)
    if not cands:
        # H not a multiple of 128: one full-width block per batch row (fallback path).
        return nH
    need = min(4, B * nH)
    good = [c for c in cands if B * (nH // c) >= need]
    return max(good or cands)


# ----------------------------- matmul kernel -----------------------------

def _matmul_kernel(x_ref, w_ref, b_ref, o_ref, acc_ref, *, act):
    @pl.when(pl.program_id(2) == 0)
    def _():
        acc_ref[...] = jnp.zeros_like(acc_ref)

    acc_ref[...] += jnp.dot(x_ref[...], w_ref[...],
                            preferred_element_type=jnp.float32)

    @pl.when(pl.program_id(2) == pl.num_programs(2) - 1)
    def _():
        y = acc_ref[...] + b_ref[...]
        if act == "gelu":
            # TODO(synk): RoBERTa uses exact (erf) GELU; tanh approx for robust TPU lowering.
            y = jax.nn.gelu(y, approximate=True)
        o_ref[...] = y.astype(o_ref.dtype)


def linear(x, w, b, act="none", *, tm=1024, tn=1024, tk=512):
    """bf16 x[M,K] @ bf16 w[K,N] + f32 b[1,N] -> bf16 [M,N]; big tiles for the MXU."""
    M, K = x.shape
    N = w.shape[1]
    tm = _tile(M, tm, 16)      # bf16 packs 2 rows / sublane -> 16-row alignment
    tn = _tile(N, tn, 128)
    tk = _tile(K, tk, 128)
    grid = (M // tm, N // tn, K // tk)
    if x.dtype != jnp.bfloat16:
        x = x.astype(jnp.bfloat16)
    # TODO(synk): on v5e, pipeline_mode=pl.Buffered(3) on the weight spec could hide
    # the weight stream a bit more; left at the default depth for portability.
    return pl.pallas_call(
        functools.partial(_matmul_kernel, act=act),
        out_shape=jax.ShapeDtypeStruct((M, N), jnp.bfloat16),
        grid_spec=pltpu.PrefetchScalarGridSpec(
            num_scalar_prefetch=0,
            grid=grid,
            in_specs=[
                pl.BlockSpec((tm, tk), lambda i, j, k: (i, k)),
                pl.BlockSpec((tk, tn), lambda i, j, k: (k, j)),
                pl.BlockSpec((1, tn), lambda i, j, k: (0, j)),
            ],
            out_specs=pl.BlockSpec((tm, tn), lambda i, j, k: (i, j)),
            scratch_shapes=[pltpu.VMEM((tm, tn), jnp.float32)],
        ),
        compiler_params=_cparams(("parallel", "parallel", "arbitrary")),
    )(x, w, b)


# ----------------------------- layernorm kernels -----------------------------

def _ln_kernel(x_ref, g_ref, b_ref, o_ref, *, eps):
    x = x_ref[...].astype(jnp.float32)
    mu = jnp.mean(x, axis=-1, keepdims=True)
    var = jnp.mean(jnp.square(x - mu), axis=-1, keepdims=True)
    y = (x - mu) * jax.lax.rsqrt(var + eps) * g_ref[...] + b_ref[...]
    o_ref[...] = y.astype(o_ref.dtype)


def _ln_residual_kernel(x_ref, r_ref, g_ref, b_ref, o_ref, *, eps):
    # Fused residual add + layernorm (saves a full HBM round-trip per use).
    x = x_ref[...].astype(jnp.float32) + r_ref[...].astype(jnp.float32)
    mu = jnp.mean(x, axis=-1, keepdims=True)
    var = jnp.mean(jnp.square(x - mu), axis=-1, keepdims=True)
    y = (x - mu) * jax.lax.rsqrt(var + eps) * g_ref[...] + b_ref[...]
    o_ref[...] = y.astype(o_ref.dtype)


def layernorm(x, g, b, eps=1e-5, *, tm=512):
    M, H = x.shape
    tm = _tile(M, tm, 16)
    row_spec = pl.BlockSpec((tm, H), lambda i: (i, 0))
    vec_spec = pl.BlockSpec((1, H), lambda i: (0, 0))
    return pl.pallas_call(
        functools.partial(_ln_kernel, eps=eps),
        out_shape=jax.ShapeDtypeStruct((M, H), jnp.bfloat16),
        grid_spec=pltpu.PrefetchScalarGridSpec(
            num_scalar_prefetch=0, grid=(M // tm,),
            in_specs=[row_spec, vec_spec, vec_spec],
            out_specs=row_spec),
        compiler_params=_cparams(("parallel",)),
    )(x, g, b)


def layernorm_residual(x, res, g, b, eps=1e-5, *, tm=512):
    M, H = x.shape
    tm = _tile(M, tm, 16)
    row_spec = pl.BlockSpec((tm, H), lambda i: (i, 0))
    vec_spec = pl.BlockSpec((1, H), lambda i: (0, 0))
    return pl.pallas_call(
        functools.partial(_ln_residual_kernel, eps=eps),
        out_shape=jax.ShapeDtypeStruct((M, H), jnp.bfloat16),
        grid_spec=pltpu.PrefetchScalarGridSpec(
            num_scalar_prefetch=0, grid=(M // tm,),
            in_specs=[row_spec, row_spec, vec_spec, vec_spec],
            out_specs=row_spec),
        compiler_params=_cparams(("parallel",)),
    )(x, res, g, b)


# ----------------------------- attention kernel -----------------------------

def _attn_kernel(q_ref, k_ref, v_ref, bias_ref, o_ref, *, hp, dh, scale):
    # q/k/v refs: [S, hp*dh] bf16 column windows; bias: [1, 1, S] f32 key mask.
    bias = bias_ref[0]                                   # [1, S] f32
    for i in range(hp):                                  # static, unrolled per head
        c0 = i * dh
        q = q_ref[:, c0:c0 + dh] * scale                 # fold 1/sqrt(dh) into Q (bf16)
        k = k_ref[:, c0:c0 + dh]
        v = v_ref[:, c0:c0 + dh]
        s = jax.lax.dot_general(q, k, (((1,), (1,)), ((), ())),
                                preferred_element_type=jnp.float32)      # [S, S]
        s = s + bias                                     # additive -1e9 mask over keys
        s = s - jnp.max(s, axis=-1, keepdims=True)
        p = jnp.exp(s)                                   # f32 (portable across v5e/v6e/v7x)
        denom = jnp.sum(p, axis=-1, keepdims=True)       # [S, 1] f32
        o = jnp.dot(p.astype(jnp.bfloat16), v,
                    preferred_element_type=jnp.float32)  # unnormalized P @ V, [S, dh]
        o = o * pl.reciprocal(denom)                     # normalize the small output
        o_ref[:, c0:c0 + dh] = o.astype(o_ref.dtype)
    # TODO(synk): for very long sequences (S >= 2048) switch to a flash-style
    # online-softmax KV loop instead of materializing the full [S, S] scores.


def attention(qkv, attn_bias, *, B, S, nH, dh, hp):
    """qkv: fused [B*S, 3H] bf16 (q|k|v columns); attn_bias: [B, 1, S] f32.

    Returns the context as [B*S, H] bf16 already in (token, head*dh) layout, so
    it feeds the output projection with no transpose and lane-dense stores.
    """
    H = nH * dh
    W = hp * dh
    ng = nH // hp
    scale = 1.0 / math.sqrt(dh)
    kernel = functools.partial(_attn_kernel, hp=hp, dh=dh, scale=scale)
    bias_spec = pl.BlockSpec((1, 1, S), lambda b, h: (b, 0, 0))

    if W % 128 == 0:
        # Lane-aligned Q/K/V column windows straight out of the fused buffer:
        # no reshape/transpose glue, no extra HBM round trips of the 3H tensor.
        def win(off):
            return pl.BlockSpec((S, W), lambda b, h, off=off: (b, off + h))
        in_specs = [win(0), win(ng), win(2 * ng), bias_spec]
        operands = (qkv, qkv, qkv, attn_bias)
        out_spec = pl.BlockSpec((S, W), lambda b, h: (b, h))
    else:
        # TODO(synk): H not a multiple of 128 -> split QKV in JAX glue (one extra
        # HBM pass) so every Pallas block spans the full head dimension.
        q2, k2, v2 = jnp.split(qkv, 3, axis=1)
        full = pl.BlockSpec((S, H), lambda b, h: (b, 0))
        in_specs = [full, full, full, bias_spec]
        operands = (q2, k2, v2, attn_bias)
        out_spec = pl.BlockSpec((S, H), lambda b, h: (b, 0))

    return pl.pallas_call(
        kernel,
        out_shape=jax.ShapeDtypeStruct((B * S, H), jnp.bfloat16),
        grid_spec=pltpu.PrefetchScalarGridSpec(
            num_scalar_prefetch=0,
            grid=(B, ng),
            in_specs=in_specs,
            out_specs=out_spec),
        compiler_params=_cparams(("parallel", "parallel")),
    )(*operands)


# ----------------------------- model glue -----------------------------

def encoder_layer(x, lp, attn_bias, *, B, S, nH, dh, hp):
    qkv = linear(x, lp["wqkv"], lp["bqkv"])                      # fused q|k|v: [B*S, 3H]
    ctx = attention(qkv, attn_bias, B=B, S=S, nH=nH, dh=dh, hp=hp)  # [B*S, H], no transposes

    attn_out = linear(ctx, lp["wo"], lp["bo"])
    x1 = layernorm_residual(attn_out, x, lp["ln1_g"], lp["ln1_b"])

    h = linear(x1, lp["w1"], lp["b1"], act="gelu")
    h2 = linear(h, lp["w2"], lp["b2"])
    return layernorm_residual(h2, x1, lp["ln2_g"], lp["ln2_b"])


def model_sub_forward(params, input_ids, *, num_heads):
    B, S = input_ids.shape
    H = params["word_emb"].shape[1]
    dh = H // num_heads
    hp = _pick_hp(num_heads, dh, S, B)

    mask = (input_ids != PAD_ID)                                 # input_ids.ne(1)
    attn_bias = ((1.0 - mask.astype(jnp.float32)) * -1e9).reshape(B, 1, S)

    # RoBERTa position ids (padding_idx = 1) + embedding gathers (JAX glue).
    mi = mask.astype(jnp.int32)
    pos_ids = jnp.cumsum(mi, axis=1) * mi + PAD_ID
    x = (params["word_emb"][input_ids]
         + params["pos_emb"][pos_ids]
         + params["type_emb"][0])
    x = layernorm(x.reshape(B * S, H), params["emb_ln_g"], params["emb_ln_b"])

    for lp in params["layers"]:
        x = encoder_layer(x, lp, attn_bias, B=B, S=S, nH=num_heads, dh=dh, hp=hp)

    # encoder.roberta(input_ids, attention_mask)[0]
    return x.reshape(B, S, H).astype(jnp.float32)


def init_params(key, *, vocab, max_pos, H, ffn, L):
    keys = iter(jax.random.split(key, 8 + 8 * L))
    nrm = lambda shape, s=0.02: (s * jax.random.normal(next(keys), shape)).astype(jnp.float32)
    bf = lambda shape: nrm(shape).astype(jnp.bfloat16)     # matmul weights stored bf16
    zeros = lambda shape: jnp.zeros(shape, jnp.float32)
    ones = lambda shape: jnp.ones(shape, jnp.float32)

    # Biases / LN params are pre-shaped to [1, N] f32 so no per-layer reshape/cast
    # ops sit between Pallas kernels at run time.
    params = {
        "word_emb": nrm((vocab, H)),
        "pos_emb": nrm((max_pos, H)),
        "type_emb": nrm((1, H)),
        "emb_ln_g": ones((1, H)), "emb_ln_b": zeros((1, H)),
        "layers": [],
    }
    for _ in range(L):
        params["layers"].append({
            "wqkv": bf((H, 3 * H)), "bqkv": zeros((1, 3 * H)),
            "wo": bf((H, H)), "bo": zeros((1, H)),
            "ln1_g": ones((1, H)), "ln1_b": zeros((1, H)),
            "w1": bf((H, ffn)), "b1": zeros((1, ffn)),
            "w2": bf((ffn, H)), "b2": zeros((1, H)),
            "ln2_g": ones((1, H)), "ln2_b": zeros((1, H)),
        })
    return params


if __name__ == "__main__":
    B, S, H, nH, L, FFN = 2, 16, 128, 4, 2, 256
    VOCAB = 128
    MAX_POS = S + 2

    root = jax.random.PRNGKey(0)
    k_params, k_ids = jax.random.split(root, 2)
    params = init_params(k_params, vocab=VOCAB, max_pos=MAX_POS, H=H, ffn=FFN, L=L)

    input_ids = jax.random.randint(k_ids, (B, S), 2, VOCAB, dtype=jnp.int32)
    input_ids = input_ids.at[:, 0].set(0)              # CLS token
    input_ids = input_ids.at[1, S - 2:].set(PAD_ID)    # padding in second sequence

    fwd = jax.jit(functools.partial(model_sub_forward, num_heads=nH))
    outputs = fwd(params, input_ids)
    jax.block_until_ready(outputs)

    assert outputs.shape == (B, S, H)
    assert bool(jnp.all(jnp.isfinite(outputs)))
    print("KERNEL_OK")
</pallas_src>

<mosaic_0001>
module attributes {stable_mosaic.version = 11 : i64} {
  func.func @_matmul_kernel(%arg0: i32, %arg1: i32, %arg2: i32, %arg3: memref<32x128xbf16, #tpu.memory_space<vmem>>, %arg4: memref<128x384xbf16, #tpu.memory_space<vmem>>, %arg5: memref<1x384xf32, #tpu.memory_space<vmem>>, %arg6: memref<32x384xbf16, #tpu.memory_space<vmem>>, %arg7: memref<32x384xf32, #tpu.memory_space<vmem>>) attributes {dimension_semantics = [#tpu.dimension_semantics<parallel>, #tpu.dimension_semantics<parallel>, #tpu.dimension_semantics<arbitrary>], iteration_bounds = array<i64: 1, 1, 1>, scalar_prefetch = 0 : i64, scratch_operands = 1 : i64, tpu.core_type = #tpu.core_type<tc>, window_params = [{transform_indices = @transform_0, window_bounds = array<i64: 32, 128>}, {transform_indices = @transform_1, window_bounds = array<i64: 128, 384>}, {transform_indices = @transform_2, window_bounds = array<i64: 1, 384>}, {transform_indices = @transform_3, window_bounds = array<i64: 32, 384>}]} {
    %c0_i32 = arith.constant 0 : i32
    %0 = arith.cmpi eq, %arg2, %c0_i32 : i32
    %1 = arith.extui %0 : i1 to i32
    %c0_i32_0 = arith.constant 0 : i32
    %2 = arith.cmpi ne, %1, %c0_i32_0 : i32
    scf.if %2 {
      %cst_10 = arith.constant 0.000000e+00 : f32
      %12 = vector.broadcast %cst_10 : f32 to vector<32x384xf32>
      %c0_11 = arith.constant 0 : index
      %c0_12 = arith.constant 0 : index
      %13 = vector.load %arg7[%c0_11, %c0_12] : memref<32x384xf32, #tpu.memory_space<vmem>>, vector<32x384xf32>
      tpu.vector_store %arg7[%c0_11, %c0_12], %12 {strides = array<i32>} : memref<32x384xf32, #tpu.memory_space<vmem>>, vector<32x384xf32>,
    } else {
    }
    %c0 = arith.constant 0 : index
    %c0_1 = arith.constant 0 : index
    %3 = vector.load %arg7[%c0, %c0_1] : memref<32x384xf32, #tpu.memory_space<vmem>>, vector<32x384xf32>
    %c0_2 = arith.constant 0 : index
    %c0_3 = arith.constant 0 : index
    %4 = vector.load %arg3[%c0_2, %c0_3] : memref<32x128xbf16, #tpu.memory_space<vmem>>, vector<32x128xbf16>
    %c0_4 = arith.constant 0 : index
    %c0_5 = arith.constant 0 : index
    %5 = vector.load %arg4[%c0_4, %c0_5] : memref<128x384xbf16, #tpu.memory_space<vmem>>, vector<128x384xbf16>
    %cst = arith.constant dense<0.000000e+00> : vector<32x384xf32>
    %6 = tpu.matmul %4, %5, %cst {dimension_numbers = #tpu.dot_dimension_numbers<[1], [0], [0], [1], [0, 0, 1, 1], [], []>} : vector<32x128xbf16>, vector<128x384xbf16>, vector<32x384xf32> -> vector<32x384xf32>
    %7 = arith.addf %3, %6 : vector<32x384xf32>
    %c0_6 = arith.constant 0 : index
    %c0_7 = arith.constant 0 : index
    %8 = vector.load %arg7[%c0_6, %c0_7] : memref<32x384xf32, #tpu.memory_space<vmem>>, vector<32x384xf32>
    tpu.vector_store %arg7[%c0_6, %c0_7], %7 {strides = array<i32>} : memref<32x384xf32, #tpu.memory_space<vmem>>, vector<32x384xf32>,
    %c0_i32_8 = arith.constant 0 : i32
    %9 = arith.cmpi eq, %arg2, %c0_i32_8 : i32
    %10 = arith.extui %9 : i1 to i32
    %c0_i32_9 = arith.constant 0 : i32
    %11 = arith.cmpi ne, %10, %c0_i32_9 : i32
    scf.if %11 {
      %c0_10 = arith.constant 0 : index
      %c0_11 = arith.constant 0 : index
      %12 = vector.load %arg7[%c0_10, %c0_11] : memref<32x384xf32, #tpu.memory_space<vmem>>, vector<32x384xf32>
      %c0_12 = arith.constant 0 : index
      %c0_13 = arith.constant 0 : index
      %13 = vector.load %arg5[%c0_12, %c0_13] : memref<1x384xf32, #tpu.memory_space<vmem>>, vector<1x384xf32>
      %14 = vector.broadcast %13 : vector<1x384xf32> to vector<32x384xf32>
      %15 = arith.addf %12, %14 : vector<32x384xf32>
      %16 = arith.truncf %15 : vector<32x384xf32> to vector<32x384xbf16>
      %c0_14 = arith.constant 0 : index
      %c0_15 = arith.constant 0 : index
      %17 = vector.load %arg6[%c0_14, %c0_15] : memref<32x384xbf16, #tpu.memory_space<vmem>>, vector<32x384xbf16>
      tpu.vector_store %arg6[%c0_14, %c0_15], %16 {strides = array<i32>} : memref<32x384xbf16, #tpu.memory_space<vmem>>, vector<32x384xbf16>,
    } else {
    }
    return
  }
  func.func @transform_0(%arg0: i32, %arg1: i32, %arg2: i32) -> (i32, i32) {
    %c0_i32 = arith.constant 0 : i32
    return %arg0, %arg2 : i32, i32
  }
  func.func @transform_1(%arg0: i32, %arg1: i32, %arg2: i32) -> (i32, i32) {
    %c0_i32 = arith.constant 0 : i32
    return %arg2, %arg1 : i32, i32
  }
  func.func @transform_2(%arg0: i32, %arg1: i32, %arg2: i32) -> (i32, i32) {
    %c0_i32 = arith.constant 0 : i32
    %c0_i32_0 = arith.constant 0 : i32
    return %c0_i32, %arg1 : i32, i32
  }
  func.func @transform_3(%arg0: i32, %arg1: i32, %arg2: i32) -> (i32, i32) {
    %c0_i32 = arith.constant 0 : i32
    return %arg0, %arg1 : i32, i32
  }
}

module attributes {stable_mosaic.version = 11 : i64} {
  func.func @_ln_kernel(%arg0: i32, %arg1: memref<32x128xf32, #tpu.memory_space<vmem>>, %arg2: memref<1x128xf32, #tpu.memory_space<vmem>>, %arg3: memref<1x128xf32, #tpu.memory_space<vmem>>, %arg4: memref<32x128xbf16, #tpu.memory_space<vmem>>) attributes {dimension_semantics = [#tpu.dimension_semantics<parallel>], iteration_bounds = array<i64: 1>, scalar_prefetch = 0 : i64, scratch_operands = 0 : i64, tpu.core_type = #tpu.core_type<tc>, window_params = [{transform_indices = @transform_0, window_bounds = array<i64: 32, 128>}, {pipeline_mode = #tpu.pipeline_mode<synchronous>, transform_indices = @transform_1, window_bounds = array<i64: 1, 128>}, {pipeline_mode = #tpu.pipeline_mode<synchronous>, transform_indices = @transform_2, window_bounds = array<i64: 1, 128>}, {transform_indices = @transform_3, window_bounds = array<i64: 32, 128>}]} {
    %c0 = arith.constant 0 : index
    %c0_0 = arith.constant 0 : index
    %0 = vector.load %arg1[%c0, %c0_0] : memref<32x128xf32, #tpu.memory_space<vmem>>, vector<32x128xf32>
    %cst = arith.constant dense<0.000000e+00> : vector<32xf32>
    %1 = vector.multi_reduction <add>, %0, %cst [1] : vector<32x128xf32> to vector<32xf32>
    %2 = vector.shape_cast %1 : vector<32xf32> to vector<32x1xf32>
    %cst_1 = arith.constant 1.280000e+02 : f32
    %3 = vector.broadcast %cst_1 : f32 to vector<32x1xf32>
    %4 = arith.divf %2, %3 : vector<32x1xf32>
    %5 = vector.broadcast %4 : vector<32x1xf32> to vector<32x128xf32>
    %6 = arith.subf %0, %5 : vector<32x128xf32>
    %7 = arith.mulf %6, %6 : vector<32x128xf32>
    %cst_2 = arith.constant dense<0.000000e+00> : vector<32xf32>
    %8 = vector.multi_reduction <add>, %7, %cst_2 [1] : vector<32x128xf32> to vector<32xf32>
    %9 = vector.shape_cast %8 : vector<32xf32> to vector<32x1xf32>
    %cst_3 = arith.constant 1.280000e+02 : f32
    %10 = vector.broadcast %cst_3 : f32 to vector<32x1xf32>
    %11 = arith.divf %9, %10 : vector<32x1xf32>
    %12 = vector.broadcast %4 : vector<32x1xf32> to vector<32x128xf32>
    %13 = arith.subf %0, %12 : vector<32x128xf32>
    %cst_4 = arith.constant 9.99999974E-6 : f32
    %14 = vector.broadcast %cst_4 : f32 to vector<32x1xf32>
    %15 = arith.addf %11, %14 : vector<32x1xf32>
    %16 = math.rsqrt %15 : vector<32x1xf32>
    %17 = vector.broadcast %16 : vector<32x1xf32> to vector<32x128xf32>
    %18 = arith.mulf %13, %17 : vector<32x128xf32>
    %c0_5 = arith.constant 0 : index
    %c0_6 = arith.constant 0 : index
    %19 = vector.load %arg2[%c0_5, %c0_6] : memref<1x128xf32, #tpu.memory_space<vmem>>, vector<1x128xf32>
    %20 = vector.broadcast %19 : vector<1x128xf32> to vector<32x128xf32>
    %21 = arith.mulf %18, %20 : vector<32x128xf32>
    %c0_7 = arith.constant 0 : index
    %c0_8 = arith.constant 0 : index
    %22 = vector.load %arg3[%c0_7, %c0_8] : memref<1x128xf32, #tpu.memory_space<vmem>>, vector<1x128xf32>
    %23 = vector.broadcast %22 : vector<1x128xf32> to vector<32x128xf32>
    %24 = arith.addf %21, %23 : vector<32x128xf32>
    %25 = arith.truncf %24 : vector<32x128xf32> to vector<32x128xbf16>
    %c0_9 = arith.constant 0 : index
    %c0_10 = arith.constant 0 : index
    %26 = vector.load %arg4[%c0_9, %c0_10] : memref<32x128xbf16, #tpu.memory_space<vmem>>, vector<32x128xbf16>
    tpu.vector_store %arg4[%c0_9, %c0_10], %25 {strides = array<i32>} : memref<32x128xbf16, #tpu.memory_space<vmem>>, vector<32x128xbf16>,
    return
  }
  func.func @transform_0(%arg0: i32) -> (i32, i32) {
    %c0_i32 = arith.constant 0 : i32
    %c0_i32_0 = arith.constant 0 : i32
    return %arg0, %c0_i32 : i32, i32
  }
  func.func @transform_1(%arg0: i32) -> (i32, i32) {
    %c0_i32 = arith.constant 0 : i32
    %c0_i32_0 = arith.constant 0 : i32
    %c0_i32_1 = arith.constant 0 : i32
    return %c0_i32, %c0_i32_0 : i32, i32
  }
  func.func @transform_2(%arg0: i32) -> (i32, i32) {
    %c0_i32 = arith.constant 0 : i32
    %c0_i32_0 = arith.constant 0 : i32
    %c0_i32_1 = arith.constant 0 : i32
    return %c0_i32, %c0_i32_0 : i32, i32
  }
  func.func @transform_3(%arg0: i32) -> (i32, i32) {
    %c0_i32 = arith.constant 0 : i32
    %c0_i32_0 = arith.constant 0 : i32
    return %arg0, %c0_i32 : i32, i32
  }
}

module attributes {stable_mosaic.version = 11 : i64} {
  func.func @_attn_kernel(%arg0: i32, %arg1: i32, %arg2: memref<16x128xbf16, #tpu.memory_space<vmem>>, %arg3: memref<16x128xbf16, #tpu.memory_space<vmem>>, %arg4: memref<16x128xbf16, #tpu.memory_space<vmem>>, %arg5: memref<1x1x16xf32, #tpu.memory_space<vmem>>, %arg6: memref<16x128xbf16, #tpu.memory_space<vmem>>) attributes {dimension_semantics = [#tpu.dimension_semantics<parallel>, #tpu.dimension_semantics<parallel>], iteration_bounds = array<i64: 2, 1>, scalar_prefetch = 0 : i64, scratch_operands = 0 : i64, tpu.core_type = #tpu.core_type<tc>, window_params = [{transform_indices = @transform_0, window_bounds = array<i64: 16, 128>}, {transform_indices = @transform_1, window_bounds = array<i64: 16, 128>}, {transform_indices = @transform_2, window_bounds = array<i64: 16, 128>}, {transform_indices = @transform_3, window_bounds = array<i64: 1, 1, 16>}, {transform_indices = @transform_4, window_bounds = array<i64: 16, 128>}]} {
    %c0 = arith.constant 0 : index
    %c0_0 = arith.constant 0 : index
    %c0_1 = arith.constant 0 : index
    %0 = vector.load %arg5[%c0, %c0_0, %c0_1] : memref<1x1x16xf32, #tpu.memory_space<vmem>>, vector<1x1x16xf32>
    %1 = vector.shape_cast %0 : vector<1x1x16xf32> to vector<1x16xf32>
    %c0_2 = arith.constant 0 : index
    %c0_3 = arith.constant 0 : index
    %2 = vector.load %arg2[%c0_2, %c0_3] : memref<16x128xbf16, #tpu.memory_space<vmem>>, vector<16x32xbf16>
    %cst = arith.constant 1.767580e-01 : bf16
    %3 = vector.broadcast %cst : bf16 to vector<16x32xbf16>
    %4 = arith.mulf %2, %3 : vector<16x32xbf16>
    %c0_4 = arith.constant 0 : index
    %c0_5 = arith.constant 0 : index
    %5 = vector.load %arg3[%c0_4, %c0_5] : memref<16x128xbf16, #tpu.memory_space<vmem>>, vector<16x32xbf16>
    %c0_6 = arith.constant 0 : index
    %c0_7 = arith.constant 0 : index
    %6 = vector.load %arg4[%c0_6, %c0_7] : memref<16x128xbf16, #tpu.memory_space<vmem>>, vector<16x32xbf16>
    %cst_8 = arith.constant dense<0.000000e+00> : vector<16x16xf32>
    %7 = tpu.matmul %4, %5, %cst_8 {dimension_numbers = #tpu.dot_dimension_numbers<[1], [1], [0], [0], [0, 0, 1, 0], [], []>} : vector<16x32xbf16>, vector<16x32xbf16>, vector<16x16xf32> -> vector<16x16xf32>
    %8 = vector.broadcast %1 : vector<1x16xf32> to vector<16x16xf32>
    %9 = arith.addf %7, %8 : vector<16x16xf32>
    %cst_9 = arith.constant dense<0xFF800000> : vector<16xf32>
    %10 = vector.multi_reduction <maximumf>, %9, %cst_9 [1] : vector<16x16xf32> to vector<16xf32>
    %11 = vector.shape_cast %10 : vector<16xf32> to vector<16x1xf32>
    %12 = vector.broadcast %11 : vector<16x1xf32> to vector<16x16xf32>
    %13 = arith.subf %9, %12 : vector<16x16xf32>
    %14 = math.exp %13 : vector<16x16xf32>
    %cst_10 = arith.constant dense<0.000000e+00> : vector<16xf32>
    %15 = vector.multi_reduction <add>, %14, %cst_10 [1] : vector<16x16xf32> to vector<16xf32>
    %16 = vector.shape_cast %15 : vector<16xf32> to vector<16x1xf32>
    %17 = arith.truncf %14 : vector<16x16xf32> to vector<16x16xbf16>
    %cst_11 = arith.constant dense<0.000000e+00> : vector<16x32xf32>
    %18 = tpu.matmul %17, %6, %cst_11 {dimension_numbers = #tpu.dot_dimension_numbers<[1], [0], [0], [1], [0, 0, 1, 1], [], []>} : vector<16x16xbf16>, vector<16x32xbf16>, vector<16x32xf32> -> vector<16x32xf32>
    %19 = tpu.reciprocal %16 : vector<16x1xf32> -> vector<16x1xf32>
    %20 = vector.broadcast %19 : vector<16x1xf32> to vector<16x32xf32>
    %21 = arith.mulf %18, %20 : vector<16x32xf32>
    %22 = arith.truncf %21 : vector<16x32xf32> to vector<16x32xbf16>
    %c0_12 = arith.constant 0 : index
    %c0_13 = arith.constant 0 : index
    %23 = vector.load %arg6[%c0_12, %c0_13] : memref<16x128xbf16, #tpu.memory_space<vmem>>, vector<16x32xbf16>
    tpu.vector_store %arg6[%c0_12, %c0_13], %22 {strides = array<i32>} : memref<16x128xbf16, #tpu.memory_space<vmem>>, vector<16x32xbf16>,
    %c0_14 = arith.constant 0 : index
    %c32 = arith.constant 32 : index
    %24 = vector.load %arg2[%c0_14, %c32] : memref<16x128xbf16, #tpu.memory_space<vmem>>, vector<16x32xbf16>
    %cst_15 = arith.constant 1.767580e-01 : bf16
    %25 = vector.broadcast %cst_15 : bf16 to vector<16x32xbf16>
    %26 = arith.mulf %24, %25 : vector<16x32xbf16>
    %c0_16 = arith.constant 0 : index
    %c32_17 = arith.constant 32 : index
    %27 = vector.load %arg3[%c0_16, %c32_17] : memref<16x128xbf16, #tpu.memory_space<vmem>>, vector<16x32xbf16>
    %c0_18 = arith.constant 0 : index
    %c32_19 = arith.constant 32 : index
    %28 = vector.load %arg4[%c0_18, %c32_19] : memref<16x128xbf16, #tpu.memory_space<vmem>>, vector<16x32xbf16>
    %cst_20 = arith.constant dense<0.000000e+00> : vector<16x16xf32>
    %29 = tpu.matmul %26, %27, %cst_20 {dimension_numbers = #tpu.dot_dimension_numbers<[1], [1], [0], [0], [0, 0, 1, 0], [], []>} : vector<16x32xbf16>, vector<16x32xbf16>, vector<16x16xf32> -> vector<16x16xf32>
    %30 = vector.broadcast %1 : vector<1x16xf32> to vector<16x16xf32>
    %31 = arith.addf %29, %30 : vector<16x16xf32>
    %cst_21 = arith.constant dense<0xFF800000> : vector<16xf32>
    %32 = vector.multi_reduction <maximumf>, %31, %cst_21 [1] : vector<16x16xf32> to vector<16xf32>
    %33 = vector.shape_cast %32 : vector<16xf32> to vector<16x1xf32>
    %34 = vector.broadcast %33 : vector<16x1xf32> to vector<16x16xf32>
    %35 = arith.subf %31, %34 : vector<16x16xf32>
    %36 = math.exp %35 : vector<16x16xf32>
    %cst_22 = arith.constant dense<0.000000e+00> : vector<16xf32>
    %37 = vector.multi_reduction <add>, %36, %cst_22 [1] : vector<16x16xf32> to vector<16xf32>
    %38 = vector.shape_cast %37 : vector<16xf32> to vector<16x1xf32>
    %39 = arith.truncf %36 : vector<16x16xf32> to vector<16x16xbf16>
    %cst_23 = arith.constant dense<0.000000e+00> : vector<16x32xf32>
    %40 = tpu.matmul %39, %28, %cst_23 {dimension_numbers = #tpu.dot_dimension_numbers<[1], [0], [0], [1], [0, 0, 1, 1], [], []>} : vector<16x16xbf16>, vector<16x32xbf16>, vector<16x32xf32> -> vector<16x32xf32>
    %41 = tpu.reciprocal %38 : vector<16x1xf32> -> vector<16x1xf32>
    %42 = vector.broadcast %41 : vector<16x1xf32> to vector<16x32xf32>
    %43 = arith.mulf %40, %42 : vector<16x32xf32>
    %44 = arith.truncf %43 : vector<16x32xf32> to vector<16x32xbf16>
    %c0_24 = arith.constant 0 : index
    %c32_25 = arith.constant 32 : index
    %45 = vector.load %arg6[%c0_24, %c32_25] : memref<16x128xbf16, #tpu.memory_space<vmem>>, vector<16x32xbf16>
    tpu.vector_store %arg6[%c0_24, %c32_25], %44 {strides = array<i32>} : memref<16x128xbf16, #tpu.memory_space<vmem>>, vector<16x32xbf16>,
    %c0_26 = arith.constant 0 : index
    %c64 = arith.constant 64 : index
    %46 = vector.load %arg2[%c0_26, %c64] : memref<16x128xbf16, #tpu.memory_space<vmem>>, vector<16x32xbf16>
    %cst_27 = arith.constant 1.767580e-01 : bf16
    %47 = vector.broadcast %cst_27 : bf16 to vector<16x32xbf16>
    %48 = arith.mulf %46, %47 : vector<16x32xbf16>
    %c0_28 = arith.constant 0 : index
    %c64_29 = arith.constant 64 : index
    %49 = vector.load %arg3[%c0_28, %c64_29] : memref<16x128xbf16, #tpu.memory_space<vmem>>, vector<16x32xbf16>
    %c0_30 = arith.constant 0 : index
    %c64_31 = arith.constant 64 : index
    %50 = vector.load %arg4[%c0_30, %c64_31] : memref<16x128xbf16, #tpu.memory_space<vmem>>, vector<16x32xbf16>
    %cst_32 = arith.constant dense<0.000000e+00> : vector<16x16xf32>
    %51 = tpu.matmul %48, %49, %cst_32 {dimension_numbers = #tpu.dot_dimension_numbers<[1], [1], [0], [0], [0, 0, 1, 0], [], []>} : vector<16x32xbf16>, vector<16x32xbf16>, vector<16x16xf32> -> vector<16x16xf32>
    %52 = vector.broadcast %1 : vector<1x16xf32> to vector<16x16xf32>
    %53 = arith.addf %51, %52 : vector<16x16xf32>
    %cst_33 = arith.constant dense<0xFF800000> : vector<16xf32>
    %54 = vector.multi_reduction <maximumf>, %53, %cst_33 [1] : vector<16x16xf32> to vector<16xf32>
    %55 = vector.shape_cast %54 : vector<16xf32> to vector<16x1xf32>
    %56 = vector.broadcast %55 : vector<16x1xf32> to vector<16x16xf32>
    %57 = arith.subf %53, %56 : vector<16x16xf32>
    %58 = math.exp %57 : vector<16x16xf32>
    %cst_34 = arith.constant dense<0.000000e+00> : vector<16xf32>
    %59 = vector.multi_reduction <add>, %58, %cst_34 [1] : vector<16x16xf32> to vector<16xf32>
    %60 = vector.shape_cast %59 : vector<16xf32> to vector<16x1xf32>
    %61 = arith.truncf %58 : vector<16x16xf32> to vector<16x16xbf16>
    %cst_35 = arith.constant dense<0.000000e+00> : vector<16x32xf32>
    %62 = tpu.matmul %61, %50, %cst_35 {dimension_numbers = #tpu.dot_dimension_numbers<[1], [0], [0], [1], [0, 0, 1, 1], [], []>} : vector<16x16xbf16>, vector<16x32xbf16>, vector<16x32xf32> -> vector<16x32xf32>
    %63 = tpu.reciprocal %60 : vector<16x1xf32> -> vector<16x1xf32>
    %64 = vector.broadcast %63 : vector<16x1xf32> to vector<16x32xf32>
    %65 = arith.mulf %62, %64 : vector<16x32xf32>
    %66 = arith.truncf %65 : vector<16x32xf32> to vector<16x32xbf16>
    %c0_36 = arith.constant 0 : index
    %c64_37 = arith.constant 64 : index
    %67 = vector.load %arg6[%c0_36, %c64_37] : memref<16x128xbf16, #tpu.memory_space<vmem>>, vector<16x32xbf16>
    tpu.vector_store %arg6[%c0_36, %c64_37], %66 {strides = array<i32>} : memref<16x128xbf16, #tpu.memory_space<vmem>>, vector<16x32xbf16>,
    %c0_38 = arith.constant 0 : index
    %c96 = arith.constant 96 : index
    %68 = vector.load %arg2[%c0_38, %c96] : memref<16x128xbf16, #tpu.memory_space<vmem>>, vector<16x32xbf16>
    %cst_39 = arith.constant 1.767580e-01 : bf16
    %69 = vector.broadcast %cst_39 : bf16 to vector<16x32xbf16>
    %70 = arith.mulf %68, %69 : vector<16x32xbf16>
    %c0_40 = arith.constant 0 : index
    %c96_41 = arith.constant 96 : index
    %71 = vector.load %arg3[%c0_40, %c96_41] : memref<16x128xbf16, #tpu.memory_space<vmem>>, vector<16x32xbf16>
    %c0_42 = arith.constant 0 : index
    %c96_43 = arith.constant 96 : index
    %72 = vector.load %arg4[%c0_42, %c96_43] : memref<16x128xbf16, #tpu.memory_space<vmem>>, vector<16x32xbf16>
    %cst_44 = arith.constant dense<0.000000e+00> : vector<16x16xf32>
    %73 = tpu.matmul %70, %71, %cst_44 {dimension_numbers = #tpu.dot_dimension_numbers<[1], [1], [0], [0], [0, 0, 1, 0], [], []>} : vector<16x32xbf16>, vector<16x32xbf16>, vector<16x16xf32> -> vector<16x16xf32>
    %74 = vector.broadcast %1 : vector<1x16xf32> to vector<16x16xf32>
    %75 = arith.addf %73, %74 : vector<16x16xf32>
    %cst_45 = arith.constant dense<0xFF800000> : vector<16xf32>
    %76 = vector.multi_reduction <maximumf>, %75, %cst_45 [1] : vector<16x16xf32> to vector<16xf32>
    %77 = vector.shape_cast %76 : vector<16xf32> to vector<16x1xf32>
    %78 = vector.broadcast %77 : vector<16x1xf32> to vector<16x16xf32>
    %79 = arith.subf %75, %78 : vector<16x16xf32>
    %80 = math.exp %79 : vector<16x16xf32>
    %cst_46 = arith.constant dense<0.000000e+00> : vector<16xf32>
    %81 = vector.multi_reduction <add>, %80, %cst_46 [1] : vector<16x16xf32> to vector<16xf32>
    %82 = vector.shape_cast %81 : vector<16xf32> to vector<16x1xf32>
    %83 = arith.truncf %80 : vector<16x16xf32> to vector<16x16xbf16>
    %cst_47 = arith.constant dense<0.000000e+00> : vector<16x32xf32>
    %84 = tpu.matmul %83, %72, %cst_47 {dimension_numbers = #tpu.dot_dimension_numbers<[1], [0], [0], [1], [0, 0, 1, 1], [], []>} : vector<16x16xbf16>, vector<16x32xbf16>, vector<16x32xf32> -> vector<16x32xf32>
    %85 = tpu.reciprocal %82 : vector<16x1xf32> -> vector<16x1xf32>
    %86 = vector.broadcast %85 : vector<16x1xf32> to vector<16x32xf32>
    %87 = arith.mulf %84, %86 : vector<16x32xf32>
    %88 = arith.truncf %87 : vector<16x32xf32> to vector<16x32xbf16>
    %c0_48 = arith.constant 0 : index
    %c96_49 = arith.constant 96 : index
    %89 = vector.load %arg6[%c0_48, %c96_49] : memref<16x128xbf16, #tpu.memory_space<vmem>>, vector<16x32xbf16>
    tpu.vector_store %arg6[%c0_48, %c96_49], %88 {strides = array<i32>} : memref<16x128xbf16, #tpu.memory_space<vmem>>, vector<16x32xbf16>,
    return
  }
  func.func @transform_0(%arg0: i32, %arg1: i32) -> (i32, i32) {
    %c0_i32 = arith.constant 0 : i32
    %0 = arith.addi %c0_i32, %arg1 : i32
    %c0_i32_0 = arith.constant 0 : i32
    return %arg0, %0 : i32, i32
  }
  func.func @transform_1(%arg0: i32, %arg1: i32) -> (i32, i32) {
    %c1_i32 = arith.constant 1 : i32
    %0 = arith.addi %c1_i32, %arg1 : i32
    %c0_i32 = arith.constant 0 : i32
    return %arg0, %0 : i32, i32
  }
  func.func @transform_2(%arg0: i32, %arg1: i32) -> (i32, i32) {
    %c2_i32 = arith.constant 2 : i32
    %0 = arith.addi %c2_i32, %arg1 : i32
    %c0_i32 = arith.constant 0 : i32
    return %arg0, %0 : i32, i32
  }
  func.func @transform_3(%arg0: i32, %arg1: i32) -> (i32, i32, i32) {
    %c0_i32 = arith.constant 0 : i32
    %c0_i32_0 = arith.constant 0 : i32
    %c0_i32_1 = arith.constant 0 : i32
    return %arg0, %c0_i32, %c0_i32_0 : i32, i32, i32
  }
  func.func @transform_4(%arg0: i32, %arg1: i32) -> (i32, i32) {
    %c0_i32 = arith.constant 0 : i32
    return %arg0, %arg1 : i32, i32
  }
}

module attributes {stable_mosaic.version = 11 : i64} {
  func.func @_matmul_kernel(%arg0: i32, %arg1: i32, %arg2: i32, %arg3: memref<32x128xbf16, #tpu.memory_space<vmem>>, %arg4: memref<128x128xbf16, #tpu.memory_space<vmem>>, %arg5: memref<1x128xf32, #tpu.memory_space<vmem>>, %arg6: memref<32x128xbf16, #tpu.memory_space<vmem>>, %arg7: memref<32x128xf32, #tpu.memory_space<vmem>>) attributes {dimension_semantics = [#tpu.dimension_semantics<parallel>, #tpu.dimension_semantics<parallel>, #tpu.dimension_semantics<arbitrary>], iteration_bounds = array<i64: 1, 1, 1>, scalar_prefetch = 0 : i64, scratch_operands = 1 : i64, tpu.core_type = #tpu.core_type<tc>, window_params = [{transform_indices = @transform_0, window_bounds = array<i64: 32, 128>}, {transform_indices = @transform_1, window_bounds = array<i64: 128, 128>}, {transform_indices = @transform_2, window_bounds = array<i64: 1, 128>}, {transform_indices = @transform_3, window_bounds = array<i64: 32, 128>}]} {
    %c0_i32 = arith.constant 0 : i32
    %0 = arith.cmpi eq, %arg2, %c0_i32 : i32
    %1 = arith.extui %0 : i1 to i32
    %c0_i32_0 = arith.constant 0 : i32
    %2 = arith.cmpi ne, %1, %c0_i32_0 : i32
    scf.if %2 {
      %cst_10 = arith.constant 0.000000e+00 : f32
      %12 = vector.broadcast %cst_10 : f32 to vector<32x128xf32>
      %c0_11 = arith.constant 0 : index
      %c0_12 = arith.constant 0 : index
      %13 = vector.load %arg7[%c0_11, %c0_12] : memref<32x128xf32, #tpu.memory_space<vmem>>, vector<32x128xf32>
      tpu.vector_store %arg7[%c0_11, %c0_12], %12 {strides = array<i32>} : memref<32x128xf32, #tpu.memory_space<vmem>>, vector<32x128xf32>,
    } else {
    }
    %c0 = arith.constant 0 : index
    %c0_1 = arith.constant 0 : index
    %3 = vector.load %arg7[%c0, %c0_1] : memref<32x128xf32, #tpu.memory_space<vmem>>, vector<32x128xf32>
    %c0_2 = arith.constant 0 : index
    %c0_3 = arith.constant 0 : index
    %4 = vector.load %arg3[%c0_2, %c0_3] : memref<32x128xbf16, #tpu.memory_space<vmem>>, vector<32x128xbf16>
    %c0_4 = arith.constant 0 : index
    %c0_5 = arith.constant 0 : index
    %5 = vector.load %arg4[%c0_4, %c0_5] : memref<128x128xbf16, #tpu.memory_space<vmem>>, vector<128x128xbf16>
    %cst = arith.constant dense<0.000000e+00> : vector<32x128xf32>
    %6 = tpu.matmul %4, %5, %cst {dimension_numbers = #tpu.dot_dimension_numbers<[1], [0], [0], [1], [0, 0, 1, 1], [], []>} : vector<32x128xbf16>, vector<128x128xbf16>, vector<32x128xf32> -> vector<32x128xf32>
    %7 = arith.addf %3, %6 : vector<32x128xf32>
    %c0_6 = arith.constant 0 : index
    %c0_7 = arith.constant 0 : index
    %8 = vector.load %arg7[%c0_6, %c0_7] : memref<32x128xf32, #tpu.memory_space<vmem>>, vector<32x128xf32>
    tpu.vector_store %arg7[%c0_6, %c0_7], %7 {strides = array<i32>} : memref<32x128xf32, #tpu.memory_space<vmem>>, vector<32x128xf32>,
    %c0_i32_8 = arith.constant 0 : i32
    %9 = arith.cmpi eq, %arg2, %c0_i32_8 : i32
    %10 = arith.extui %9 : i1 to i32
    %c0_i32_9 = arith.constant 0 : i32
    %11 = arith.cmpi ne, %10, %c0_i32_9 : i32
    scf.if %11 {
      %c0_10 = arith.constant 0 : index
      %c0_11 = arith.constant 0 : index
      %12 = vector.load %arg7[%c0_10, %c0_11] : memref<32x128xf32, #tpu.memory_space<vmem>>, vector<32x128xf32>
      %c0_12 = arith.constant 0 : index
      %c0_13 = arith.constant 0 : index
      %13 = vector.load %arg5[%c0_12, %c0_13] : memref<1x128xf32, #tpu.memory_space<vmem>>, vector<1x128xf32>
      %14 = vector.broadcast %13 : vector<1x128xf32> to vector<32x128xf32>
      %15 = arith.addf %12, %14 : vector<32x128xf32>
      %16 = arith.truncf %15 : vector<32x128xf32> to vector<32x128xbf16>
      %c0_14 = arith.constant 0 : index
      %c0_15 = arith.constant 0 : index
      %17 = vector.load %arg6[%c0_14, %c0_15] : memref<32x128xbf16, #tpu.memory_space<vmem>>, vector<32x128xbf16>
      tpu.vector_store %arg6[%c0_14, %c0_15], %16 {strides = array<i32>} : memref<32x128xbf16, #tpu.memory_space<vmem>>, vector<32x128xbf16>,
    } else {
    }
    return
  }
  func.func @transform_0(%arg0: i32, %arg1: i32, %arg2: i32) -> (i32, i32) {
    %c0_i32 = arith.constant 0 : i32
    return %arg0, %arg2 : i32, i32
  }
  func.func @transform_1(%arg0: i32, %arg1: i32, %arg2: i32) -> (i32, i32) {
    %c0_i32 = arith.constant 0 : i32
    return %arg2, %arg1 : i32, i32
  }
  func.func @transform_2(%arg0: i32, %arg1: i32, %arg2: i32) -> (i32, i32) {
    %c0_i32 = arith.constant 0 : i32
    %c0_i32_0 = arith.constant 0 : i32
    return %c0_i32, %arg1 : i32, i32
  }
  func.func @transform_3(%arg0: i32, %arg1: i32, %arg2: i32) -> (i32, i32) {
    %c0_i32 = arith.constant 0 : i32
    return %arg0, %arg1 : i32, i32
  }
}

module attributes {stable_mosaic.version = 11 : i64} {
  func.func @_ln_residual_kernel(%arg0: i32, %arg1: memref<32x128xbf16, #tpu.memory_space<vmem>>, %arg2: memref<32x128xbf16, #tpu.memory_space<vmem>>, %arg3: memref<1x128xf32, #tpu.memory_space<vmem>>, %arg4: memref<1x128xf32, #tpu.memory_space<vmem>>, %arg5: memref<32x128xbf16, #tpu.memory_space<vmem>>) attributes {dimension_semantics = [#tpu.dimension_semantics<parallel>], iteration_bounds = array<i64: 1>, scalar_prefetch = 0 : i64, scratch_operands = 0 : i64, tpu.core_type = #tpu.core_type<tc>, window_params = [{transform_indices = @transform_0, window_bounds = array<i64: 32, 128>}, {transform_indices = @transform_1, window_bounds = array<i64: 32, 128>}, {pipeline_mode = #tpu.pipeline_mode<synchronous>, transform_indices = @transform_2, window_bounds = array<i64: 1, 128>}, {pipeline_mode = #tpu.pipeline_mode<synchronous>, transform_indices = @transform_3, window_bounds = array<i64: 1, 128>}, {transform_indices = @transform_4, window_bounds = array<i64: 32, 128>}]} {
    %c0 = arith.constant 0 : index
    %c0_0 = arith.constant 0 : index
    %0 = vector.load %arg1[%c0, %c0_0] : memref<32x128xbf16, #tpu.memory_space<vmem>>, vector<32x128xbf16>
    %1 = arith.extf %0 : vector<32x128xbf16> to vector<32x128xf32>
    %c0_1 = arith.constant 0 : index
    %c0_2 = arith.constant 0 : index
    %2 = vector.load %arg2[%c0_1, %c0_2] : memref<32x128xbf16, #tpu.memory_space<vmem>>, vector<32x128xbf16>
    %3 = arith.extf %2 : vector<32x128xbf16> to vector<32x128xf32>
    %4 = arith.addf %1, %3 : vector<32x128xf32>
    %cst = arith.constant dense<0.000000e+00> : vector<32xf32>
    %5 = vector.multi_reduction <add>, %4, %cst [1] : vector<32x128xf32> to vector<32xf32>
    %6 = vector.shape_cast %5 : vector<32xf32> to vector<32x1xf32>
    %cst_3 = arith.constant 1.280000e+02 : f32
    %7 = vector.broadcast %cst_3 : f32 to vector<32x1xf32>
    %8 = arith.divf %6, %7 : vector<32x1xf32>
    %9 = vector.broadcast %8 : vector<32x1xf32> to vector<32x128xf32>
    %10 = arith.subf %4, %9 : vector<32x128xf32>
    %11 = arith.mulf %10, %10 : vector<32x128xf32>
    %cst_4 = arith.constant dense<0.000000e+00> : vector<32xf32>
    %12 = vector.multi_reduction <add>, %11, %cst_4 [1] : vector<32x128xf32> to vector<32xf32>
    %13 = vector.shape_cast %12 : vector<32xf32> to vector<32x1xf32>
    %cst_5 = arith.constant 1.280000e+02 : f32
    %14 = vector.broadcast %cst_5 : f32 to vector<32x1xf32>
    %15 = arith.divf %13, %14 : vector<32x1xf32>
    %16 = vector.broadcast %8 : vector<32x1xf32> to vector<32x128xf32>
    %17 = arith.subf %4, %16 : vector<32x128xf32>
    %cst_6 = arith.constant 9.99999974E-6 : f32
    %18 = vector.broadcast %cst_6 : f32 to vector<32x1xf32>
    %19 = arith.addf %15, %18 : vector<32x1xf32>
    %20 = math.rsqrt %19 : vector<32x1xf32>
    %21 = vector.broadcast %20 : vector<32x1xf32> to vector<32x128xf32>
    %22 = arith.mulf %17, %21 : vector<32x128xf32>
    %c0_7 = arith.constant 0 : index
    %c0_8 = arith.constant 0 : index
    %23 = vector.load %arg3[%c0_7, %c0_8] : memref<1x128xf32, #tpu.memory_space<vmem>>, vector<1x128xf32>
    %24 = vector.broadcast %23 : vector<1x128xf32> to vector<32x128xf32>
    %25 = arith.mulf %22, %24 : vector<32x128xf32>
    %c0_9 = arith.constant 0 : index
    %c0_10 = arith.constant 0 : index
    %26 = vector.load %arg4[%c0_9, %c0_10] : memref<1x128xf32, #tpu.memory_space<vmem>>, vector<1x128xf32>
    %27 = vector.broadcast %26 : vector<1x128xf32> to vector<32x128xf32>
    %28 = arith.addf %25, %27 : vector<32x128xf32>
    %29 = arith.truncf %28 : vector<32x128xf32> to vector<32x128xbf16>
    %c0_11 = arith.constant 0 : index
    %c0_12 = arith.constant 0 : index
    %30 = vector.load %arg5[%c0_11, %c0_12] : memref<32x128xbf16, #tpu.memory_space<vmem>>, vector<32x128xbf16>
    tpu.vector_store %arg5[%c0_11, %c0_12], %29 {strides = array<i32>} : memref<32x128xbf16, #tpu.memory_space<vmem>>, vector<32x128xbf16>,
    return
  }
  func.func @transform_0(%arg0: i32) -> (i32, i32) {
    %c0_i32 = arith.constant 0 : i32
    %c0_i32_0 = arith.constant 0 : i32
    return %arg0, %c0_i32 : i32, i32
  }
  func.func @transform_1(%arg0: i32) -> (i32, i32) {
    %c0_i32 = arith.constant 0 : i32
    %c0_i32_0 = arith.constant 0 : i32
    return %arg0, %c0_i32 : i32, i32
  }
  func.func @transform_2(%arg0: i32) -> (i32, i32) {
    %c0_i32 = arith.constant 0 : i32
    %c0_i32_0 = arith.constant 0 : i32
    %c0_i32_1 = arith.constant 0 : i32
    return %c0_i32, %c0_i32_0 : i32, i32
  }
  func.func @transform_3(%arg0: i32) -> (i32, i32) {
    %c0_i32 = arith.constant 0 : i32
    %c0_i32_0 = arith.constant 0 : i32
    %c0_i32_1 = arith.constant 0 : i32
    return %c0_i32, %c0_i32_0 : i32, i32
  }
  func.func @transform_4(%arg0: i32) -> (i32, i32) {
    %c0_i32 = arith.constant 0 : i32
    %c0_i32_0 = arith.constant 0 : i32
    return %arg0, %c0_i32 : i32, i32
  }
}

module attributes {stable_mosaic.version = 11 : i64} {
  func.func @_matmul_kernel(%arg0: i32, %arg1: i32, %arg2: i32, %arg3: memref<32x128xbf16, #tpu.memory_space<vmem>>, %arg4: memref<128x256xbf16, #tpu.memory_space<vmem>>, %arg5: memref<1x256xf32, #tpu.memory_space<vmem>>, %arg6: memref<32x256xbf16, #tpu.memory_space<vmem>>, %arg7: memref<32x256xf32, #tpu.memory_space<vmem>>) attributes {dimension_semantics = [#tpu.dimension_semantics<parallel>, #tpu.dimension_semantics<parallel>, #tpu.dimension_semantics<arbitrary>], iteration_bounds = array<i64: 1, 1, 1>, scalar_prefetch = 0 : i64, scratch_operands = 1 : i64, tpu.core_type = #tpu.core_type<tc>, window_params = [{transform_indices = @transform_0, window_bounds = array<i64: 32, 128>}, {transform_indices = @transform_1, window_bounds = array<i64: 128, 256>}, {transform_indices = @transform_2, window_bounds = array<i64: 1, 256>}, {transform_indices = @transform_3, window_bounds = array<i64: 32, 256>}]} {
    %c0_i32 = arith.constant 0 : i32
    %0 = arith.cmpi eq, %arg2, %c0_i32 : i32
    %1 = arith.extui %0 : i1 to i32
    %c0_i32_0 = arith.constant 0 : i32
    %2 = arith.cmpi ne, %1, %c0_i32_0 : i32
    scf.if %2 {
      %cst_10 = arith.constant 0.000000e+00 : f32
      %12 = vector.broadcast %cst_10 : f32 to vector<32x256xf32>
      %c0_11 = arith.constant 0 : index
      %c0_12 = arith.constant 0 : index
      %13 = vector.load %arg7[%c0_11, %c0_12] : memref<32x256xf32, #tpu.memory_space<vmem>>, vector<32x256xf32>
      tpu.vector_store %arg7[%c0_11, %c0_12], %12 {strides = array<i32>} : memref<32x256xf32, #tpu.memory_space<vmem>>, vector<32x256xf32>,
    } else {
    }
    %c0 = arith.constant 0 : index
    %c0_1 = arith.constant 0 : index
    %3 = vector.load %arg7[%c0, %c0_1] : memref<32x256xf32, #tpu.memory_space<vmem>>, vector<32x256xf32>
    %c0_2 = arith.constant 0 : index
    %c0_3 = arith.constant 0 : index
    %4 = vector.load %arg3[%c0_2, %c0_3] : memref<32x128xbf16, #tpu.memory_space<vmem>>, vector<32x128xbf16>
    %c0_4 = arith.constant 0 : index
    %c0_5 = arith.constant 0 : index
    %5 = vector.load %arg4[%c0_4, %c0_5] : memref<128x256xbf16, #tpu.memory_space<vmem>>, vector<128x256xbf16>
    %cst = arith.constant dense<0.000000e+00> : vector<32x256xf32>
    %6 = tpu.matmul %4, %5, %cst {dimension_numbers = #tpu.dot_dimension_numbers<[1], [0], [0], [1], [0, 0, 1, 1], [], []>} : vector<32x128xbf16>, vector<128x256xbf16>, vector<32x256xf32> -> vector<32x256xf32>
    %7 = arith.addf %3, %6 : vector<32x256xf32>
    %c0_6 = arith.constant 0 : index
    %c0_7 = arith.constant 0 : index
    %8 = vector.load %arg7[%c0_6, %c0_7] : memref<32x256xf32, #tpu.memory_space<vmem>>, vector<32x256xf32>
    tpu.vector_store %arg7[%c0_6, %c0_7], %7 {strides = array<i32>} : memref<32x256xf32, #tpu.memory_space<vmem>>, vector<32x256xf32>,
    %c0_i32_8 = arith.constant 0 : i32
    %9 = arith.cmpi eq, %arg2, %c0_i32_8 : i32
    %10 = arith.extui %9 : i1 to i32
    %c0_i32_9 = arith.constant 0 : i32
    %11 = arith.cmpi ne, %10, %c0_i32_9 : i32
    scf.if %11 {
      %c0_10 = arith.constant 0 : index
      %c0_11 = arith.constant 0 : index
      %12 = vector.load %arg7[%c0_10, %c0_11] : memref<32x256xf32, #tpu.memory_space<vmem>>, vector<32x256xf32>
      %c0_12 = arith.constant 0 : index
      %c0_13 = arith.constant 0 : index
      %13 = vector.load %arg5[%c0_12, %c0_13] : memref<1x256xf32, #tpu.memory_space<vmem>>, vector<1x256xf32>
      %14 = vector.broadcast %13 : vector<1x256xf32> to vector<32x256xf32>
      %15 = arith.addf %12, %14 : vector<32x256xf32>
      %16 = arith.mulf %15, %15 : vector<32x256xf32>
      %17 = arith.mulf %15, %16 : vector<32x256xf32>
      %cst_14 = arith.constant 4.471500e-02 : f32
      %18 = vector.broadcast %cst_14 : f32 to vector<32x256xf32>
      %19 = arith.mulf %18, %17 : vector<32x256xf32>
      %20 = arith.addf %15, %19 : vector<32x256xf32>
      %cst_15 = arith.constant 0.797884583 : f32
      %21 = vector.broadcast %cst_15 : f32 to vector<32x256xf32>
      %22 = arith.mulf %21, %20 : vector<32x256xf32>
      %23 = math.tanh %22 : vector<32x256xf32>
      %cst_16 = arith.constant 1.000000e+00 : f32
      %24 = vector.broadcast %cst_16 : f32 to vector<32x256xf32>
      %25 = arith.addf %24, %23 : vector<32x256xf32>
      %cst_17 = arith.constant 5.000000e-01 : f32
      %26 = vector.broadcast %cst_17 : f32 to vector<32x256xf32>
      %27 = arith.mulf %26, %25 : vector<32x256xf32>
      %28 = arith.mulf %15, %27 : vector<32x256xf32>
      %29 = arith.truncf %28 : vector<32x256xf32> to vector<32x256xbf16>
      %c0_18 = arith.constant 0 : index
      %c0_19 = arith.constant 0 : index
      %30 = vector.load %arg6[%c0_18, %c0_19] : memref<32x256xbf16, #tpu.memory_space<vmem>>, vector<32x256xbf16>
      tpu.vector_store %arg6[%c0_18, %c0_19], %29 {strides = array<i32>} : memref<32x256xbf16, #tpu.memory_space<vmem>>, vector<32x256xbf16>,
    } else {
    }
    return
  }
  func.func @transform_0(%arg0: i32, %arg1: i32, %arg2: i32) -> (i32, i32) {
    %c0_i32 = arith.constant 0 : i32
    return %arg0, %arg2 : i32, i32
  }
  func.func @transform_1(%arg0: i32, %arg1: i32, %arg2: i32) -> (i32, i32) {
    %c0_i32 = arith.constant 0 : i32
    return %arg2, %arg1 : i32, i32
  }
  func.func @transform_2(%arg0: i32, %arg1: i32, %arg2: i32) -> (i32, i32) {
    %c0_i32 = arith.constant 0 : i32
    %c0_i32_0 = arith.constant 0 : i32
    return %c0_i32, %arg1 : i32, i32
  }
  func.func @transform_3(%arg0: i32, %arg1: i32, %arg2: i32) -> (i32, i32) {
    %c0_i32 = arith.constant 0 : i32
    return %arg0, %arg1 : i32, i32
  }
}

module attributes {stable_mosaic.version = 11 : i64} {
  func.func @_matmul_kernel(%arg0: i32, %arg1: i32, %arg2: i32, %arg3: memref<32x256xbf16, #tpu.memory_space<vmem>>, %arg4: memref<256x128xbf16, #tpu.memory_space<vmem>>, %arg5: memref<1x128xf32, #tpu.memory_space<vmem>>, %arg6: memref<32x128xbf16, #tpu.memory_space<vmem>>, %arg7: memref<32x128xf32, #tpu.memory_space<vmem>>) attributes {dimension_semantics = [#tpu.dimension_semantics<parallel>, #tpu.dimension_semantics<parallel>, #tpu.dimension_semantics<arbitrary>], iteration_bounds = array<i64: 1, 1, 1>, scalar_prefetch = 0 : i64, scratch_operands = 1 : i64, tpu.core_type = #tpu.core_type<tc>, window_params = [{transform_indices = @transform_0, window_bounds = array<i64: 32, 256>}, {transform_indices = @transform_1, window_bounds = array<i64: 256, 128>}, {transform_indices = @transform_2, window_bounds = array<i64: 1, 128>}, {transform_indices = @transform_3, window_bounds = array<i64: 32, 128>}]} {
    %c0_i32 = arith.constant 0 : i32
    %0 = arith.cmpi eq, %arg2, %c0_i32 : i32
    %1 = arith.extui %0 : i1 to i32
    %c0_i32_0 = arith.constant 0 : i32
    %2 = arith.cmpi ne, %1, %c0_i32_0 : i32
    scf.if %2 {
      %cst_10 = arith.constant 0.000000e+00 : f32
      %12 = vector.broadcast %cst_10 : f32 to vector<32x128xf32>
      %c0_11 = arith.constant 0 : index
      %c0_12 = arith.constant 0 : index
      %13 = vector.load %arg7[%c0_11, %c0_12] : memref<32x128xf32, #tpu.memory_space<vmem>>, vector<32x128xf32>
      tpu.vector_store %arg7[%c0_11, %c0_12], %12 {strides = array<i32>} : memref<32x128xf32, #tpu.memory_space<vmem>>, vector<32x128xf32>,
    } else {
    }
    %c0 = arith.constant 0 : index
    %c0_1 = arith.constant 0 : index
    %3 = vector.load %arg7[%c0, %c0_1] : memref<32x128xf32, #tpu.memory_space<vmem>>, vector<32x128xf32>
    %c0_2 = arith.constant 0 : index
    %c0_3 = arith.constant 0 : index
    %4 = vector.load %arg3[%c0_2, %c0_3] : memref<32x256xbf16, #tpu.memory_space<vmem>>, vector<32x256xbf16>
    %c0_4 = arith.constant 0 : index
    %c0_5 = arith.constant 0 : index
    %5 = vector.load %arg4[%c0_4, %c0_5] : memref<256x128xbf16, #tpu.memory_space<vmem>>, vector<256x128xbf16>
    %cst = arith.constant dense<0.000000e+00> : vector<32x128xf32>
    %6 = tpu.matmul %4, %5, %cst {dimension_numbers = #tpu.dot_dimension_numbers<[1], [0], [0], [1], [0, 0, 1, 1], [], []>} : vector<32x256xbf16>, vector<256x128xbf16>, vector<32x128xf32> -> vector<32x128xf32>
    %7 = arith.addf %3, %6 : vector<32x128xf32>
    %c0_6 = arith.constant 0 : index
    %c0_7 = arith.constant 0 : index
    %8 = vector.load %arg7[%c0_6, %c0_7] : memref<32x128xf32, #tpu.memory_space<vmem>>, vector<32x128xf32>
    tpu.vector_store %arg7[%c0_6, %c0_7], %7 {strides = array<i32>} : memref<32x128xf32, #tpu.memory_space<vmem>>, vector<32x128xf32>,
    %c0_i32_8 = arith.constant 0 : i32
    %9 = arith.cmpi eq, %arg2, %c0_i32_8 : i32
    %10 = arith.extui %9 : i1 to i32
    %c0_i32_9 = arith.constant 0 : i32
    %11 = arith.cmpi ne, %10, %c0_i32_9 : i32
    scf.if %11 {
      %c0_10 = arith.constant 0 : index
      %c0_11 = arith.constant 0 : index
      %12 = vector.load %arg7[%c0_10, %c0_11] : memref<32x128xf32, #tpu.memory_space<vmem>>, vector<32x128xf32>
      %c0_12 = arith.constant 0 : index
      %c0_13 = arith.constant 0 : index
      %13 = vector.load %arg5[%c0_12, %c0_13] : memref<1x128xf32, #tpu.memory_space<vmem>>, vector<1x128xf32>
      %14 = vector.broadcast %13 : vector<1x128xf32> to vector<32x128xf32>
      %15 = arith.addf %12, %14 : vector<32x128xf32>
      %16 = arith.truncf %15 : vector<32x128xf32> to vector<32x128xbf16>
      %c0_14 = arith.constant 0 : index
      %c0_15 = arith.constant 0 : index
      %17 = vector.load %arg6[%c0_14, %c0_15] : memref<32x128xbf16, #tpu.memory_space<vmem>>, vector<32x128xbf16>
      tpu.vector_store %arg6[%c0_14, %c0_15], %16 {strides = array<i32>} : memref<32x128xbf16, #tpu.memory_space<vmem>>, vector<32x128xbf16>,
    } else {
    }
    return
  }
  func.func @transform_0(%arg0: i32, %arg1: i32, %arg2: i32) -> (i32, i32) {
    %c0_i32 = arith.constant 0 : i32
    return %arg0, %arg2 : i32, i32
  }
  func.func @transform_1(%arg0: i32, %arg1: i32, %arg2: i32) -> (i32, i32) {
    %c0_i32 = arith.constant 0 : i32
    return %arg2, %arg1 : i32, i32
  }
  func.func @transform_2(%arg0: i32, %arg1: i32, %arg2: i32) -> (i32, i32) {
    %c0_i32 = arith.constant 0 : i32
    %c0_i32_0 = arith.constant 0 : i32
    return %c0_i32, %arg1 : i32, i32
  }
  func.func @transform_3(%arg0: i32, %arg1: i32, %arg2: i32) -> (i32, i32) {
    %c0_i32 = arith.constant 0 : i32
    return %arg0, %arg1 : i32, i32
  }
}

</mosaic_0001>

<bundles_post_ra>
// kernel: model_sub_forward.15
= control target key start
LH: loop header
LB: loop body
LE: loop exit
PB: predicated region body
PF: predicated region fallthrough
CT: control target
= control target key end

     0   :  { %8 = vsyncpa [#allocation3], 0  ;;  %s375_s0 = inlined_call_operand.hbm [shape: f32[32,128], index: 0, kind: input, shape index: {}]   ;;  %s376_s1 = inlined_call_operand.hbm [shape: f32[1,128], index: 1, kind: input, shape index: {}]   ;;  %s377_s2 = inlined_call_operand.hbm [shape: f32[1,128], index: 2, kind: input, shape index: {}]   ;;  %s378_s3 = inlined_call_operand.hbm [shape: bf16[32,128], index: 3, kind: output, shape index: {}]  }
   0x1   :  { %9 = vsyncpa [#allocation6], 0 }
   0x2   :  { %10 = vsyncpa [#allocation4], 0  ;;  %s292_s12 = smov [#allocation5]   ;;  %s293_s14 = smov [#allocation2]  }
   0x3   :  { %s29_s13 = sshll.u32 %s292_s12, 4  ;;  %s16_s15 = sshll.u32 %s293_s14, 4  ;;  %s30_s13 = int_to_ptr.vmem [resolvable:$true] %s29_s13  ;;  %s320_s15 = int_to_ptr.vmem [resolvable:$true] %s16_s15 }
   0x4   :  { %s198_s18 = scalar_lea.hbm %s376_s1, 16 }
   0x5   :  { %p199_p0 = scmp.ne.s32.totalorder %s376_s1, %s198_s18  ;;  %p202_p1 = scmp.lt.u32.totalorder %s198_s18, %s376_s1 }
   0x7   :  { %p204_p2 = pnand %p202_p1, %p199_p0 }
   0x9   :  { %207 = shalt.err (!%p204_p2)
}
   0xa   :  { %s208_s23 = scalar_lea.vmem %s30_s13, 16  ;;  %s212_s24 = scalar_lea.vmem %s30_s13, 32 }
   0xb   :  { %p209_p3 = scmp.ne.s32.totalorder %s30_s13, %s208_s23  ;;  %p213_p4 = scmp.lt.s32.totalorder %s30_s13, %s30_s13 }
   0xc   :  { %p214_p5 = scmp.lt.s32.totalorder %s212_s24, %s208_s23 }
   0xe   :  { %p215_p6 = por %p214_p5, %p213_p4 }
  0x10   :  { %p216_p7 = pnand %p215_p6, %p209_p3 }
  0x12   :  { %219 = shalt.err (!%p216_p7)
}
  0x13   :  { %32 = dma.hbm_to_vmem [thread:$0]  %s376_s1, 16, %s30_s13, [#allocation6]  }
  0x14   :  { %s220_s29 = scalar_lea.hbm %s375_s0, 512 }
  0x15   :  { %p221_p8 = scmp.ne.s32.totalorder %s375_s0, %s220_s29  ;;  %p224_p9 = scmp.lt.u32.totalorder %s220_s29, %s375_s0 }
  0x17   :  { %p226_p10 = pnand %p224_p9, %p221_p8 }
  0x19   :  { %229 = shalt.err (!%p226_p10)
}
  0x1a   :  { %s230_s7 = scalar_lea.vmem %s320_s15, 512  ;;  %p235_p12 = scmp.lt.s32.totalorder %s320_s15, %s320_s15 }
  0x1b   :  { %p231_p11 = scmp.ne.s32.totalorder %s320_s15, %s230_s7  ;;  %p236_p13 = scmp.lt.s32.totalorder %s230_s7, %s230_s7 }
  0x1d   :  { %p237_p0 = por %p236_p13, %p235_p12 }
  0x1f   :  { %p238_p1 = pnand %p237_p0, %p231_p11 }
  0x21   :  { %241 = shalt.err (!%p238_p1)
}
  0x22   :  { %s294_s1 = smov 128   ;;  %s295_s8 = smov 8  }
  0x23   :  { %22 = dma.hbm_to_vmem [thread:$0]  %s375_s0, 512, %s320_s15, [#allocation3], %s294_s1, %s294_s1, %s295_s8  }
  0x24   :  { %s296_s11 = smov [#allocation7]   ;;  %s242_s16 = scalar_lea.hbm %s377_s2, 16 }
  0x25   :  { %s39_s12 = sshll.u32 %s296_s11, 4  ;;  %p243_p2 = scmp.ne.s32.totalorder %s377_s2, %s242_s16  ;;  %s40_s12 = int_to_ptr.vmem [resolvable:$true] %s39_s12 }
  0x26   :  { %p246_p3 = scmp.lt.u32.totalorder %s242_s16, %s377_s2 }
  0x28   :  { %p248_p4 = pnand %p246_p3, %p243_p2 }
  0x2a   :  { %251 = shalt.err (!%p248_p4)
}
  0x2b   :  { %s252_s21 = scalar_lea.vmem %s40_s12, 16  ;;  %s256_s0 = scalar_lea.vmem %s40_s12, 32 }
  0x2c   :  { %p253_p5 = scmp.ne.s32.totalorder %s40_s12, %s252_s21  ;;  %p257_p6 = scmp.lt.s32.totalorder %s40_s12, %s40_s12 }
  0x2d   :  { %p258_p7 = scmp.lt.s32.totalorder %s256_s0, %s252_s21 }
  0x2f   :  { %p259_p8 = por %p258_p7, %p257_p6 }
  0x31   :  { %p260_p9 = pnand %p259_p8, %p253_p5 }
  0x33   :  { %263 = shalt.err (!%p260_p9)
}
  0x34   :  { %42 = dma.hbm_to_vmem [thread:$0]  %s377_s2, 16, %s40_s12, [#allocation6]  }
  0x35   :  { %286 = dma.done.wait [#allocation3], 512  }
  0x36   :  { %287 = vsyncadd [#allocation3], 4294966784 }
  0x37   :  { %288 = dma.done.wait [#allocation6], 32  }
  0x38   :  { %289 = vsyncadd [#allocation6], 4294967264  ;;  %v52_v0 = vld [vmem:[#allocation2] sm:$0xff]  ;;  %v54_v1 = vld [vmem:[#allocation2 + $0x10] sm:$0xff]  ;;  %s297_s2 = smov [#allocation8]  }
  0x39   :  { %56 = vadd.xlane.f32.xlu0 %v52_v0  ;;  %60 = vadd.xlane.f32.xlu1 %v54_v1  ;;  %v53_v2 = vld [vmem:[#allocation2 + $0x8] sm:$0xff]  ;;  %v55_v3 = vld [vmem:[#allocation2 + $0x18] sm:$0xff]  ;;  %v161_v34 = vld [vmem:[#allocation5] ss:$0 sm:$0xff]  ;;  %s148_s23 = sshll.u32 %s297_s2, 4  ;;  %s149_s23 = int_to_ptr.vmem [resolvable:$true] %s148_s23 }
  0x3a   :  { %v162_v40 = vld [vmem:[#allocation7] ss:$0 sm:$0xff]  ;;  %s264_s24 = scalar_lea.vmem %s149_s23, 256  ;;  %p269_p11 = scmp.lt.s32.totalorder %s149_s23, %s149_s23 }
  0x3b   :  { %p265_p10 = scmp.ne.s32.totalorder %s149_s23, %s264_s24  ;;  %p270_p12 = scmp.lt.s32.totalorder %s264_s24, %s264_s24 }
  0x3d   :  { %58 = vadd.xlane.f32.xlu0 %v53_v2  ;;  %62 = vadd.xlane.f32.xlu1 %v55_v3  ;;  %p271_p13 = por %p270_p12, %p269_p11 }
  0x3f   :  { %p272_p0 = pnand %p271_p13, %p265_p10 }
  0xc6   :  { %v57_v4 = vpop.xlane.xlu0 %56  ;;  %v61_v5 = vpop.xlane.xlu1 %60 }
  0xc7   :  { %v65_v6 = vmul.f32 0.0078125, %v57_v4  ;;  %v67_v7 = vmul.f32 0.0078125, %v61_v5 }
  0xc9   :  { %v69_v8 = vsub.f32 %v52_v0, %v65_v6  ;;  %v71_v9 = vsub.f32 %v54_v1, %v67_v7 }
  0xca   :  { %v59_v10 = vpop.xlane.xlu0 %58  ;;  %v63_v11 = vpop.xlane.xlu1 %62 }
  0xcb   :  { %v66_v12 = vmul.f32 0.0078125, %v59_v10  ;;  %v73_v13 = vmul.f32 %v69_v8, %v69_v8  ;;  %v68_v14 = vmul.f32 0.0078125, %v63_v11  ;;  %v75_v17 = vmul.f32 %v71_v9, %v71_v9 }
  0xcd   :  { %v70_v15 = vsub.f32 %v53_v2, %v66_v12  ;;  %77 = vadd.xlane.f32.xlu0 %v73_v13  ;;  %v72_v16 = vsub.f32 %v55_v3, %v68_v14 }
  0xcf   :  { %v74_v18 = vmul.f32 %v70_v15, %v70_v15  ;;  %v76_v19 = vmul.f32 %v72_v16, %v72_v16 }
  0xd1   :  { %81 = vadd.xlane.f32.xlu0 %v75_v17  ;;  %79 = vadd.xlane.f32.xlu1 %v74_v18 }
  0xd5   :  { %83 = vadd.xlane.f32.xlu1 %v76_v19 }
 0x15a   :  { %v78_v20 = vpop.xlane.xlu0 %77 }
 0x15b   :  { %v85_v21 = vmul.f32 0.0078125, %v78_v20 }
 0x15d   :  { %v89_v22 = vadd.f32 1e-05, %v85_v21 }
 0x15e   :  { %v80_v23 = vpop.xlane.xlu1 %79  ;;  %v82_v24 = vpop.xlane.xlu0 %81 }
 0x15f   :  { %190 = vrsqrt.f32 %v89_v22  ;;  %v86_v25 = vmul.f32 0.0078125, %v80_v23  ;;  %v87_v26 = vmul.f32 0.0078125, %v82_v24 }
 0x161   :  { %v90_v27 = vadd.f32 1e-05, %v86_v25  ;;  %v91_v28 = vadd.f32 1e-05, %v87_v26 }
 0x162   :  { %v84_v29 = vpop.xlane.xlu1 %83 }
 0x163   :  { %192 = vrsqrt.f32 %v90_v27  ;;  %v88_v30 = vmul.f32 0.0078125, %v84_v29 }
 0x164   :  { %194 = vrsqrt.f32 %v91_v28 }
 0x165   :  { %v92_v31 = vadd.f32 1e-05, %v88_v30 }
 0x167   :  { %196 = vrsqrt.f32 %v92_v31 }
 0x169   :  { %v191_v32 = vpop.eup %190 }
 0x16a   :  { %v97_v33 = vmul.f32 %v191_v32, %v69_v8 }
 0x16c   :  { %v108_v38 = vmul.f32 %v161_v34, %v97_v33 }
 0x16d   :  { %v193_v35 = vpop.eup %192 }
 0x16e   :  { %v195_v36 = vpop.eup %194  ;;  %v98_v37 = vmul.f32 %v193_v35, %v70_v15  ;;  %v119_v45 = vadd.f32 %v162_v40, %v108_v38 }
 0x16f   :  { %v99_v39 = vmul.f32 %v195_v36, %v71_v9 }
 0x170   :  { %v109_v41 = vmul.f32 %v161_v34, %v98_v37 }
 0x171   :  { %v197_v42 = vpop.eup %196  ;;  %v110_v43 = vmul.f32 %v161_v34, %v99_v39 }
 0x172   :  { %v100_v44 = vmul.f32 %v197_v42, %v72_v16  ;;  %v120_v46 = vadd.f32 %v162_v40, %v109_v41 }
 0x173   :  { %v121_v49 = vadd.f32 %v162_v40, %v110_v43 }
 0x174   :  { %v111_v47 = vmul.f32 %v161_v34, %v100_v44  ;;  %v174_v48 = vpack.c.bf16 %v120_v46, %v119_v45 }
 0x176   :  { %v122_v50 = vadd.f32 %v162_v40, %v111_v47  ;;  %175 = vst [vmem:[#allocation8] sm:$0xff] %v174_v48  }
 0x178   :  { %v179_v51 = vpack.c.bf16 %v122_v50, %v121_v49 }
 0x17a   :  { %181 = vst [vmem:[#allocation8 + $0x8] sm:$0xff] %v179_v51  }
 0x17b   :  { %275 = shalt.err (!%p272_p0)
}
 0x17c   :  { %s276_s27 = scalar_lea.hbm %s378_s3, 256 }
 0x17d   :  { %p277_p1 = scmp.ne.s32.totalorder %s378_s3, %s276_s27  ;;  %p280_p2 = scmp.lt.u32.totalorder %s276_s27, %s378_s3 }
 0x17f   :  { %p282_p3 = pnand %p280_p2, %p277_p1 }
 0x181   :  { %285 = shalt.err (!%p282_p3)
}
 0x182   :  { %s298_s5 = smov 64   ;;  %s299_s6 = smov 4  }
 0x183   :  { %154 = dma.vmem_to_hbm [thread:$0]  %s149_s23, 256, %s378_s3, [#allocation4], %s298_s5, %s298_s5, %s299_s6  }
 0x184   :  { %290 = dma.done.wait [#allocation4], 256  }
 0x185   :  { %291 = vsyncadd [#allocation4], 4294967040 }
 0x186   :  { %158 = vsyncpa [#allocation3], 1 }
 0x187   :  { %159 = vsyncpa [#allocation6], 1 }
 0x188   :  { %160 = vsyncpa [#allocation4], 1 }

// kernel: model_sub_forward.18
= control target key start
LH: loop header
LB: loop body
LE: loop exit
PB: predicated region body
PF: predicated region fallthrough
CT: control target
= control target key end

     0   :  { %8 = vsyncpa [#allocation4], 0  ;;  %s520_s0 = inlined_call_operand.hbm [shape: bf16[32,128], index: 0, kind: input, shape index: {}]   ;;  %s521_s1 = inlined_call_operand.hbm [shape: bf16[128,128], index: 1, kind: input, shape index: {}]   ;;  %s522_s2 = inlined_call_operand.hbm [shape: f32[1,128], index: 2, kind: input, shape index: {}]   ;;  %s523_s3 = inlined_call_operand.hbm [shape: bf16[32,128], index: 3, kind: output, shape index: {}]  }
   0x1   :  { %9 = vsyncpa [#allocation7], 0 }
   0x2   :  { %10 = vsyncpa [#allocation5], 0  ;;  %s430_s12 = smov [#allocation6]   ;;  %s431_s14 = smov [#allocation3]  }
   0x3   :  { %s28_s13 = sshll.u32 %s430_s12, 4  ;;  %s16_s15 = sshll.u32 %s431_s14, 4  ;;  %s29_s13 = int_to_ptr.vmem [resolvable:$true] %s28_s13  ;;  %s456_s15 = int_to_ptr.vmem [resolvable:$true] %s16_s15 }
   0x4   :  { %s336_s18 = scalar_lea.hbm %s521_s1, 1024 }
   0x5   :  { %p337_p0 = scmp.ne.s32.totalorder %s521_s1, %s336_s18  ;;  %p340_p1 = scmp.lt.u32.totalorder %s336_s18, %s521_s1 }
   0x7   :  { %p342_p2 = pnand %p340_p1, %p337_p0 }
   0x9   :  { %345 = shalt.err (!%p342_p2)
}
   0xa   :  { %s346_s23 = scalar_lea.vmem %s29_s13, 1024  ;;  %p351_p4 = scmp.lt.s32.totalorder %s29_s13, %s29_s13 }
   0xb   :  { %p347_p3 = scmp.ne.s32.totalorder %s29_s13, %s346_s23  ;;  %p352_p5 = scmp.lt.s32.totalorder %s346_s23, %s346_s23 }
   0xd   :  { %p353_p6 = por %p352_p5, %p351_p4 }
   0xf   :  { %p354_p7 = pnand %p353_p6, %p347_p3 }
  0x11   :  { %357 = shalt.err (!%p354_p7)
}
  0x12   :  { %s432_s24 = smov 64   ;;  %s433_s25 = smov 4  }
  0x13   :  { %34 = dma.hbm_to_vmem [thread:$0]  %s521_s1, 1024, %s29_s13, [#allocation7], %s432_s24, %s432_s24, %s433_s25  }
  0x14   :  { %s358_s30 = scalar_lea.hbm %s520_s0, 256 }
  0x15   :  { %p359_p8 = scmp.ne.s32.totalorder %s520_s0, %s358_s30  ;;  %p362_p9 = scmp.lt.u32.totalorder %s358_s30, %s520_s0 }
  0x17   :  { %p364_p10 = pnand %p362_p9, %p359_p8 }
  0x19   :  { %367 = shalt.err (!%p364_p10)
}
  0x1a   :  { %s368_s8 = scalar_lea.vmem %s456_s15, 256  ;;  %p373_p12 = scmp.lt.s32.totalorder %s456_s15, %s456_s15 }
  0x1b   :  { %p369_p11 = scmp.ne.s32.totalorder %s456_s15, %s368_s8  ;;  %p374_p13 = scmp.lt.s32.totalorder %s368_s8, %s368_s8 }
  0x1d   :  { %p375_p0 = por %p374_p13, %p373_p12 }
  0x1f   :  { %p376_p1 = pnand %p375_p0, %p369_p11 }
  0x21   :  { %379 = shalt.err (!%p376_p1)
}
  0x22   :  { %22 = dma.hbm_to_vmem [thread:$0]  %s520_s0, 256, %s456_s15, [#allocation4], %s432_s24, %s432_s24, %s433_s25  }
  0x23   :  { %s434_s10 = smov [#allocation8]   ;;  %s380_s14 = scalar_lea.hbm %s522_s2, 16 }
  0x24   :  { %s41_s11 = sshll.u32 %s434_s10, 4  ;;  %p381_p2 = scmp.ne.s32.totalorder %s522_s2, %s380_s14  ;;  %s42_s11 = int_to_ptr.vmem [resolvable:$true] %s41_s11 }
  0x25   :  { %p384_p3 = scmp.lt.u32.totalorder %s380_s14, %s522_s2 }
  0x27   :  { %p386_p4 = pnand %p384_p3, %p381_p2 }
  0x29   :  { %389 = shalt.err (!%p386_p4)
}
  0x2a   :  { %s390_s20 = scalar_lea.vmem %s42_s11, 16  ;;  %s394_s0 = scalar_lea.vmem %s42_s11, 32 }
  0x2b   :  { %p391_p5 = scmp.ne.s32.totalorder %s42_s11, %s390_s20  ;;  %p395_p6 = scmp.lt.s32.totalorder %s42_s11, %s42_s11 }
  0x2c   :  { %p396_p7 = scmp.lt.s32.totalorder %s394_s0, %s390_s20 }
  0x2e   :  { %p397_p8 = por %p396_p7, %p395_p6 }
  0x30   :  { %p398_p9 = pnand %p397_p8, %p391_p5 }
  0x32   :  { %401 = shalt.err (!%p398_p9)
}
  0x33   :  { %44 = dma.hbm_to_vmem [thread:$0]  %s522_s2, 16, %s42_s11, [#allocation7]  }
  0x34   :  { %424 = dma.done.wait [#allocation4], 256  }
  0x35   :  { %425 = vsyncadd [#allocation4], 4294967040 }
  0x36   :  { %426 = dma.done.wait [#allocation7], 1040  }
  0x37   :  { %427 = vsyncadd [#allocation7], 4294966256  ;;  %v326_v0 = vld [vmem:[#allocation6] sm:$0xff]   ;;  %v327_v1 = vld [vmem:[#allocation6 + $0x8] sm:$0xff]   ;;  %s435_s2 = smov [#allocation9]  }
  0x38   :  { %300 = vmatprep.subr.bf16.mxu0 %v326_v0  ;;  %v328_v2 = vld [vmem:[#allocation6 + $0x10] sm:$0xff]   ;;  %v329_v3 = vld [vmem:[#allocation6 + $0x18] sm:$0xff]   ;;  %v330_v5 = vld [vmem:[#allocation6 + $0x20] sm:$0xff]   ;;  %s247_s22 = sshll.u32 %s435_s2, 4  ;;  %s248_s22 = int_to_ptr.vmem [resolvable:$true] %s247_s22 }
  0x39   :  { %301 = vmatpush3.bf16.msra.mxu0 %v326_v0  ;;  %v334_v4 = vld [vmem:[#allocation3] sm:$0xff]   ;;  %v331_v6 = vld [vmem:[#allocation6 + $0x28] sm:$0xff]   ;;  %v333_v8 = vld [vmem:[#allocation6 + $0x38] sm:$0xff]   ;;  %s402_s23 = scalar_lea.vmem %s248_s22, 256  ;;  %p407_p11 = scmp.lt.s32.totalorder %s248_s22, %s248_s22 }
  0x3a   :  { %302 = vmatprep.subr.bf16.mxu0 %v327_v1  ;;  %316 = vmatprep.mubr.bf16.mxu0 %v334_v4  ;;  %v332_v7 = vld [vmem:[#allocation6 + $0x30] sm:$0xff]   ;;  %v335_v9 = vld [vmem:[#allocation3 + $0x8] sm:$0xff]   ;;  %v270_v11 = vld [vmem:[#allocation8] ss:$0 sm:$0xff]  ;;  %p403_p10 = scmp.ne.s32.totalorder %s248_s22, %s402_s23  ;;  %p408_p12 = scmp.lt.s32.totalorder %s402_s23, %s402_s23 }
  0x3c   :  { %p409_p13 = por %p408_p12, %p407_p11 }
  0x3d   :  { %303 = vmatpush3.bf16.msra.mxu0 %v327_v1 }
  0x3e   :  { %304 = vmatprep.subr.bf16.mxu0 %v328_v2  ;;  %p410_p0 = pnand %p409_p13, %p403_p10 }
  0x41   :  { %305 = vmatpush3.bf16.msra.mxu0 %v328_v2 }
  0x42   :  { %306 = vmatprep.subr.bf16.mxu0 %v329_v3 }
  0x45   :  { %307 = vmatpush3.bf16.msra.mxu0 %v329_v3 }
  0x46   :  { %308 = vmatprep.subr.bf16.mxu0 %v330_v5 }
  0x49   :  { %309 = vmatpush3.bf16.msra.mxu0 %v330_v5 }
  0x4a   :  { %310 = vmatprep.subr.bf16.mxu0 %v331_v6 }
  0x4d   :  { %311 = vmatpush3.bf16.msra.mxu0 %v331_v6 }
  0x4e   :  { %312 = vmatprep.subr.bf16.mxu0 %v332_v7 }
  0x51   :  { %313 = vmatpush3.bf16.msra.mxu0 %v332_v7 }
  0x52   :  { %314 = vmatprep.subr.bf16.mxu0 %v333_v8 }
  0x55   :  { %315 = vmatpush3.bf16.msra.mxu0 %v333_v8 }
  0x58   :  { %317 = vmatmul.mubr.bf16.vlgmr.msra.gmra.mrb[0].mxu0 %v335_v9 }
 0x12b   :  { %v318_v10 = vpop.f32.mrb[0].mxu0 }
 0x12c   :  { %v181_v12 = vpop.f32.mrb[1].mxu0  ;;  %v220_v14 = vadd.f32 %v318_v10, %v270_v11 }
 0x12d   :  { %v319_v13 = vpop.f32.mrb[2].mxu0  ;;  %v218_v17 = vadd.f32 %v270_v11, %v181_v12 }
 0x12e   :  { %v221_v15 = vadd.f32 %v319_v13, %v270_v11  ;;  %v184_v16 = vpop.f32.mrb[3].mxu0 }
 0x12f   :  { %v219_v18 = vadd.f32 %v270_v11, %v184_v16 }
 0x130   :  { %v287_v19 = vpack.c.bf16 %v221_v15, %v220_v14 }
 0x131   :  { %v282_v20 = vpack.c.bf16 %v219_v18, %v218_v17 }
 0x132   :  { %289 = vst [vmem:[#allocation9 + $0x8] sm:$0xff] %v287_v19  }
 0x133   :  { %283 = vst [vmem:[#allocation9] sm:$0xff] %v282_v20  }
 0x134   :  { %413 = shalt.err (!%p410_p0)
}
 0x135   :  { %s414_s28 = scalar_lea.hbm %s523_s3, 256 }
 0x136   :  { %p415_p1 = scmp.ne.s32.totalorder %s523_s3, %s414_s28  ;;  %p418_p2 = scmp.lt.u32.totalorder %s414_s28, %s523_s3 }
 0x138   :  { %p420_p3 = pnand %p418_p2, %p415_p1 }
 0x13a   :  { %423 = shalt.err (!%p420_p3)
}
 0x13b   :  { %253 = dma.vmem_to_hbm [thread:$0]  %s248_s22, 256, %s523_s3, [#allocation5], %s432_s24, %s432_s24, %s433_s25  }
 0x13c   :  { %428 = dma.done.wait [#allocation5], 256  }
 0x13d   :  { %429 = vsyncadd [#allocation5], 4294967040 }
 0x13e   :  { %257 = vsyncpa [#allocation4], 1 }
 0x13f   :  { %258 = vsyncpa [#allocation7], 1 }
 0x140   :  { %259 = vsyncpa [#allocation5], 1 }

// kernel: model_sub_forward.16
= control target key start
LH: loop header
LB: loop body
LE: loop exit
PB: predicated region body
PF: predicated region fallthrough
CT: control target
= control target key end

     0   :  { %8 = vsyncpa [#allocation4], 0  ;;  %s787_s0 = inlined_call_operand.hbm [shape: bf16[32,128], index: 0, kind: input, shape index: {}]   ;;  %s788_s1 = inlined_call_operand.hbm [shape: bf16[128,384], index: 1, kind: input, shape index: {}]   ;;  %s789_s2 = inlined_call_operand.hbm [shape: f32[1,384], index: 2, kind: input, shape index: {}]   ;;  %s790_s3 = inlined_call_operand.hbm [shape: bf16[32,384], index: 3, kind: output, shape index: {}]  }
   0x1   :  { %9 = vsyncpa [#allocation7], 0 }
   0x2   :  { %10 = vsyncpa [#allocation5], 0  ;;  %s704_s12 = smov [#allocation6]   ;;  %s610_s16 = scalar_lea.hbm %s788_s1, 3072 }
   0x3   :  { %s28_s13 = sshll.u32 %s704_s12, 4  ;;  %p611_p0 = scmp.ne.s32.totalorder %s788_s1, %s610_s16  ;;  %s29_s13 = int_to_ptr.vmem [resolvable:$true] %s28_s13 }
   0x4   :  { %p614_p1 = scmp.lt.u32.totalorder %s610_s16, %s788_s1 }
   0x6   :  { %p616_p2 = pnand %p614_p1, %p611_p0 }
   0x8   :  { %619 = shalt.err (!%p616_p2)
}
   0x9   :  { %s620_s21 = scalar_lea.vmem %s29_s13, 3072  ;;  %p625_p4 = scmp.lt.s32.totalorder %s29_s13, %s29_s13 }
   0xa   :  { %p621_p3 = scmp.ne.s32.totalorder %s29_s13, %s620_s21  ;;  %p626_p5 = scmp.lt.s32.totalorder %s620_s21, %s620_s21 }
   0xc   :  { %p627_p6 = por %p626_p5, %p625_p4 }
   0xe   :  { %p628_p7 = pnand %p627_p6, %p621_p3 }
  0x10   :  { %631 = shalt.err (!%p628_p7)
}
  0x11   :  { %s705_s22 = smov 192   ;;  %s706_s23 = smov 12  }
  0x12   :  { %34 = dma.hbm_to_vmem [thread:$0]  %s788_s1, 3072, %s29_s13, [#allocation7], %s705_s22, %s705_s22, %s706_s23  }
  0x13   :  { %s707_s26 = smov [#allocation3]   ;;  %s632_s30 = scalar_lea.hbm %s787_s0, 256 }
  0x14   :  { %s16_s27 = sshll.u32 %s707_s26, 4  ;;  %p633_p8 = scmp.ne.s32.totalorder %s787_s0, %s632_s30  ;;  %s17_s27 = int_to_ptr.vmem [resolvable:$true] %s16_s27 }
  0x15   :  { %p636_p9 = scmp.lt.u32.totalorder %s632_s30, %s787_s0 }
  0x17   :  { %p638_p10 = pnand %p636_p9, %p633_p8 }
  0x19   :  { %641 = shalt.err (!%p638_p10)
}
  0x1a   :  { %s642_s8 = scalar_lea.vmem %s17_s27, 256  ;;  %p647_p12 = scmp.lt.s32.totalorder %s17_s27, %s17_s27 }
  0x1b   :  { %p643_p11 = scmp.ne.s32.totalorder %s17_s27, %s642_s8  ;;  %p648_p13 = scmp.lt.s32.totalorder %s642_s8, %s642_s8 }
  0x1d   :  { %p649_p0 = por %p648_p13, %p647_p12 }
  0x1f   :  { %p650_p1 = pnand %p649_p0, %p643_p11 }
  0x21   :  { %653 = shalt.err (!%p650_p1)
}
  0x22   :  { %s708_s1 = smov 64   ;;  %s709_s9 = smov 4  }
  0x23   :  { %22 = dma.hbm_to_vmem [thread:$0]  %s787_s0, 256, %s17_s27, [#allocation4], %s708_s1, %s708_s1, %s709_s9  }
  0x24   :  { %s710_s12 = smov [#allocation8]   ;;  %s654_s16 = scalar_lea.hbm %s789_s2, 48 }
  0x25   :  { %s41_s13 = sshll.u32 %s710_s12, 4  ;;  %p655_p2 = scmp.ne.s32.totalorder %s789_s2, %s654_s16  ;;  %s42_s13 = int_to_ptr.vmem [resolvable:$true] %s41_s13 }
  0x26   :  { %p658_p3 = scmp.lt.u32.totalorder %s654_s16, %s789_s2 }
  0x28   :  { %p660_p4 = pnand %p658_p3, %p655_p2 }
  0x2a   :  { %663 = shalt.err (!%p660_p4)
}
  0x2b   :  { %s664_s21 = scalar_lea.vmem %s42_s13, 48  ;;  %s668_s0 = scalar_lea.vmem %s42_s13, 64 }
  0x2c   :  { %p665_p5 = scmp.ne.s32.totalorder %s42_s13, %s664_s21  ;;  %p669_p6 = scmp.lt.s32.totalorder %s42_s13, %s42_s13 }
  0x2d   :  { %p670_p7 = scmp.lt.s32.totalorder %s668_s0, %s664_s21 }
  0x2f   :  { %p671_p8 = por %p670_p7, %p669_p6 }
  0x31   :  { %p672_p9 = pnand %p671_p8, %p665_p5 }
  0x33   :  { %675 = shalt.err (!%p672_p9)
}
  0x34   :  { %44 = dma.hbm_to_vmem [thread:$0]  %s789_s2, 48, %s42_s13, [#allocation7]  }
  0x35   :  { %698 = dma.done.wait [#allocation4], 256  }
  0x36   :  { %699 = vsyncadd [#allocation4], 4294967040 }
  0x37   :  { %700 = dma.done.wait [#allocation7], 3120  }
  0x38   :  { %701 = vsyncadd [#allocation7], 4294964176  ;;  %v711_v0 = vmov 0   ;;  %v576_v1 = vld [vmem:[#allocation6 + $0x4] ss:$12 sps:$4 sm:$0xff]   ;;  %v609_v26 = vld [vmem:[#allocation3 + $0x8] sm:$0xff]   ;;  %v402_v27 = vlaneseq }
  0x39   :  { %291 = vmatprep.mubr.bf16.mxu0 %v711_v0  ;;  %v578_v2 = vld [vmem:[#allocation6] ss:$12 sps:$4 sm:$0xff]   ;;  %259 = vmatprep.subr.bf16.mxu0 %v576_v1  ;;  %v579_v3 = vld [vmem:[#allocation6 + $0x1c] ss:$12 sps:$4 sm:$0xff]   ;;  %v581_v4 = vld [vmem:[#allocation6 + $0x18] ss:$12 sps:$4 sm:$0xff]  }
  0x3a   :  { %260 = vmatpush1.bf16.msra.mxu0 %v578_v2  ;;  %v582_v5 = vld [vmem:[#allocation6 + $0x8] ss:$12 sps:$4 sm:$0xff]   ;;  %v586_v7 = vld [vmem:[#allocation6 + $0x20] ss:$12 sps:$4 sm:$0xff]   ;;  %v585_v8 = vld [vmem:[#allocation6 + $0x30] ss:$12 sps:$4 sm:$0xff]  }
  0x3b   :  { %261 = vmatprep.subr.bf16.mxu0 %v579_v3  ;;  %v583_v6 = vld [vmem:[#allocation6 + $0x34] ss:$12 sps:$4 sm:$0xff]   ;;  %547 = vmatprep.subr.bf16.mxu1 %v582_v5  ;;  %v587_v9 = vld [vmem:[#allocation6 + $0x4c] ss:$12 sps:$4 sm:$0xff]   ;;  %v594_v12 = vld [vmem:[#allocation6 + $0x50] ss:$12 sps:$4 sm:$0xff]  }
  0x3c   :  { %548 = vmatpush3.bf16.msra.mxu1 %v582_v5  ;;  %v590_v10 = vld [vmem:[#allocation6 + $0x38] ss:$12 sps:$4 sm:$0xff]   ;;  %v589_v11 = vld [vmem:[#allocation6 + $0x48] ss:$12 sps:$4 sm:$0xff]   ;;  %v593_v14 = vld [vmem:[#allocation6 + $0x60] ss:$12 sps:$4 sm:$0xff]  }
  0x3d   :  { %549 = vmatprep.subr.bf16.mxu1 %v586_v7  ;;  %v591_v13 = vld [vmem:[#allocation6 + $0x64] ss:$12 sps:$4 sm:$0xff]   ;;  %v598_v15 = vld [vmem:[#allocation6 + $0x68] ss:$12 sps:$4 sm:$0xff]   ;;  %v602_v19 = vld [vmem:[#allocation6 + $0x80] ss:$12 sps:$4 sm:$0xff]  }
  0x3e   :  { %262 = vmatpush1.bf16.msra.mxu0 %v581_v4  ;;  %v595_v16 = vld [vmem:[#allocation6 + $0x7c] ss:$12 sps:$4 sm:$0xff]   ;;  %v597_v17 = vld [vmem:[#allocation6 + $0x78] ss:$12 sps:$4 sm:$0xff]   ;;  %v607_v18 = vld [vmem:[#allocation3] sm:$0xff]   ;;  %v403_v28 = vshrl.u32 %v402_v27, 7 }
  0x3f   :  { %263 = vmatprep.subr.bf16.mxu0 %v583_v6  ;;  %v599_v20 = vld [vmem:[#allocation6 + $0x94] ss:$12 sps:$4 sm:$0xff]   ;;  %563 = vmatprep.mubr.bf16.mxu1 %v607_v18  ;;  %v601_v21 = vld [vmem:[#allocation6 + $0x90] ss:$12 sps:$4 sm:$0xff]   ;;  %v606_v22 = vld [vmem:[#allocation6 + $0x98] ss:$12 sps:$4 sm:$0xff]  }
  0x40   :  { %550 = vmatpush3.bf16.msra.mxu1 %v586_v7  ;;  %v603_v23 = vld [vmem:[#allocation6 + $0xac] ss:$12 sps:$4 sm:$0xff]   ;;  %v605_v24 = vld [vmem:[#allocation6 + $0xa8] ss:$12 sps:$4 sm:$0xff]   ;;  %v608_v25 = vld [vmem:[#allocation6 + $0xb0] ss:$12 sps:$4 sm:$0xff]  }
  0x41   :  { %551 = vmatprep.subr.bf16.mxu1 %v590_v10  ;;  %v404_v29 = vsub.s32 0, %v403_v28  ;;  %v400_v30 = vld [vmem:[#allocation8] sm:$0x7]  ;;  %v408_v31 = vsub.s32 1, %v403_v28  ;;  %v412_v32 = vsub.s32 2, %v403_v28  ;;  %s712_s2 = smov [#allocation9]  }
  0x42   :  { %264 = vmatpush1.bf16.msra.mxu0 %v585_v8  ;;  %s482_s26 = sshll.u32 %s712_s2, 4  ;;  %s483_s26 = int_to_ptr.vmem [resolvable:$true] %s482_s26 }
  0x43   :  { %265 = vmatprep.subr.bf16.mxu0 %v587_v9  ;;  %v405_v33 = vrot.slane %v400_v30, %v404_v29  ;;  %v409_v34 = vrot.slane %v400_v30, %v408_v31  ;;  %v413_v36 = vrot.slane %v400_v30, %v412_v32  ;;  %s676_s27 = scalar_lea.vmem %s483_s26, 768  ;;  %p681_p11 = scmp.lt.s32.totalorder %s483_s26, %s483_s26 }
  0x44   :  { %552 = vmatpush3.bf16.msra.mxu1 %v590_v10  ;;  %p677_p10 = scmp.ne.s32.totalorder %s483_s26, %s676_s27  ;;  %p682_p12 = scmp.lt.s32.totalorder %s676_s27, %s676_s27 }
  0x45   :  { %553 = vmatprep.subr.bf16.mxu1 %v594_v12 }
  0x46   :  { %266 = vmatpush1.bf16.msra.mxu0 %v589_v11  ;;  %p683_p13 = por %p682_p12, %p681_p11 }
  0x47   :  { %267 = vmatprep.subr.bf16.mxu0 %v591_v13 }
  0x48   :  { %554 = vmatpush3.bf16.msra.mxu1 %v594_v12  ;;  %p684_p0 = pnand %p683_p13, %p677_p10 }
  0x49   :  { %555 = vmatprep.subr.bf16.mxu1 %v598_v15 }
  0x4a   :  { %268 = vmatpush1.bf16.msra.mxu0 %v593_v14 }
  0x4b   :  { %269 = vmatprep.subr.bf16.mxu0 %v595_v16 }
  0x4c   :  { %556 = vmatpush3.bf16.msra.mxu1 %v598_v15 }
  0x4d   :  { %557 = vmatprep.subr.bf16.mxu1 %v602_v19 }
  0x4e   :  { %270 = vmatpush1.bf16.msra.mxu0 %v597_v17 }
  0x4f   :  { %271 = vmatprep.subr.bf16.mxu0 %v599_v20 }
  0x50   :  { %558 = vmatpush3.bf16.msra.mxu1 %v602_v19 }
  0x51   :  { %559 = vmatprep.subr.bf16.mxu1 %v606_v22 }
  0x52   :  { %272 = vmatpush1.bf16.msra.mxu0 %v601_v21 }
  0x53   :  { %273 = vmatprep.subr.bf16.mxu0 %v603_v23 }
  0x54   :  { %560 = vmatpush3.bf16.msra.mxu1 %v606_v22 }
  0x55   :  { %561 = vmatprep.subr.bf16.mxu1 %v608_v25 }
  0x56   :  { %274 = vmatpush1.bf16.msra.mxu0 %v605_v24 }
  0x58   :  { %562 = vmatpush3.bf16.msra.mxu1 %v608_v25 }
  0x59   :  { %292 = vmatmul.mubr.bf16.vlgmr.msra.gmra.mrb[0].mxu0 %v607_v18 }
  0x5a   :  { %301 = vmatprep.mubr.bf16.mxu0 %v711_v0 }
  0x5b   :  { %564 = vmatmul.mubr.bf16.vlgmr.msra.gmra.mrb[0].mxu1 %v609_v26 }
  0x61   :  { %302 = vmatmul.mubr.bf16.gmra.mrb[4].mxu0 %v609_v26 }
 0x12c   :  { %v293_v35 = vpop.f32.mrb[0].mxu0 }
 0x12d   :  { %v417_v37 = vadd.f32 %v405_v33, %v293_v35  ;;  %v295_v38 = vpop.f32.mrb[1].mxu0 }
 0x12e   :  { %v418_v39 = vadd.f32 %v409_v34, %v295_v38  ;;  %v297_v40 = vpop.f32.mrb[2].mxu0  ;;  %v565_v43 = vpop.f32.mrb[0].mxu1 }
 0x12f   :  { %v420_v41 = vadd.f32 %v405_v33, %v297_v40  ;;  %v299_v42 = vpop.f32.mrb[3].mxu0  ;;  %v425_v46 = vadd.f32 %v565_v43, %v413_v36  ;;  %v346_v47 = vpop.f32.mrb[1].mxu1 }
 0x130   :  { %v529_v44 = vpack.c.bf16 %v418_v39, %v417_v37  ;;  %v421_v45 = vadd.f32 %v409_v34, %v299_v42  ;;  %v419_v48 = vadd.f32 %v413_v36, %v346_v47  ;;  %v566_v49 = vpop.f32.mrb[2].mxu1 }
 0x131   :  { %v534_v51 = vpack.c.bf16 %v425_v46, %v425_v46  ;;  %v428_v52 = vadd.f32 %v566_v49, %v413_v36  ;;  %v349_v53 = vpop.f32.mrb[3].mxu1 }
 0x132   :  { %469 = vst [vmem:[#allocation9] sm:$0xff] %v529_v44  ;;  %v531_v50 = vpack.c.bf16 %v421_v45, %v420_v41  ;;  %v530_v54 = vpack.c.bf16 %v419_v48, %v419_v48  ;;  %v422_v55 = vadd.f32 %v413_v36, %v349_v53 }
 0x133   :  { %474 = vst [vmem:[#allocation9 + $0x20] sm:$0xf] %v534_v51  ;;  %v536_v56 = vpack.c.bf16 %v428_v52, %v428_v52 }
 0x134   :  { %471 = vst [vmem:[#allocation9 + $0xc] sm:$0xff] %v531_v50  ;;  %v303_v57 = vpop.f32.mrb[4].mxu0  ;;  %470 = vst [vmem:[#allocation9 + $0x8] sm:$0xf] %v530_v54  ;;  %v532_v59 = vpack.c.bf16 %v422_v55, %v422_v55 }
 0x135   :  { %v423_v58 = vadd.f32 %v405_v33, %v303_v57  ;;  %v305_v60 = vpop.f32.mrb[5].mxu0  ;;  %476 = vst [vmem:[#allocation9 + $0x2c] sm:$0xf] %v536_v56 }
 0x136   :  { %v424_v61 = vadd.f32 %v409_v34, %v305_v60  ;;  %v307_v62 = vpop.f32.mrb[6].mxu0  ;;  %472 = vst [vmem:[#allocation9 + $0x14] sm:$0xf] %v532_v59 }
 0x137   :  { %v426_v63 = vadd.f32 %v405_v33, %v307_v62  ;;  %v309_v0 = vpop.f32.mrb[7].mxu0 }
 0x138   :  { %v533_v1 = vpack.c.bf16 %v424_v61, %v423_v58  ;;  %v427_v2 = vadd.f32 %v409_v34, %v309_v0 }
 0x13a   :  { %473 = vst [vmem:[#allocation9 + $0x18] sm:$0xff] %v533_v1  ;;  %v535_v3 = vpack.c.bf16 %v427_v2, %v426_v63 }
 0x13c   :  { %475 = vst [vmem:[#allocation9 + $0x24] sm:$0xff] %v535_v3 }
 0x13d   :  { %687 = shalt.err (!%p684_p0)
}
 0x13e   :  { %s688_s30 = scalar_lea.hbm %s790_s3, 768 }
 0x13f   :  { %p689_p1 = scmp.ne.s32.totalorder %s790_s3, %s688_s30  ;;  %p692_p2 = scmp.lt.u32.totalorder %s688_s30, %s790_s3 }
 0x141   :  { %p694_p3 = pnand %p692_p2, %p689_p1 }
 0x143   :  { %697 = shalt.err (!%p694_p3)
}
 0x144   :  { %488 = dma.vmem_to_hbm [thread:$0]  %s483_s26, 768, %s790_s3, [#allocation5], %s705_s22, %s705_s22, %s706_s23  }
 0x145   :  { %702 = dma.done.wait [#allocation5], 768  }
 0x146   :  { %703 = vsyncadd [#allocation5], 4294966528 }
 0x147   :  { %492 = vsyncpa [#allocation4], 1 }
 0x148   :  { %493 = vsyncpa [#allocation7], 1 }
 0x149   :  { %494 = vsyncpa [#allocation5], 1 }

// kernel: model_sub_forward.17
= control target key start
LH: loop header
LB: loop body
LE: loop exit
PB: predicated region body
PF: predicated region fallthrough
CT: control target
= control target key end

     0   :  { %s2118_s0 = inlined_call_operand.hbm [shape: bf16[32,384], index: 0, kind: input, shape index: {}, may-alias: {0,1,2}]   ;;  %s2119_s1 = inlined_call_operand.hbm [shape: bf16[32,384], index: 1, kind: input, shape index: {}, may-alias: {0,1,2}]   ;;  %s2120_s2 = inlined_call_operand.hbm [shape: bf16[32,384], index: 2, kind: input, shape index: {}, may-alias: {0,1,2}]   ;;  %s2121_s3 = inlined_call_operand.hbm [shape: f32[2,1,16], index: 3, kind: input, shape index: {}]   ;;  %s2122_s4 = inlined_call_operand.hbm [shape: bf16[32,128], index: 4, kind: output, shape index: {}]  }
   0x1   :  { %2137 = sst [smem:[#allocation20_spill]] %s2118_s0 }
   0x2   :  { %2138 = sst [smem:[#allocation21_spill]] %s2119_s1 }
   0x3   :  { %9 = vsyncpa [#allocation3], 0 }
   0x4   :  { %11 = vsyncpa [#allocation3 + $0x1], 0 }
   0x5   :  { %12 = vsyncpa [#allocation6], 0 }
   0x6   :  { %14 = vsyncpa [#allocation6 + $0x1], 0 }
   0x7   :  { %15 = vsyncpa [#allocation9], 0 }
   0x8   :  { %17 = vsyncpa [#allocation9 + $0x1], 0 }
   0x9   :  { %18 = vsyncpa [#allocation4], 0 }
   0xa   :  { %20 = vsyncpa [#allocation4 + $0x1], 0  ;;  %s1676_s15 = smov 0   ;;  %s1678_s16 = smov 0  }
   0xb   :  { %s1680_s17 = smov 0   ;;  %s1682_s18 = smov 0  }
   0xc   :  { %s1684_s19 = smov 0   ;;  %s1686_s20 = smov 0  }
   0xd LB: > { %2139 = sst [smem:[#allocation15_spill]] %s1623_s17  ;;  %s1707_s21 = sadd.s32 4294967295, %s1635_s20   ;;  %s1635_s20 = sphi %s1686_s20, %s26_s20   ;;  %s1631_s19 = sphi %s1684_s19, %s2170_s19   ;;  %s1627_s18 = sphi %s1682_s18, %s2169_s18   ;;  %s1623_s17 = sphi %s1680_s17, %s2165_s17   ;;  %s1619_s16 = sphi %s1678_s16, %s2168_s16   ;;  %s1615_s15 = sphi %s1676_s15, %s2167_s15  }
   0xe   : > { %2140 = sst [smem:[#allocation16_spill]] %s1635_s20  ;;  %s1172_s22 = sadd.s32 4294967294, %s1635_s20  }
   0xf   : > { %s38_s23 = sadd.s32 1, %s1631_s19  ;;  %s47_s24 = sadd.s32 1, %s1623_s17 }
  0x10   : > { %p40_p0 = scmp.ge.s32.totalorder %s38_s23, 2  ;;  %p54_p1 = scmp.ne.s32.totalorder %s1623_s17, %s1619_s16 }
  0x11   : > { %p55_p2 = scmp.eq.s32.totalorder %s1635_s20, 0  ;;  %p60_p3 = scmp.ne.s32.totalorder %s1619_s16, %s1615_s15 }
  0x12   : > { %s2172_s23 = smov (%p40_p0, %s38_s23), 0  ;;  %p61_p5 = scmp.eq.s32.totalorder %s1707_s21, 0 }
  0x13   : > { %2141 = sst [smem:[#allocation17_spill]] %s2172_s23  ;;  %p1719_p4 = por %p55_p2, %p54_p1 }
  0x14   : > { %s42_s26 = ssub.s32 %s1631_s19, %s2172_s23  ;;  %p172_p6 = scmp.eq.s32.totalorder %s1707_s21, 1 }
  0x15   : > { %p45_p7 = scmp.eq.s32.totalorder %s42_s26, 0  ;;  %p1727_p8 = por %p61_p5, %p60_p3 }
  0x16   : > { %p1731_p9 = por %p172_p6, %p54_p1  ;;  %p178_p10 = scmp.eq.s32.totalorder %s1172_s22, 1 }
  0x17   : > { %s2143_s27 = scalar_select %p1727_p8, 1, 0 }
  0x18   : > { %s2144_s28 = scalar_select %p1731_p9, 1, 0 }
  0x19   : > { %s1736_s29 = scalar_select %p45_p7, %s1623_s17, %s47_s24  }
  0x1a   : > { %p1738_p11 = por %p178_p10, %p60_p3  ;;  %p1324_p13 = scmp.lt.s32.totalorder %s1635_s20, 2 }
  0x1b   : > { %2145 = sst [smem:[#allocation18_spill]] %s1736_s29  ;;  %s1745_s5 = sand.u32 1, %s1623_s17  }
  0x1c   : > { %s2146_s30 = scalar_select %p1738_p11, 1, 0 }
  0x1d   : > { %s1748_s6 = sshll.u32 %s1745_s5, 3  ;;  %s1751_s7 = smul.u32 384, %s1631_s19 }
  0x1e   : > { %2147 = sst [smem:[#allocation19_spill]] %s2146_s30  ;;  %p1755_p0 = pnand %p1324_p13, %p1719_p4 }
  0x1f   : > { %s221_s9 = sand.u32 1, %s1635_s20   ;;  %s2149_s1 = sld [smem:[#allocation21_spill]] }
  0x20   : > { %s2148_s8 = scalar_select %p1755_p0, 1, 0 }
  0x21   : > { %s225_s13 = scalar_lea.vmem [#allocation5], %s1748_s6  ;;  %s1769_s24 = scalar_lea.sflag [#allocation6], %s221_s9 }
  0x22   : > { %s235_s14 = sshll.u32 %s225_s13, 4  ;;  %p1774_p2 = pneg %p1755_p0  ;;  %s1767_s14 = int_to_ptr.vmem [resolvable:$true] %s235_s14 }
  0x25   : > { %s1063_s12 = scalar_lea.hbm %s2149_s1, %s1751_s7  ;;  %s1428_s13 = scalar_lea.hbm %s2149_s1, 768 }
  0x26   : > { %s1765_s22 = scalar_lea.hbm %s1063_s12, 64  ;;  %s1453_s25 = scalar_lea.hbm %s1063_s12, 192 }
  0x27   : > { %p1424_p1 = scmp.ne.s32.totalorder %s1765_s22, %s1453_s25  ;;  %p1429_p5 = scmp.lt.u32.totalorder %s1765_s22, %s2149_s1 }
  0x28   : > { %p1430_p6 = scmp.lt.u32.totalorder %s1428_s13, %s1453_s25  ;;  %p1432_p10 = scmp.lt.u32.totalorder %s1453_s25, %s1765_s22 }
  0x29   : > { %p1426_p3 = pnand %p1774_p2, %p1424_p1 }
  0x2a   : > { %p1431_p7 = por %p1430_p6, %p1429_p5 }
  0x2b   : > { %p1427_p4 = pneg %p1426_p3 }
  0x2c   : > { %p1433_p13 = por %p1432_p10, %p1431_p7 }
  0x2e   : > { %p1434_p12 = pnand %p1433_p13, %p1427_p4 }
  0x30   : > { %1437 = shalt.err (!%p1434_p12)
}
  0x31   : > { %s1438_s9 = scalar_lea.vmem %s1767_s14, 128  ;;  %s1637_s12 = smov [#allocation5]  }
  0x32   : > { %p1439_p1 = scmp.ne.s32.totalorder %s1767_s14, %s1438_s9  ;;  %s1443_s10 = sshll.u32 %s1637_s12, 4  ;;  %s1444_s10 = int_to_ptr.vmem [resolvable:$false] %s1443_s10 }
  0x33   : > { %s1445_s23 = scalar_lea.vmem %s1444_s10, 256  ;;  %p1446_p9 = scmp.lt.s32.totalorder %s1767_s14, %s1444_s10 }
  0x34   : > { %p1441_p3 = pnand %p1439_p1, %p1774_p2  ;;  %p1447_p8 = scmp.lt.s32.totalorder %s1445_s23, %s1438_s9 }
  0x36   : > { %p1442_p11 = pneg %p1441_p3  ;;  %p1448_p5 = por %p1447_p8, %p1446_p9 }
  0x38   : > { %p1449_p6 = pnand %p1448_p5, %p1442_p11 }
  0x3a   : > { %1452 = shalt.err (!%p1449_p6)
}
  0x3b   : > { %s2126_s29 = smov 192   ;;  %s2128_s25 = smov 64  }
  0x3c   : > { %s2130_s11 = smov 4   ;;  %p1184_p8 = scmp.ge.s32.totalorder %s1635_s20, 1 }
  0x3d   : > { %1313 = dma.hbm_to_vmem [thread:$0]  (!%p1755_p0), %s1765_s22, 128, %s1767_s14, %s1769_s24, %s2126_s29, %s2128_s25, %s2130_s11  }
  0x3e   : > { %p284_p9 = scmp.lt.s32.totalorder %s1635_s20, 3  ;;  %s2152_s0 = sld [smem:[#allocation20_spill]] }
  0x3f   : > { %s202_s23 = scalar_lea.vmem [#allocation2], %s1748_s6  ;;  %s1820_s29 = scalar_lea.hbm %s2120_s2, %s1751_s7 }
  0x40   : > { %p1803_p11 = pnand %p1184_p8, %p284_p9  ;;  %s211_s1 = sshll.u32 %s202_s23, 4  ;;  %s1814_s1 = int_to_ptr.vmem [resolvable:$true] %s211_s1 }
  0x41   : > { %s199_s25 = scalar_lea.sflag [#allocation3], %s1745_s5 }
  0x42   : > { %s2151_s13 = scalar_select %p1803_p11, 1, 0 }
  0x44   : > { %s1811_s10 = scalar_lea.hbm %s2152_s0, %s1751_s7  ;;  %s1459_s17 = scalar_lea.hbm %s2152_s0, 768 }
  0x45   : > { %s1454_s11 = scalar_lea.hbm %s1811_s10, 128  ;;  %p1460_p10 = scmp.lt.u32.totalorder %s1811_s10, %s2152_s0 }
  0x46   : > { %p1455_p12 = scmp.ne.s32.totalorder %s1811_s10, %s1454_s11  ;;  %p1461_p13 = scmp.lt.u32.totalorder %s1459_s17, %s1454_s11 }
  0x47   : > { %p1463_p3 = scmp.lt.u32.totalorder %s1454_s11, %s1811_s10 }
  0x48   : > { %p1457_p4 = pnand %p1455_p12, %p1774_p2  ;;  %p1462_p1 = por %p1461_p13, %p1460_p10 }
  0x4a   : > { %p1458_p7 = pneg %p1457_p4  ;;  %p1464_p5 = por %p1463_p3, %p1462_p1 }
  0x4c   : > { %p1465_p6 = pnand %p1464_p5, %p1458_p7 }
  0x4e   : > { %1468 = shalt.err (!%p1465_p6)
}
  0x4f   : > { %s1469_s7 = scalar_lea.vmem %s1814_s1, 128  ;;  %s1641_s23 = smov [#allocation2]  }
  0x50   : > { %p1470_p8 = scmp.ne.s32.totalorder %s1814_s1, %s1469_s7  ;;  %s1474_s14 = sshll.u32 %s1641_s23, 4  ;;  %s1475_s14 = int_to_ptr.vmem [resolvable:$false] %s1474_s14 }
  0x51   : > { %s1476_s20 = scalar_lea.vmem %s1475_s14, 256  ;;  %p1477_p4 = scmp.lt.s32.totalorder %s1814_s1, %s1475_s14 }
  0x52   : > { %p1472_p9 = pnand %p1470_p8, %p1774_p2  ;;  %p1478_p11 = scmp.lt.s32.totalorder %s1476_s20, %s1469_s7 }
  0x54   : > { %p1473_p12 = pneg %p1472_p9  ;;  %p1479_p10 = por %p1478_p11, %p1477_p4 }
  0x56   : > { %p1480_p13 = pnand %p1479_p10, %p1473_p12 }
  0x58   : > { %1483 = shalt.err (!%p1480_p13)
}
  0x59   : > { %s2153_s17 = smov 4   ;;  %s2154_s30 = smov 64  }
  0x5a   : > { %s2155_s11 = smov 192   ;;  %s1850_s22 = scalar_lea.hbm %s1820_s29, 128 }
  0x5b   : > { %1310 = dma.hbm_to_vmem [thread:$0]  (!%p1755_p0), %s1811_s10, 128, %s1814_s1, %s199_s25, %s2155_s11, %s2154_s30, %s2153_s17  }
  0x5c   : > { %s249_s9 = scalar_lea.vmem [#allocation7], %s1748_s6  ;;  %s1514_s7 = scalar_lea.hbm %s1820_s29, 256 }
  0x5d   : > { %s259_s12 = sshll.u32 %s249_s9, 4  ;;  %p1485_p11 = scmp.ne.s32.totalorder %s1850_s22, %s1514_s7  ;;  %s1853_s12 = int_to_ptr.vmem [resolvable:$true] %s259_s12 }
  0x5e   : > { %s1489_s20 = scalar_lea.hbm %s2120_s2, 768  ;;  %p1490_p3 = scmp.lt.u32.totalorder %s1850_s22, %s2120_s2 }
  0x5f   : > { %p1487_p7 = pnand %p1485_p11, %p1774_p2  ;;  %p1491_p5 = scmp.lt.u32.totalorder %s1489_s20, %s1514_s7 }
  0x60   : > { %p1493_p8 = scmp.lt.u32.totalorder %s1514_s7, %s1850_s22 }
  0x61   : > { %p1488_p1 = pneg %p1487_p7  ;;  %p1492_p6 = por %p1491_p5, %p1490_p3 }
  0x63   : > { %p1494_p9 = por %p1493_p8, %p1492_p6 }
  0x65   : > { %p1495_p12 = pnand %p1494_p9, %p1488_p1 }
  0x67   : > { %1498 = shalt.err (!%p1495_p12)
}
  0x68   : > { %s1499_s6 = scalar_lea.vmem %s1853_s12, 128  ;;  %s1642_s29 = smov [#allocation7]  }
  0x69   : > { %p1500_p4 = scmp.ne.s32.totalorder %s1853_s12, %s1499_s6  ;;  %s1504_s25 = sshll.u32 %s1642_s29, 4  ;;  %s1505_s25 = int_to_ptr.vmem [resolvable:$false] %s1504_s25 }
  0x6a   : > { %s1506_s0 = scalar_lea.vmem %s1505_s25, 256  ;;  %p1507_p11 = scmp.lt.s32.totalorder %s1853_s12, %s1505_s25 }
  0x6b   : > { %p1502_p10 = pnand %p1500_p4, %p1774_p2  ;;  %p1508_p7 = scmp.lt.s32.totalorder %s1506_s0, %s1499_s6 }
  0x6d   : > { %p1503_p13 = pneg %p1502_p10  ;;  %p1509_p3 = por %p1508_p7, %p1507_p11 }
  0x6f   : > { %p1510_p5 = pnand %p1509_p3, %p1503_p13 }
  0x71   : > { %1513 = shalt.err (!%p1510_p5)
}
  0x72   : > { %1316 = dma.hbm_to_vmem [thread:$0]  (!%p1755_p0), %s1850_s22, 128, %s1853_s12, %s1769_s24, %s2155_s11, %s2154_s30, %s2153_s17  }
  0x73   : > { %s1183_s10 = sshll.u32 %s1631_s19, 4  ;;  %s272_s14 = scalar_lea.vmem [#allocation8], %s1745_s5 }
  0x74   : > { %s1884_s23 = scalar_lea.hbm %s2121_s3, %s1183_s10  ;;  %s279_s20 = sshll.u32 %s272_s14, 4  ;;  %s280_s20 = int_to_ptr.vmem [resolvable:$true] %s279_s20 }
  0x75   : > { %s270_s1 = scalar_lea.sflag [#allocation9], %s1745_s5  ;;  %s1515_s6 = scalar_lea.hbm %s1884_s23, 16 }
  0x76   : > { %p1516_p1 = scmp.ne.s32.totalorder %s1884_s23, %s1515_s6  ;;  %s1520_s30 = scalar_lea.hbm %s2121_s3, 32 }
  0x77   : > { %p1521_p9 = scmp.lt.u32.totalorder %s1884_s23, %s2121_s3  ;;  %p1522_p12 = scmp.lt.u32.totalorder %s1520_s30, %s1515_s6 }
  0x78   : > { %p1518_p6 = pnand %p1516_p1, %p1774_p2  ;;  %p1524_p10 = scmp.lt.u32.totalorder %s1515_s6, %s1884_s23 }
  0x79   : > { %p1523_p4 = por %p1522_p12, %p1521_p9 }
  0x7a   : > { %p1519_p8 = pneg %p1518_p6 }
  0x7b   : > { %p1525_p13 = por %p1524_p10, %p1523_p4 }
  0x7d   : > { %p1526_p11 = pnand %p1525_p13, %p1519_p8 }
  0x7f   : > { %1529 = shalt.err (!%p1526_p11)
}
  0x80   : > { %s1530_s5 = scalar_lea.vmem %s280_s20, 16  ;;  %s1643_s12 = smov [#allocation8]  }
  0x81   : > { %p1531_p7 = scmp.ne.s32.totalorder %s280_s20, %s1530_s5  ;;  %s1535_s29 = sshll.u32 %s1643_s12, 4  ;;  %s1536_s29 = int_to_ptr.vmem [resolvable:$false] %s1535_s29 }
  0x82   : > { %s1537_s25 = scalar_lea.vmem %s1536_s29, 32  ;;  %p1538_p1 = scmp.lt.s32.totalorder %s280_s20, %s1536_s29 }
  0x83   : > { %p1533_p3 = pnand %p1531_p7, %p1774_p2  ;;  %p1539_p6 = scmp.lt.s32.totalorder %s1537_s25, %s1530_s5 }
  0x85   : > { %p1534_p5 = pneg %p1533_p3  ;;  %p1540_p0 = por %p1539_p6, %p1538_p1 }
  0x87   : > { %p1541_p9 = pnand %p1540_p0, %p1534_p5 }
  0x89   : > { %1544 = shalt.err (!%p1541_p9)
}
  0x8a   : > { %p2156_p12 = scmp.ne.s32.totalorder %s2148_s8, 0  ;;  %p2157_p8 = scmp.ne.s32.totalorder %s2151_s13, 0 }
  0x8b   : > { %s1908_s26 = sand.u32 (!%p2157_p8), 1, %s1619_s16   ;;  %p2158_p0 = scmp.ne.s32.totalorder (!%p2157_p8), %s2143_s27, 0 }
  0x8c   : > { %1319 = dma.hbm_to_vmem [thread:$0]  (!%p2156_p12), %s1884_s23, 16, %s280_s20, %s270_s1  }
  0x8d   : > { %288 = sbr.rel (%p2157_p8) target bundleno = 1338 (0x53a), region = 36  ;;  %s1911_s0 = sshll.u32 (!%p2157_p8), %s1908_s26, 3 }
  0x8e   : > { %s291_s10 = scalar_lea.sflag (!%p2157_p8), [#allocation3], %s1908_s26  ;;  %s1915_s9 = scalar_lea.vmem (!%p2157_p8), [#allocation2], %s1911_s0 }
  0x94   : > { %1598 = dma.done.wait (%p2158_p0), %s291_s10, 128  }
  0x95   : > { %1600 = vsyncadd (%p2158_p0), %s291_s10, 4294967168  ;;  %s299_s8 = sand.u32 1, %s1707_s21   ;;  %s1923_s7 = scalar_lea.vmem [#allocation5], %s1911_s0 }
  0x96   : > { %s300_s13 = scalar_lea.sflag [#allocation6], %s299_s8 }
  0x97   : > { %1602 = dma.done.wait (%p2158_p0), %s300_s13, 256  }
  0x98   : > { %1604 = vsyncadd (%p2158_p0), %s300_s13, 4294967040  ;;  %s1930_s23 = scalar_lea.vmem [#allocation7], %s1911_s0  ;;  %s318_s14 = scalar_lea.sflag [#allocation9], %s1908_s26 }
  0x99   : > { %s320_s20 = scalar_lea.vmem [#allocation8], %s1908_s26 }
  0x9a   : > { %1606 = dma.done.wait (%p2158_p0), %s318_s14, 16  }
  0x9b   : > { %1608 = vsyncadd (%p2158_p0), %s318_s14, 4294967280  ;;  %v1644_v0 = vmov 0.0   ;;  %vm1645_vm0 = vmmov 0   ;;  %vm392_vm1 = vcmask 261120   ;;  %v1383_v1 = vld [vmem:[%s1923_s7] sm:$0xff]   ;;  %s1646_s21 = smov 96  }
  0x9c   : > { %1248 = vmatprep.subr.bf16.mxu0 %v1644_v0  ;;  %1250 = vmatprep.mubr.msk.bf16.mxu0 %vm1645_vm0, %v1644_v0  ;;  %v368_v2 = vld [vmem:[%s1915_s9] sm:$0xf]  ;;  %v369_v3 = vld [vmem:[%s1915_s9 + $0x4] sm:$0xf]  ;;  %v397_v4 = vsel %vm392_vm1, %v1383_v1, 0  ;;  %v1384_v8 = vld [vmem:[%s1923_s7] sm:$0xff]  }
  0x9d   : > { %1254 = vmatprep.subr.bf16.mxu1 %v1644_v0  ;;  %1256 = vmatprep.mubr.msk.bf16.mxu1 %vm1645_vm0, %v1644_v0  ;;  %v370_v5 = vmul.bf16 1043676725, %v368_v2  ;;  %v371_v6 = vmul.bf16 1043676725, %v369_v3  ;;  %v525_v9 = vld [vmem:[%s1915_s9] sm:$0xf] }
  0x9e   : > { %1249 = vmatpush3.bf16.xpose.msra.mxu0 %v397_v4  ;;  %545 = vrot.lane.b32.xlu1 %v1384_v8, %s1646_s21  ;;  %v526_v10 = vld [vmem:[%s1915_s9 + $0x4] sm:$0xf]  ;;  %v684_v11 = vld [vmem:[%s1915_s9] sm:$0xf]  ;;  %v527_v12 = vmul.bf16 1043676725, %v525_v9 }
  0x9f   : > { %1266 = vmatprep.subr.bf16.mxu0 %v1644_v0  ;;  %v1190_v7 = vcombine.low %v370_v5, %v371_v6  ;;  %v528_v13 = vmul.bf16 1043676725, %v526_v10  ;;  %v685_v14 = vld [vmem:[%s1915_s9 + $0x4] sm:$0xf]  ;;  %v686_v15 = vmul.bf16 1043676725, %v684_v11 }
  0xa0   : > { %v687_v16 = vmul.bf16 1043676725, %v685_v14  ;;  %v843_v19 = vld [vmem:[%s1915_s9] sm:$0xf]  ;;  %v844_v20 = vld [vmem:[%s1915_s9 + $0x4] sm:$0xf] }
  0xa1   : > { %v1197_v17 = vcombine.low %v527_v12, %v528_v13  ;;  %s1647_s27 = smov 64   ;;  %v1386_v21 = vld [vmem:[%s1923_s7] sm:$0xff]   ;;  %v845_v22 = vmul.bf16 1043676725, %v843_v19  ;;  %v846_v23 = vmul.bf16 1043676725, %v844_v20 }
  0xa2   : > { %v1204_v18 = vcombine.low %v686_v15, %v687_v16  ;;  %s1648_s1 = smov 32   ;;  %v1967_v25 = vld [vmem:[%s320_s20] ss:$0 sm:$0xff]  ;;  %vm440_vm2 = vcmask 130048   ;;  %v1385_v34 = vld [vmem:[%s1923_s7] sm:$0xff]   ;;  %vm522_vm3 = vcmask 257024  }
  0xa3   : > { %538 = vrot.lane.b32.xlu1 %v1197_v17, %s1646_s21  ;;  %v1211_v24 = vcombine.low %v845_v22, %v846_v23  ;;  %v1387_v35 = vld [vmem:[%s1930_s23] sm:$0xff]   ;;  %s2041_s6 = scalar_lea.vmem [#allocation10], %s1911_s0  ;;  %vm681_vm4 = vcmask 519424   ;;  %vm840_vm5 = vcmask 781824   ;;  %s1231_s24 = sshll.u32 %s1627_s18, 7  ;;  %vm999_vm6 = vcmask 1044224  }
  0xa4   : > { %1255 = vmatpush3.bf16.msra.mxu1 %v1387_v35  ;;  %v1388_v17 = vld [vmem:[%s1930_s23] sm:$0xff]   ;;  %s1017_s17 = sshll.u32 %s2041_s6, 4  ;;  %s2063_s22 = scalar_lea.hbm %s2122_s4, %s1231_s24  ;;  %s2066_s17 = int_to_ptr.vmem [resolvable:$true] %s1017_s17 }
  0xa5   : > { %1251 = vmatmul.mubr.msk.bf16.vlgmr.msra.gmra.mrb[0].mxu0 %vm392_vm1, %v1190_v7  ;;  %1260 = vmatprep.subr.bf16.mxu1 %v1644_v0  ;;  %s1003_s5 = scalar_lea.sflag [#allocation4], %s1908_s26  ;;  %s1545_s12 = scalar_lea.vmem %s2066_s17, 128 }
  0xa6   : > { %1268 = vmatprep.mubr.msk.bf16.mxu0 %vm1645_vm0, %v1644_v0  ;;  %p1546_p2 = scmp.ne.s32.totalorder %s2066_s17, %s1545_s12  ;;  %p2159_p4 = scmp.ne.s32.totalorder %s2144_s28, 0 }
  0xa7   : > { %697 = vrot.lane.b32.xlu1 %v1204_v18, %s1647_s27  ;;  %v1389_v18 = vld [vmem:[%s1930_s23] sm:$0xff]   ;;  %s1649_s18 = smov [#allocation10]  }
  0xa8   : > { %p1547_p10 = pnand %p1546_p2, %p2159_p4  ;;  %s1549_s29 = sshll.u32 %s1649_s18, 4  ;;  %s1550_s29 = int_to_ptr.vmem [resolvable:$false] %s1549_s29 }
  0xa9   : > { %s1551_s25 = scalar_lea.vmem %s1550_s29, 256  ;;  %p1552_p11 = scmp.lt.s32.totalorder %s2066_s17, %s1550_s29 }
  0xaa   : > { %p1548_p13 = pneg %p1547_p10  ;;  %p1553_p7 = scmp.lt.s32.totalorder %s1551_s25, %s1545_s12 }
  0xab   : > { %863 = vrot.lane.b32.xlu1 %v1386_v21, %s1648_s1  ;;  %v1390_v21 = vld [vmem:[%s1930_s23] sm:$0xff]  }
  0xac   : > { %p1554_p3 = por %p1553_p7, %p1552_p11 }
  0xae   : > { %p1555_p5 = pnand %p1554_p3, %p1548_p13 }
  0xaf   : > { %856 = vrot.lane.b32.xlu1 %v1211_v24, %s1648_s1 }
 0x110   : > { %v546_v42 = vpop.permute.xlu1 %545 }
 0x111   : > { %v551_v45 = vsel %vm392_vm1, %v546_v42, 0 }
 0x115   : > { %v539_v47 = vpop.permute.xlu1 %538 }
 0x119   : > { %v698_v49 = vpop.permute.xlu1 %697 }
 0x11d   : > { %v864_v51 = vpop.permute.xlu1 %863 }
 0x11e   : > { %v869_v52 = vsel %vm392_vm1, %v864_v51, 0 }
 0x121   : > { %v857_v53 = vpop.permute.xlu1 %856 }
 0x178   : > { %v433_v26 = vpop.f32.mrb[0].mxu0 }
 0x179   : > { %v434_v27 = vadd.f32 %v1967_v25, %v433_v26  ;;  %v1252_v28 = vpop.f32.mrb[1].mxu0 }
 0x17a   : > { %v436_v29 = vpop.f32.mrb[2].mxu0 }
 0x17b   : > { %v437_v30 = vadd.f32 %v1967_v25, %v436_v29  ;;  %v1253_v31 = vpop.f32.mrb[3].mxu0  ;;  %v441_v32 = vsel %vm440_vm2, %v434_v27, -inf }
 0x17c   : > { %442 = vmax.xlane.f32.xlu0 %v441_v32 }
 0x17d   : > { %v444_v33 = vsel %vm440_vm2, %v437_v30, -inf }
 0x180   : > { %445 = vmax.xlane.f32.xlu0 %v444_v33 }
 0x196   : > { %704 = vrot.lane.b32.xlu0 %v1385_v34, %s1647_s27 }
 0x209   : > { %v443_v36 = vpop.xlane.xlu0 %442 }
 0x20a   : > { %v447_v37 = vsub.f32 %v434_v27, %v443_v36 }
 0x20c   : > { %v449_v38 = vmul.f32 1.442695, %v447_v37 }
 0x20d   : > { %v446_v39 = vpop.xlane.xlu0 %445 }
 0x20e   : > { %v448_v40 = vsub.f32 %v437_v30, %v446_v39  ;;  %1391 = vpow2.f32 %v449_v38 }
 0x210   : > { %v451_v41 = vmul.f32 1.442695, %v448_v40 }
 0x211   : > { %v705_v48 = vpop.permute.xlu0 %704 }
 0x212   : > { %1393 = vpow2.f32 %v451_v41  ;;  %v710_v50 = vsel %vm392_vm1, %v705_v48, 0 }
 0x218   : > { %v1977_v43 = vpop.eup %1391 }
 0x21c   : > { %v1979_v44 = vpop.eup %1393 }
 0x21d   : > { %v459_v46 = vpack.c.bf16 %v1979_v44, %v1977_v43 }
 0x21f   : > { %1257 = vmatmul.mubr.msk.bf16.vlgmr.msra.gmra.mrb[0].mxu1 %vm440_vm2, %v459_v46 }
 0x220   : > { %1261 = vmatpush3.bf16.xpose.msra.mxu1 %v551_v45  ;;  %1262 = vmatprep.mubr.msk.bf16.mxu1 %vm1645_vm0, %v1644_v0 }
 0x221   : > { %1272 = vmatprep.subr.bf16.mxu1 %v1644_v0 }
 0x227   : > { %1263 = vmatmul.mubr.msk.bf16.vlgmr.msra.gmra.mrb[4].mxu1 %vm392_vm1, %v539_v47 }
 0x228   : > { %1273 = vmatpush3.bf16.xpose.msra.mxu1 %v710_v50  ;;  %1274 = vmatprep.mubr.msk.bf16.mxu1 %vm1645_vm0, %v1644_v0 }
 0x229   : > { %1284 = vmatprep.subr.bf16.mxu1 %v1644_v0 }
 0x22f   : > { %1275 = vmatmul.mubr.msk.bf16.vlgmr.msra.gmra.mrb[8].mxu1 %vm392_vm1, %v698_v49 }
 0x230   : > { %1285 = vmatpush3.bf16.xpose.msra.mxu1 %v869_v52  ;;  %1286 = vmatprep.mubr.msk.bf16.mxu1 %vm1645_vm0, %v1644_v0 }
 0x237   : > { %1287 = vmatmul.mubr.msk.bf16.vlgmr.msra.gmra.mrb[12].mxu1 %vm392_vm1, %v857_v53  ;;  %v453_v53 = vsel %vm440_vm2, %v1977_v43, 0.0 }
 0x2f2   : > { %v1998_v54 = vpop.f32.mrb[0].mxu1 }
 0x2f3   : > { %v1258_v55 = vpop.f32.mrb[1].mxu1 }
 0x2f4   : > { %v2000_v56 = vpop.f32.mrb[2].mxu1 }
 0x2f5   : > { %v1259_v57 = vpop.f32.mrb[3].mxu1 }
 0x2fa   : > { %v587_v58 = vpop.f32.mrb[4].mxu1 }
 0x2fb   : > { %v588_v59 = vadd.f32 %v1967_v25, %v587_v58  ;;  %v1264_v60 = vpop.f32.mrb[5].mxu1 }
 0x2fc   : > { %v590_v61 = vpop.f32.mrb[6].mxu1 }
 0x2fd   : > { %v591_v62 = vadd.f32 %v1967_v25, %v590_v61  ;;  %v1265_v63 = vpop.f32.mrb[7].mxu1  ;;  %v594_v1 = vsel %vm440_vm2, %v588_v59, -inf }
 0x2fe   : > { %595 = vmax.xlane.f32.xlu1 %v594_v1 }
 0x2ff   : > { %v597_v2 = vsel %vm440_vm2, %v591_v62, -inf }
 0x300   : > { %598 = vmax.xlane.f32.xlu0 %v597_v2 }
 0x302   : > { %v746_v3 = vpop.f32.mrb[8].mxu1 }
 0x303   : > { %v747_v4 = vadd.f32 %v1967_v25, %v746_v3  ;;  %v1276_v5 = vpop.f32.mrb[9].mxu1 }
 0x304   : > { %v749_v6 = vpop.f32.mrb[10].mxu1 }
 0x305   : > { %v750_v7 = vadd.f32 %v1967_v25, %v749_v6  ;;  %v1277_v8 = vpop.f32.mrb[11].mxu1  ;;  %v753_v9 = vsel %vm440_vm2, %v747_v4, -inf }
 0x306   : > { %754 = vmax.xlane.f32.xlu1 %v753_v9 }
 0x307   : > { %v756_v10 = vsel %vm440_vm2, %v750_v7, -inf }
 0x30a   : > { %757 = vmax.xlane.f32.xlu1 %v756_v10  ;;  %v905_v11 = vpop.f32.mrb[12].mxu1 }
 0x30b   : > { %v906_v12 = vadd.f32 %v1967_v25, %v905_v11  ;;  %v1288_v13 = vpop.f32.mrb[13].mxu1 }
 0x30c   : > { %v908_v14 = vpop.f32.mrb[14].mxu1 }
 0x30d   : > { %v912_v15 = vsel %vm440_vm2, %v906_v12, -inf  ;;  %v1289_v16 = vpop.f32.mrb[15].mxu1  ;;  %v909_v19 = vadd.f32 %v1967_v25, %v908_v14 }
 0x30e   : > { %913 = vmax.xlane.f32.xlu0 %v912_v15 }
 0x30f   : > { %v915_v20 = vsel %vm440_vm2, %v909_v19, -inf }
 0x31b   : > { %777 = vrot.lane.b32.xlu1 %v1388_v17, %s1647_s27 }
 0x324   : > { %618 = vrot.lane.b32.xlu0 %v1389_v18, %s1646_s21 }
 0x33f   : > { %916 = vmax.xlane.f32.xlu1 %v915_v20 }
 0x350   : > { %936 = vrot.lane.b32.xlu1 %v1390_v21, %s1648_s1 }
 0x38b   : > { %v596_v22 = vpop.xlane.xlu1 %595 }
 0x38c   : > { %v600_v23 = vsub.f32 %v588_v59, %v596_v22 }
 0x38d   : > { %v599_v24 = vpop.xlane.xlu0 %598 }
 0x38e   : > { %v602_v26 = vmul.f32 1.442695, %v600_v23  ;;  %v601_v27 = vsub.f32 %v591_v62, %v599_v24 }
 0x390   : > { %1395 = vpow2.f32 %v602_v26  ;;  %v604_v28 = vmul.f32 1.442695, %v601_v27 }
 0x392   : > { %1397 = vpow2.f32 %v604_v28 }
 0x393   : > { %v755_v29 = vpop.xlane.xlu1 %754 }
 0x394   : > { %v759_v30 = vsub.f32 %v747_v4, %v755_v29 }
 0x396   : > { %v761_v31 = vmul.f32 1.442695, %v759_v30 }
 0x397   : > { %v758_v32 = vpop.xlane.xlu1 %757 }
 0x398   : > { %1399 = vpow2.f32 %v761_v31  ;;  %v760_v25 = vsub.f32 %v750_v7, %v758_v32 }
 0x39a   : > { %v1396_v33 = vpop.eup %1395  ;;  %v763_v34 = vmul.f32 1.442695, %v760_v25 }
 0x39b   : > { %v914_v35 = vpop.xlane.xlu0 %913  ;;  %v606_v36 = vsel %vm440_vm2, %v1396_v33, 0.0  ;;  %v778_v46 = vpop.permute.xlu1 %777 }
 0x39c   : > { %v1398_v37 = vpop.eup %1397  ;;  %1401 = vpow2.f32 %v763_v34  ;;  %v918_v38 = vsub.f32 %v906_v12, %v914_v35  ;;  %607 = vadd.xlane.f32.xlu0 %v606_v36 }
 0x39d   : > { %v609_v39 = vsel %vm440_vm2, %v1398_v37, 0.0  ;;  %v612_v42 = vpack.c.bf16 %v1398_v37, %v1396_v33 }
 0x39e   : > { %v920_v40 = vmul.f32 1.442695, %v918_v38  ;;  %610 = vadd.xlane.f32.xlu1 %v609_v39 }
 0x39f   : > { %v619_v41 = vpop.permute.xlu0 %618 }
 0x3a0   : > { %1403 = vpow2.f32 %v920_v40  ;;  %1267 = vmatpush3.bf16.msra.mxu0 %v619_v41 }
 0x3a1   : > { %1278 = vmatprep.subr.bf16.mxu0 %v1644_v0 }
 0x3a2   : > { %v1400_v45 = vpop.eup %1399 }
 0x3a3   : > { %1269 = vmatmul.mubr.msk.bf16.vlgmr.msra.gmra.mrb[4].mxu0 %vm440_vm2, %v612_v42  ;;  %v765_v47 = vsel %vm440_vm2, %v1400_v45, 0.0 }
 0x3a4   : > { %766 = vadd.xlane.f32.xlu0 %v765_v47  ;;  %1279 = vmatpush3.bf16.msra.mxu0 %v778_v46 }
 0x3a5   : > { %1280 = vmatprep.mubr.msk.bf16.mxu0 %vm1645_vm0, %v1644_v0  ;;  %1290 = vmatprep.subr.bf16.mxu0 %v1644_v0 }
 0x3a6   : > { %v1402_v48 = vpop.eup %1401 }
 0x3a7   : > { %v768_v49 = vsel %vm440_vm2, %v1402_v48, 0.0  ;;  %v771_v50 = vpack.c.bf16 %v1402_v48, %v1400_v45 }
 0x3a8   : > { %769 = vadd.xlane.f32.xlu0 %v768_v49 }
 0x3aa   : > { %v1404_v51 = vpop.eup %1403 }
 0x3ab   : > { %1281 = vmatmul.mubr.msk.bf16.vlgmr.msra.gmra.mrb[8].mxu0 %vm440_vm2, %v771_v50  ;;  %v924_v52 = vsel %vm440_vm2, %v1404_v51, 0.0 }
 0x3ac   : > { %925 = vadd.xlane.f32.xlu1 %v924_v52  ;;  %1292 = vmatprep.mubr.msk.bf16.mxu0 %vm1645_vm0, %v1644_v0  ;;  %v456_v0 = vsel %vm440_vm2, %v1979_v44, 0.0 }
 0x3b0   : > { %454 = vadd.xlane.f32.xlu1 %v453_v53 }
 0x3cc   : > { %v917_v55 = vpop.xlane.xlu1 %916 }
 0x3cd   : > { %v919_v57 = vsub.f32 %v909_v19, %v917_v55 }
 0x3cf   : > { %v922_v58 = vmul.f32 1.442695, %v919_v57 }
 0x3d0   : > { %v937_v59 = vpop.permute.xlu1 %936 }
 0x3d1   : > { %1405 = vpow2.f32 %v922_v58  ;;  %1291 = vmatpush3.bf16.msra.mxu0 %v937_v59 }
 0x3db   : > { %v1406_v60 = vpop.eup %1405 }
 0x3dc   : > { %v927_v61 = vsel %vm440_vm2, %v1406_v60, 0.0  ;;  %v930_v62 = vpack.c.bf16 %v1406_v60, %v1404_v51 }
 0x3dd   : > { %928 = vadd.xlane.f32.xlu0 %v927_v61 }
 0x3de   : > { %1293 = vmatmul.mubr.msk.bf16.vlgmr.msra.gmra.mrb[12].mxu0 %vm440_vm2, %v930_v62 }
 0x3e1   : > { %457 = vadd.xlane.f32.xlu0 %v456_v0 }
 0x429   : > { %v608_v5 = vpop.xlane.xlu0 %607 }
 0x42b   : > { %v611_v43 = vpop.xlane.xlu1 %610 }
 0x431   : > { %v767_v6 = vpop.xlane.xlu0 %766 }
 0x435   : > { %v770_v7 = vpop.xlane.xlu0 %769 }
 0x439   : > { %v926_v63 = vpop.xlane.xlu1 %925 }
 0x43d   : > { %v455_v1 = vpop.xlane.xlu1 %454 }
 0x43e   : > { %1407 = vrcp.f32 %v455_v1 }
 0x43f   : > { %1409 = vrcp.f32 %v608_v5 }
 0x440   : > { %1411 = vrcp.f32 %v611_v43 }
 0x448   : > { %v1408_v2 = vpop.eup %1407 }
 0x449   : > { %v512_v3 = vmul.f32 %v1408_v2, %v1998_v54  ;;  %v1410_v9 = vpop.eup %1409 }
 0x44a   : > { %v1412_v12 = vpop.eup %1411 }
 0x44b   : > { %v1223_v4 = vpack.c.bf16 %v512_v3, %v512_v3 }
 0x44d   : > { %523 = vst.msk [vmem:[%s2041_s6] sm:$0xf] %vm522_vm3, %v1223_v4 }
 0x46a   : > { %v929_v8 = vpop.xlane.xlu0 %928 }
 0x46e   : > { %v458_v44 = vpop.xlane.xlu0 %457 }
 0x46f   : > { %1413 = vrcp.f32 %v458_v44 }
 0x470   : > { %1415 = vrcp.f32 %v767_v6 }
 0x471   : > { %1417 = vrcp.f32 %v770_v7 }
 0x472   : > { %1419 = vrcp.f32 %v926_v63 }
 0x473   : > { %1421 = vrcp.f32 %v929_v8 }
 0x476   : > { %v658_v10 = vpop.f32.mrb[4].mxu0 }
 0x477   : > { %v667_v54 = vmul.f32 %v1410_v9, %v658_v10  ;;  %v1270_v11 = vpop.f32.mrb[5].mxu0 }
 0x478   : > { %v661_v13 = vpop.f32.mrb[6].mxu0 }
 0x479   : > { %v1414_v14 = vpop.eup %1413  ;;  %v1225_v15 = vpack.c.bf16 %v667_v54, %v667_v54  ;;  %v668_v16 = vmul.f32 %v1412_v12, %v661_v13  ;;  %v1271_v17 = vpop.f32.mrb[7].mxu0 }
 0x47a   : > { %v513_v18 = vmul.f32 %v1414_v14, %v2000_v56  ;;  %v1416_v21 = vpop.eup %1415 }
 0x47b   : > { %v1226_v19 = vpack.c.bf16 %v668_v16, %v668_v16  ;;  %675 = vrot.lane.b32.xlu1 %v1225_v15, %s1648_s1  ;;  %v1418_v26 = vpop.eup %1417 }
 0x47c   : > { %v1224_v20 = vpack.c.bf16 %v513_v18, %v513_v18  ;;  %v1420_v31 = vpop.eup %1419 }
 0x47d   : > { %677 = vrot.lane.b32.xlu0 %v1226_v19, %s1648_s1  ;;  %v1422_v34 = vpop.eup %1421 }
 0x47e   : > { %v817_v22 = vpop.f32.mrb[8].mxu0  ;;  %524 = vst.msk [vmem:[%s2041_s6 + $0x4] sm:$0xf] %vm522_vm3, %v1224_v20 }
 0x47f   : > { %v826_v23 = vmul.f32 %v1416_v21, %v817_v22  ;;  %v1282_v24 = vpop.f32.mrb[9].mxu0 }
 0x480   : > { %v820_v27 = vpop.f32.mrb[10].mxu0 }
 0x481   : > { %v1227_v28 = vpack.c.bf16 %v826_v23, %v826_v23  ;;  %v827_v29 = vmul.f32 %v1418_v26, %v820_v27  ;;  %v1283_v30 = vpop.f32.mrb[11].mxu0 }
 0x483   : > { %834 = vrot.lane.b32.xlu1 %v1227_v28, %s1647_s27  ;;  %v1228_v56 = vpack.c.bf16 %v827_v29, %v827_v29 }
 0x487   : > { %836 = vrot.lane.b32.xlu1 %v1228_v56, %s1647_s27 }
 0x4b1   : > { %v976_v32 = vpop.f32.mrb[12].mxu0 }
 0x4b2   : > { %v985_v25 = vmul.f32 %v1420_v31, %v976_v32  ;;  %v1294_v33 = vpop.f32.mrb[13].mxu0 }
 0x4b3   : > { %v979_v35 = vpop.f32.mrb[14].mxu0 }
 0x4b4   : > { %v1229_v36 = vpack.c.bf16 %v985_v25, %v985_v25  ;;  %v986_v37 = vmul.f32 %v1422_v34, %v979_v35  ;;  %v1295_v38 = vpop.f32.mrb[15].mxu0 }
 0x4b6   : > { %v1230_v39 = vpack.c.bf16 %v986_v37, %v986_v37  ;;  %993 = vrot.lane.b32.xlu0 %v1229_v36, %s1646_s21 }
 0x4b8   : > { %995 = vrot.lane.b32.xlu1 %v1230_v39, %s1646_s21 }
 0x4ed   : > { %v676_v40 = vpop.permute.xlu1 %675 }
 0x4ee   : > { %682 = vst.msk [vmem:[%s2041_s6] sm:$0xf] %vm681_vm4, %v676_v40 }
 0x4ef   : > { %v678_v41 = vpop.permute.xlu0 %677 }
 0x4f0   : > { %683 = vst.msk [vmem:[%s2041_s6 + $0x4] sm:$0xf] %vm681_vm4, %v678_v41 }
 0x4f5   : > { %v835_v42 = vpop.permute.xlu1 %834 }
 0x4f6   : > { %841 = vst.msk [vmem:[%s2041_s6] sm:$0xf] %vm840_vm5, %v835_v42 }
 0x4f9   : > { %v837_v45 = vpop.permute.xlu1 %836 }
 0x4fa   : > { %842 = vst.msk [vmem:[%s2041_s6 + $0x4] sm:$0xf] %vm840_vm5, %v837_v45 }
 0x528   : > { %v994_v46 = vpop.permute.xlu0 %993 }
 0x529   : > { %1000 = vst.msk [vmem:[%s2041_s6] sm:$0xf] %vm999_vm6, %v994_v46 }
 0x52a   : > { %v996_v47 = vpop.permute.xlu1 %995 }
 0x52b   : > { %1001 = vst.msk [vmem:[%s2041_s6 + $0x4] sm:$0xf] %vm999_vm6, %v996_v47 }
 0x52c   : > { %1558 = shalt.err (!%p1555_p5)
}
 0x52d   : > { %s1559_s0 = scalar_lea.hbm %s2063_s22, 128  ;;  %s1563_s8 = scalar_lea.hbm %s2122_s4, 256 }
 0x52e   : > { %p1560_p1 = scmp.ne.s32.totalorder %s2063_s22, %s1559_s0  ;;  %p1564_p12 = scmp.lt.u32.totalorder %s2063_s22, %s2122_s4 }
 0x52f   : > { %p1565_p8 = scmp.lt.u32.totalorder %s1563_s8, %s1559_s0  ;;  %p1567_p2 = scmp.lt.u32.totalorder %s1559_s0, %s2063_s22 }
 0x530   : > { %p1561_p6 = pnand %p1560_p1, %p2159_p4 }
 0x531   : > { %p1566_p0 = por %p1565_p8, %p1564_p12 }
 0x532   : > { %p1562_p9 = pneg %p1561_p6 }
 0x533   : > { %p1568_p10 = por %p1567_p2, %p1566_p0 }
 0x535   : > { %p1569_p13 = pnand %p1568_p10, %p1562_p9 }
 0x537   : > { %1572 = shalt.err (!%p1569_p13)
}
 0x538   : > { %s1650_s23 = smov 4  }
 0x539   : > { %1305 = dma.vmem_to_hbm [thread:$0]  (%p2159_p4), %s2066_s17, 128, %s2063_s22, %s1003_s5, %s1647_s27, %s1647_s27, %s1650_s23  }
 0x53a PF: > { %s2160_s14 = sld [smem:[#allocation19_spill]]  ;;  %s2161_s20 = sld [smem:[#allocation16_spill]] }
 0x53b   : > { %s1032_s21 = sand.u32 1, %s1615_s15  }
 0x53c   : > { %s1033_s1 = scalar_lea.sflag [#allocation4], %s1032_s21 }
 0x540   : > { %p2162_p11 = scmp.ne.s32.totalorder %s2160_s14, 0  ;;  %p2163_p7 = scmp.ge.s32.totalorder %s2161_s20, 2 }
 0x542   : > { %p1321_p3 = pnand %p2163_p7, %p2162_p11 }
 0x544   : > { %1610 = dma.done.wait (!%p1321_p3), %s1033_s1, 128  }
 0x545   : > { %1612 = vsyncadd (!%p1321_p3), %s1033_s1, 4294967168  ;;  %s26_s20 = sadd.s32 1, %s2161_s20   ;;  %s2164_s28 = sld [smem:[#allocation15_spill]] }
 0x546   : > { %p23_p5 = scmp.ge.s32.totalorder %s26_s20, 4   ;;  %s2165_s17 = sld [smem:[#allocation18_spill]] }
 0x547   : > { %s2166_s26 = sld [smem:[#allocation17_spill]]  ;;  %s2167_s15 = smov %s1619_s16 }
 0x548   : > { %s2169_s18 = smov %s1631_s19  ;;  %25 = sbr.rel (!%p23_p5) target bundleno = 13 (0xd), region = 118 }
 0x54b   : > { %s2168_s16 = smov %s2164_s28 }
 0x54d   : > { %s2170_s19 = smov %s2166_s26 }
 0x54f   :  { %1038 = vsyncpa [#allocation3], 1 }
 0x550   :  { %1040 = vsyncpa [#allocation3 + $0x1], 1 }
 0x551   :  { %1041 = vsyncpa [#allocation6], 1 }
 0x552   :  { %1043 = vsyncpa [#allocation6 + $0x1], 1 }
 0x553   :  { %1044 = vsyncpa [#allocation9], 1 }
 0x554   :  { %1046 = vsyncpa [#allocation9 + $0x1], 1 }
 0x555   :  { %1047 = vsyncpa [#allocation4], 1 }
 0x556   :  { %1049 = vsyncpa [#allocation4 + $0x1], 1 }

// kernel: model_sub_forward.19
= control target key start
LH: loop header
LB: loop body
LE: loop exit
PB: predicated region body
PF: predicated region fallthrough
CT: control target
= control target key end

     0   :  { %9 = vsyncpa [#allocation3], 0  ;;  %s475_s0 = inlined_call_operand.hbm [shape: bf16[32,128], index: 0, kind: input, shape index: {}]   ;;  %s476_s1 = inlined_call_operand.hbm [shape: bf16[32,128], index: 1, kind: input, shape index: {}]   ;;  %s477_s2 = inlined_call_operand.hbm [shape: f32[1,128], index: 2, kind: input, shape index: {}]   ;;  %s478_s3 = inlined_call_operand.hbm [shape: f32[1,128], index: 3, kind: input, shape index: {}]   ;;  %s479_s4 = inlined_call_operand.hbm [shape: bf16[32,128], index: 4, kind: output, shape index: {}]  }
   0x1   :  { %10 = vsyncpa [#allocation6], 0 }
   0x2   :  { %11 = vsyncpa [#allocation9], 0 }
   0x3   :  { %12 = vsyncpa [#allocation4], 0  ;;  %s367_s15 = smov [#allocation5]   ;;  %s368_s17 = smov [#allocation2]  }
   0x4   :  { %s30_s16 = sshll.u32 %s367_s15, 4  ;;  %s18_s18 = sshll.u32 %s368_s17, 4  ;;  %s31_s16 = int_to_ptr.vmem [resolvable:$true] %s30_s16  ;;  %s399_s18 = int_to_ptr.vmem [resolvable:$true] %s18_s18 }
   0x5   :  { %s249_s21 = scalar_lea.hbm %s476_s1, 256 }
   0x6   :  { %p250_p0 = scmp.ne.s32.totalorder %s476_s1, %s249_s21  ;;  %p253_p1 = scmp.lt.u32.totalorder %s249_s21, %s476_s1 }
   0x8   :  { %p255_p2 = pnand %p253_p1, %p250_p0 }
   0xa   :  { %258 = shalt.err (!%p255_p2)
}
   0xb   :  { %s259_s26 = scalar_lea.vmem %s31_s16, 256  ;;  %p264_p4 = scmp.lt.s32.totalorder %s31_s16, %s31_s16 }
   0xc   :  { %p260_p3 = scmp.ne.s32.totalorder %s31_s16, %s259_s26  ;;  %p265_p5 = scmp.lt.s32.totalorder %s259_s26, %s259_s26 }
   0xe   :  { %p266_p6 = por %p265_p5, %p264_p4 }
  0x10   :  { %p267_p7 = pnand %p266_p6, %p260_p3 }
  0x12   :  { %270 = shalt.err (!%p267_p7)
}
  0x13   :  { %s369_s27 = smov 64   ;;  %s370_s28 = smov 4  }
  0x14   :  { %36 = dma.hbm_to_vmem [thread:$0]  %s476_s1, 256, %s31_s16, [#allocation6], %s369_s27, %s369_s27, %s370_s28  }
  0x15   :  { %s271_s7 = scalar_lea.hbm %s475_s0, 256 }
  0x16   :  { %p272_p8 = scmp.ne.s32.totalorder %s475_s0, %s271_s7  ;;  %p275_p9 = scmp.lt.u32.totalorder %s271_s7, %s475_s0 }
  0x18   :  { %p277_p10 = pnand %p275_p9, %p272_p8 }
  0x1a   :  { %280 = shalt.err (!%p277_p10)
}
  0x1b   :  { %s281_s12 = scalar_lea.vmem %s399_s18, 256  ;;  %p286_p12 = scmp.lt.s32.totalorder %s399_s18, %s399_s18 }
  0x1c   :  { %p282_p11 = scmp.ne.s32.totalorder %s399_s18, %s281_s12  ;;  %p287_p13 = scmp.lt.s32.totalorder %s281_s12, %s281_s12 }
  0x1e   :  { %p288_p0 = por %p287_p13, %p286_p12 }
  0x20   :  { %p289_p1 = pnand %p288_p0, %p282_p11 }
  0x22   :  { %292 = shalt.err (!%p289_p1)
}
  0x23   :  { %24 = dma.hbm_to_vmem [thread:$0]  %s475_s0, 256, %s399_s18, [#allocation3], %s369_s27, %s369_s27, %s370_s28  }
  0x24   :  { %s371_s14 = smov [#allocation7]   ;;  %s372_s16 = smov [#allocation8]  }
  0x25   :  { %s43_s15 = sshll.u32 %s371_s14, 4  ;;  %s53_s17 = sshll.u32 %s372_s16, 4  ;;  %s44_s15 = int_to_ptr.vmem [resolvable:$true] %s43_s15  ;;  %s54_s17 = int_to_ptr.vmem [resolvable:$true] %s53_s17 }
  0x26   :  { %s293_s21 = scalar_lea.hbm %s477_s2, 16 }
  0x27   :  { %p294_p2 = scmp.ne.s32.totalorder %s477_s2, %s293_s21  ;;  %p297_p3 = scmp.lt.u32.totalorder %s293_s21, %s477_s2 }
  0x29   :  { %p299_p4 = pnand %p297_p3, %p294_p2 }
  0x2b   :  { %302 = shalt.err (!%p299_p4)
}
  0x2c   :  { %s303_s0 = scalar_lea.vmem %s44_s15, 16  ;;  %s307_s18 = scalar_lea.vmem %s44_s15, 32 }
  0x2d   :  { %p304_p5 = scmp.ne.s32.totalorder %s44_s15, %s303_s0  ;;  %p308_p6 = scmp.lt.s32.totalorder %s44_s15, %s44_s15 }
  0x2e   :  { %p309_p7 = scmp.lt.s32.totalorder %s307_s18, %s303_s0 }
  0x30   :  { %p310_p8 = por %p309_p7, %p308_p6 }
  0x32   :  { %p311_p9 = pnand %p310_p8, %p304_p5 }
  0x34   :  { %314 = shalt.err (!%p311_p9)
}
  0x35   :  { %46 = dma.hbm_to_vmem [thread:$0]  %s477_s2, 16, %s44_s15, [#allocation6]  }
  0x36   :  { %s315_s6 = scalar_lea.hbm %s478_s3, 16 }
  0x37   :  { %p316_p10 = scmp.ne.s32.totalorder %s478_s3, %s315_s6  ;;  %p319_p11 = scmp.lt.u32.totalorder %s315_s6, %s478_s3 }
  0x39   :  { %p321_p12 = pnand %p319_p11, %p316_p10 }
  0x3b   :  { %324 = shalt.err (!%p321_p12)
}
  0x3c   :  { %s325_s11 = scalar_lea.vmem %s54_s17, 16  ;;  %s329_s12 = scalar_lea.vmem %s54_s17, 32 }
  0x3d   :  { %p326_p13 = scmp.ne.s32.totalorder %s54_s17, %s325_s11  ;;  %p330_p0 = scmp.lt.s32.totalorder %s54_s17, %s54_s17 }
  0x3e   :  { %p331_p1 = scmp.lt.s32.totalorder %s329_s12, %s325_s11 }
  0x40   :  { %p332_p2 = por %p331_p1, %p330_p0 }
  0x42   :  { %p333_p3 = pnand %p332_p2, %p326_p13 }
  0x44   :  { %336 = shalt.err (!%p333_p3)
}
  0x45   :  { %56 = dma.hbm_to_vmem [thread:$0]  %s478_s3, 16, %s54_s17, [#allocation9]  }
  0x46   :  { %359 = dma.done.wait [#allocation3], 256  }
  0x47   :  { %360 = vsyncadd [#allocation3], 4294967040 }
  0x48   :  { %361 = dma.done.wait [#allocation6], 272  }
  0x49   :  { %362 = vsyncadd [#allocation6], 4294967024 }
  0x4a   :  { %363 = dma.done.wait [#allocation9], 16  }
  0x4b   :  { %364 = vsyncadd [#allocation9], 4294967280  ;;  %v206_v0 = vld [vmem:[#allocation2] sm:$0xff]   ;;  %v214_v1 = vld [vmem:[#allocation5] sm:$0xff]   ;;  %s373_s3 = smov [#allocation10]  }
  0x4c   :  { %v231_v2 = vld [vmem:[#allocation2 + $0x8] sm:$0xff]   ;;  %v207_v3 = vunpack.c.l.bf16 %v206_v0  ;;  %v215_v4 = vunpack.c.l.bf16 %v214_v1  ;;  %v232_v6 = vld [vmem:[#allocation5 + $0x8] sm:$0xff]   ;;  %v208_v7 = vunpack.c.h.bf16 %v206_v0  ;;  %v216_v9 = vunpack.c.h.bf16 %v214_v1  ;;  %v195_v46 = vld [vmem:[#allocation7] ss:$0 sm:$0xff]  ;;  %s181_s13 = sshll.u32 %s373_s3, 4  ;;  %s182_s13 = int_to_ptr.vmem [resolvable:$true] %s181_s13 }
  0x4d   :  { %v211_v5 = vunpack.c.l.bf16 %v231_v2  ;;  %v219_v8 = vunpack.c.l.bf16 %v232_v6  ;;  %v212_v10 = vunpack.c.h.bf16 %v231_v2  ;;  %v220_v11 = vunpack.c.h.bf16 %v232_v6  ;;  %v196_v52 = vld [vmem:[#allocation8] ss:$0 sm:$0xff]  ;;  %s337_s14 = scalar_lea.vmem %s182_s13, 256  ;;  %p342_p5 = scmp.lt.s32.totalorder %s182_s13, %s182_s13 }
  0x4e   :  { %v85_v12 = vadd.f32 %v215_v4, %v207_v3  ;;  %v86_v14 = vadd.f32 %v216_v9, %v208_v7  ;;  %p338_p4 = scmp.ne.s32.totalorder %s182_s13, %s337_s14  ;;  %p343_p6 = scmp.lt.s32.totalorder %s337_s14, %s337_s14 }
  0x4f   :  { %v87_v13 = vadd.f32 %v219_v8, %v211_v5  ;;  %v88_v15 = vadd.f32 %v220_v11, %v212_v10 }
  0x50   :  { %89 = vadd.xlane.f32.xlu0 %v85_v12  ;;  %p344_p7 = por %p343_p6, %p342_p5 }
  0x51   :  { %93 = vadd.xlane.f32.xlu1 %v87_v13 }
  0x52   :  { %p345_p8 = pnand %p344_p7, %p338_p4 }
  0x54   :  { %91 = vadd.xlane.f32.xlu0 %v86_v14 }
  0x55   :  { %95 = vadd.xlane.f32.xlu1 %v88_v15 }
  0xdd   :  { %v90_v16 = vpop.xlane.xlu0 %89 }
  0xde   :  { %v98_v17 = vmul.f32 0.0078125, %v90_v16  ;;  %v94_v18 = vpop.xlane.xlu1 %93 }
  0xdf   :  { %v100_v19 = vmul.f32 0.0078125, %v94_v18 }
  0xe0   :  { %v102_v20 = vsub.f32 %v85_v12, %v98_v17 }
  0xe1   :  { %v104_v21 = vsub.f32 %v87_v13, %v100_v19  ;;  %v92_v22 = vpop.xlane.xlu0 %91 }
  0xe2   :  { %v99_v23 = vmul.f32 0.0078125, %v92_v22  ;;  %v106_v24 = vmul.f32 %v102_v20, %v102_v20  ;;  %v96_v25 = vpop.xlane.xlu1 %95 }
  0xe3   :  { %v101_v26 = vmul.f32 0.0078125, %v96_v25  ;;  %v108_v28 = vmul.f32 %v104_v21, %v104_v21 }
  0xe4   :  { %v103_v27 = vsub.f32 %v86_v14, %v99_v23  ;;  %110 = vadd.xlane.f32.xlu0 %v106_v24 }
  0xe5   :  { %v105_v29 = vsub.f32 %v88_v15, %v101_v26 }
  0xe6   :  { %v107_v30 = vmul.f32 %v103_v27, %v103_v27 }
  0xe7   :  { %v109_v31 = vmul.f32 %v105_v29, %v105_v29 }
  0xe8   :  { %114 = vadd.xlane.f32.xlu0 %v108_v28  ;;  %112 = vadd.xlane.f32.xlu1 %v107_v30 }
  0xec   :  { %116 = vadd.xlane.f32.xlu1 %v109_v31 }
 0x171   :  { %v111_v32 = vpop.xlane.xlu0 %110 }
 0x172   :  { %v118_v33 = vmul.f32 0.0078125, %v111_v32 }
 0x174   :  { %v122_v34 = vadd.f32 1e-05, %v118_v33 }
 0x175   :  { %v113_v35 = vpop.xlane.xlu1 %112  ;;  %v115_v36 = vpop.xlane.xlu0 %114 }
 0x176   :  { %241 = vrsqrt.f32 %v122_v34  ;;  %v119_v37 = vmul.f32 0.0078125, %v113_v35  ;;  %v120_v38 = vmul.f32 0.0078125, %v115_v36 }
 0x178   :  { %v123_v39 = vadd.f32 1e-05, %v119_v37  ;;  %v124_v40 = vadd.f32 1e-05, %v120_v38 }
 0x179   :  { %v117_v41 = vpop.xlane.xlu1 %116 }
 0x17a   :  { %243 = vrsqrt.f32 %v123_v39  ;;  %v121_v42 = vmul.f32 0.0078125, %v117_v41 }
 0x17b   :  { %245 = vrsqrt.f32 %v124_v40 }
 0x17c   :  { %v125_v43 = vadd.f32 1e-05, %v121_v42 }
 0x17e   :  { %247 = vrsqrt.f32 %v125_v43 }
 0x180   :  { %v242_v44 = vpop.eup %241 }
 0x181   :  { %v130_v45 = vmul.f32 %v242_v44, %v102_v20 }
 0x183   :  { %v141_v50 = vmul.f32 %v195_v46, %v130_v45 }
 0x184   :  { %v244_v47 = vpop.eup %243 }
 0x185   :  { %v246_v48 = vpop.eup %245  ;;  %v131_v49 = vmul.f32 %v244_v47, %v103_v27  ;;  %v152_v57 = vadd.f32 %v196_v52, %v141_v50 }
 0x186   :  { %v132_v51 = vmul.f32 %v246_v48, %v104_v21 }
 0x187   :  { %v142_v53 = vmul.f32 %v195_v46, %v131_v49 }
 0x188   :  { %v248_v54 = vpop.eup %247  ;;  %v143_v56 = vmul.f32 %v195_v46, %v132_v51 }
 0x189   :  { %v133_v55 = vmul.f32 %v248_v54, %v105_v29  ;;  %v153_v58 = vadd.f32 %v196_v52, %v142_v53 }
 0x18a   :  { %v154_v61 = vadd.f32 %v196_v52, %v143_v56 }
 0x18b   :  { %v144_v59 = vmul.f32 %v195_v46, %v133_v55  ;;  %v224_v60 = vpack.c.bf16 %v153_v58, %v152_v57 }
 0x18d   :  { %v155_v62 = vadd.f32 %v196_v52, %v144_v59  ;;  %225 = vst [vmem:[#allocation10] sm:$0xff] %v224_v60  }
 0x18f   :  { %v229_v63 = vpack.c.bf16 %v155_v62, %v154_v61 }
 0x191   :  { %233 = vst [vmem:[#allocation10 + $0x8] sm:$0xff] %v229_v63  }
 0x192   :  { %348 = shalt.err (!%p345_p8)
}
 0x193   :  { %s349_s17 = scalar_lea.hbm %s479_s4, 256 }
 0x194   :  { %p350_p9 = scmp.ne.s32.totalorder %s479_s4, %s349_s17  ;;  %p353_p10 = scmp.lt.u32.totalorder %s349_s17, %s479_s4 }
 0x196   :  { %p355_p11 = pnand %p353_p10, %p350_p9 }
 0x198   :  { %358 = shalt.err (!%p355_p11)
}
 0x199   :  { %187 = dma.vmem_to_hbm [thread:$0]  %s182_s13, 256, %s479_s4, [#allocation4], %s369_s27, %s369_s27, %s370_s28  }
 0x19a   :  { %365 = dma.done.wait [#allocation4], 256  }
 0x19b   :  { %366 = vsyncadd [#allocation4], 4294967040 }
 0x19c   :  { %191 = vsyncpa [#allocation3], 1 }
 0x19d   :  { %192 = vsyncpa [#allocation6], 1 }
 0x19e   :  { %193 = vsyncpa [#allocation9], 1 }
 0x19f   :  { %194 = vsyncpa [#allocation4], 1 }

// kernel: model_sub_forward.20
= control target key start
LH: loop header
LB: loop body
LE: loop exit
PB: predicated region body
PF: predicated region fallthrough
CT: control target
= control target key end

     0   :  { %8 = vsyncpa [#allocation4], 0  ;;  %s731_s0 = inlined_call_operand.hbm [shape: bf16[32,128], index: 0, kind: input, shape index: {}]   ;;  %s732_s1 = inlined_call_operand.hbm [shape: bf16[128,256], index: 1, kind: input, shape index: {}]   ;;  %s733_s2 = inlined_call_operand.hbm [shape: f32[1,256], index: 2, kind: input, shape index: {}]   ;;  %s734_s3 = inlined_call_operand.hbm [shape: bf16[32,256], index: 3, kind: output, shape index: {}]  }
   0x1   :  { %9 = vsyncpa [#allocation7], 0 }
   0x2   :  { %10 = vsyncpa [#allocation5], 0  ;;  %s592_s12 = smov [#allocation6]   ;;  %s498_s16 = scalar_lea.hbm %s732_s1, 2048 }
   0x3   :  { %s28_s13 = sshll.u32 %s592_s12, 4  ;;  %p499_p0 = scmp.ne.s32.totalorder %s732_s1, %s498_s16  ;;  %s29_s13 = int_to_ptr.vmem [resolvable:$true] %s28_s13 }
   0x4   :  { %p502_p1 = scmp.lt.u32.totalorder %s498_s16, %s732_s1 }
   0x6   :  { %p504_p2 = pnand %p502_p1, %p499_p0 }
   0x8   :  { %507 = shalt.err (!%p504_p2)
}
   0x9   :  { %s508_s21 = scalar_lea.vmem %s29_s13, 2048  ;;  %p513_p4 = scmp.lt.s32.totalorder %s29_s13, %s29_s13 }
   0xa   :  { %p509_p3 = scmp.ne.s32.totalorder %s29_s13, %s508_s21  ;;  %p514_p5 = scmp.lt.s32.totalorder %s508_s21, %s508_s21 }
   0xc   :  { %p515_p6 = por %p514_p5, %p513_p4 }
   0xe   :  { %p516_p7 = pnand %p515_p6, %p509_p3 }
  0x10   :  { %519 = shalt.err (!%p516_p7)
}
  0x11   :  { %s593_s22 = smov 128   ;;  %s594_s23 = smov 8  }
  0x12   :  { %34 = dma.hbm_to_vmem [thread:$0]  %s732_s1, 2048, %s29_s13, [#allocation7], %s593_s22, %s593_s22, %s594_s23  }
  0x13   :  { %s595_s26 = smov [#allocation3]   ;;  %s520_s30 = scalar_lea.hbm %s731_s0, 256 }
  0x14   :  { %s16_s27 = sshll.u32 %s595_s26, 4  ;;  %p521_p8 = scmp.ne.s32.totalorder %s731_s0, %s520_s30  ;;  %s17_s27 = int_to_ptr.vmem [resolvable:$true] %s16_s27 }
  0x15   :  { %p524_p9 = scmp.lt.u32.totalorder %s520_s30, %s731_s0 }
  0x17   :  { %p526_p10 = pnand %p524_p9, %p521_p8 }
  0x19   :  { %529 = shalt.err (!%p526_p10)
}
  0x1a   :  { %s530_s8 = scalar_lea.vmem %s17_s27, 256  ;;  %p535_p12 = scmp.lt.s32.totalorder %s17_s27, %s17_s27 }
  0x1b   :  { %p531_p11 = scmp.ne.s32.totalorder %s17_s27, %s530_s8  ;;  %p536_p13 = scmp.lt.s32.totalorder %s530_s8, %s530_s8 }
  0x1d   :  { %p537_p0 = por %p536_p13, %p535_p12 }
  0x1f   :  { %p538_p1 = pnand %p537_p0, %p531_p11 }
  0x21   :  { %541 = shalt.err (!%p538_p1)
}
  0x22   :  { %s596_s1 = smov 64   ;;  %s597_s9 = smov 4  }
  0x23   :  { %22 = dma.hbm_to_vmem [thread:$0]  %s731_s0, 256, %s17_s27, [#allocation4], %s596_s1, %s596_s1, %s597_s9  }
  0x24   :  { %s598_s12 = smov [#allocation8]   ;;  %s542_s16 = scalar_lea.hbm %s733_s2, 32 }
  0x25   :  { %s41_s13 = sshll.u32 %s598_s12, 4  ;;  %p543_p2 = scmp.ne.s32.totalorder %s733_s2, %s542_s16  ;;  %s42_s13 = int_to_ptr.vmem [resolvable:$true] %s41_s13 }
  0x26   :  { %p546_p3 = scmp.lt.u32.totalorder %s542_s16, %s733_s2 }
  0x28   :  { %p548_p4 = pnand %p546_p3, %p543_p2 }
  0x2a   :  { %551 = shalt.err (!%p548_p4)
}
  0x2b   :  { %s552_s21 = scalar_lea.vmem %s42_s13, 32  ;;  %p557_p6 = scmp.lt.s32.totalorder %s42_s13, %s42_s13 }
  0x2c   :  { %p553_p5 = scmp.ne.s32.totalorder %s42_s13, %s552_s21  ;;  %p558_p7 = scmp.lt.s32.totalorder %s552_s21, %s552_s21 }
  0x2e   :  { %p559_p8 = por %p558_p7, %p557_p6 }
  0x30   :  { %p560_p9 = pnand %p559_p8, %p553_p5 }
  0x32   :  { %563 = shalt.err (!%p560_p9)
}
  0x33   :  { %44 = dma.hbm_to_vmem [thread:$0]  %s733_s2, 32, %s42_s13, [#allocation7]  }
  0x34   :  { %586 = dma.done.wait [#allocation4], 256  }
  0x35   :  { %587 = vsyncadd [#allocation4], 4294967040 }
  0x36   :  { %588 = dma.done.wait [#allocation7], 2080  }
  0x37   :  { %589 = vsyncadd [#allocation7], 4294965216  ;;  %v599_v0 = vmov 0   ;;  %v456_v1 = vld [vmem:[#allocation6 + $0x4] ss:$8 sps:$4 sm:$0xff]   ;;  %v480_v17 = vld [vmem:[#allocation3] sm:$0xff]   ;;  %v269_v19 = vlaneseq }
  0x38   :  { %219 = vmatprep.mubr.bf16.mxu0 %v599_v0  ;;  %229 = vmatprep.mubr.bf16.mxu1 %v599_v0  ;;  %v458_v2 = vld [vmem:[#allocation6] ss:$8 sps:$4 sm:$0xff]   ;;  %v459_v3 = vld [vmem:[#allocation6 + $0x14] ss:$8 sps:$4 sm:$0xff]   ;;  %v461_v4 = vld [vmem:[#allocation6 + $0x10] ss:$8 sps:$4 sm:$0xff]  }
  0x39   :  { %187 = vmatprep.subr.bf16.mxu0 %v456_v1  ;;  %431 = vmatprep.subr.bf16.mxu1 %v456_v1  ;;  %v462_v5 = vld [vmem:[#allocation6 + $0x24] ss:$8 sps:$4 sm:$0xff]   ;;  %v464_v6 = vld [vmem:[#allocation6 + $0x20] ss:$8 sps:$4 sm:$0xff]   ;;  %v465_v7 = vld [vmem:[#allocation6 + $0x34] ss:$8 sps:$4 sm:$0xff]  }
  0x3a   :  { %188 = vmatpush1.bf16.msra.mxu0 %v458_v2  ;;  %439 = vmatpush1.bf16.msra.mxu1 %v458_v2  ;;  %v467_v8 = vld [vmem:[#allocation6 + $0x30] ss:$8 sps:$4 sm:$0xff]   ;;  %v468_v9 = vld [vmem:[#allocation6 + $0x44] ss:$8 sps:$4 sm:$0xff]   ;;  %v470_v10 = vld [vmem:[#allocation6 + $0x40] ss:$8 sps:$4 sm:$0xff]  }
  0x3b   :  { %189 = vmatprep.subr.bf16.mxu0 %v459_v3  ;;  %432 = vmatprep.subr.bf16.mxu1 %v459_v3  ;;  %v471_v11 = vld [vmem:[#allocation6 + $0x54] ss:$8 sps:$4 sm:$0xff]   ;;  %v473_v12 = vld [vmem:[#allocation6 + $0x50] ss:$8 sps:$4 sm:$0xff]   ;;  %v474_v13 = vld [vmem:[#allocation6 + $0x64] ss:$8 sps:$4 sm:$0xff]  }
  0x3c   :  { %v476_v14 = vld [vmem:[#allocation6 + $0x60] ss:$8 sps:$4 sm:$0xff]   ;;  %v477_v15 = vld [vmem:[#allocation6 + $0x74] ss:$8 sps:$4 sm:$0xff]   ;;  %v479_v16 = vld [vmem:[#allocation6 + $0x70] ss:$8 sps:$4 sm:$0xff]  }
  0x3d   :  { %v481_v18 = vld [vmem:[#allocation3 + $0x8] sm:$0xff]   ;;  %v270_v20 = vshrl.u32 %v269_v19, 7  ;;  %v267_v22 = vld [vmem:[#allocation8] sm:$0x3]  ;;  %s600_s2 = smov [#allocation9]  }
  0x3e   :  { %190 = vmatpush1.bf16.msra.mxu0 %v461_v4  ;;  %440 = vmatpush1.bf16.msra.mxu1 %v461_v4  ;;  %s392_s25 = sshll.u32 %s600_s2, 4  ;;  %s393_s25 = int_to_ptr.vmem [resolvable:$true] %s392_s25 }
  0x3f   :  { %191 = vmatprep.subr.bf16.mxu0 %v462_v5  ;;  %433 = vmatprep.subr.bf16.mxu1 %v462_v5  ;;  %v271_v21 = vsub.s32 0, %v270_v20  ;;  %v275_v23 = vsub.s32 1, %v270_v20  ;;  %s564_s26 = scalar_lea.vmem %s393_s25, 512  ;;  %p569_p11 = scmp.lt.s32.totalorder %s393_s25, %s393_s25 }
  0x40   :  { %p565_p10 = scmp.ne.s32.totalorder %s393_s25, %s564_s26  ;;  %p570_p12 = scmp.lt.s32.totalorder %s564_s26, %s564_s26 }
  0x41   :  { %v272_v24 = vrot.slane %v267_v22, %v271_v21  ;;  %v276_v25 = vrot.slane %v267_v22, %v275_v23 }
  0x42   :  { %192 = vmatpush1.bf16.msra.mxu0 %v464_v6  ;;  %441 = vmatpush1.bf16.msra.mxu1 %v464_v6  ;;  %p571_p13 = por %p570_p12, %p569_p11 }
  0x43   :  { %193 = vmatprep.subr.bf16.mxu0 %v465_v7  ;;  %434 = vmatprep.subr.bf16.mxu1 %v465_v7 }
  0x44   :  { %p572_p0 = pnand %p571_p13, %p565_p10 }
  0x46   :  { %194 = vmatpush1.bf16.msra.mxu0 %v467_v8  ;;  %442 = vmatpush1.bf16.msra.mxu1 %v467_v8 }
  0x47   :  { %195 = vmatprep.subr.bf16.mxu0 %v468_v9  ;;  %435 = vmatprep.subr.bf16.mxu1 %v468_v9 }
  0x4a   :  { %196 = vmatpush1.bf16.msra.mxu0 %v470_v10  ;;  %443 = vmatpush1.bf16.msra.mxu1 %v470_v10 }
  0x4b   :  { %197 = vmatprep.subr.bf16.mxu0 %v471_v11  ;;  %436 = vmatprep.subr.bf16.mxu1 %v471_v11 }
  0x4e   :  { %198 = vmatpush1.bf16.msra.mxu0 %v473_v12  ;;  %444 = vmatpush1.bf16.msra.mxu1 %v473_v12 }
  0x4f   :  { %199 = vmatprep.subr.bf16.mxu0 %v474_v13  ;;  %437 = vmatprep.subr.bf16.mxu1 %v474_v13 }
  0x52   :  { %200 = vmatpush1.bf16.msra.mxu0 %v476_v14  ;;  %445 = vmatpush1.bf16.msra.mxu1 %v476_v14 }
  0x53   :  { %201 = vmatprep.subr.bf16.mxu0 %v477_v15  ;;  %438 = vmatprep.subr.bf16.mxu1 %v477_v15 }
  0x56   :  { %202 = vmatpush1.bf16.msra.mxu0 %v479_v16  ;;  %446 = vmatpush1.bf16.msra.mxu1 %v479_v16 }
  0x59   :  { %220 = vmatmul.mubr.bf16.vlgmr.msra.gmra.mrb[0].mxu0 %v480_v17  ;;  %230 = vmatmul.mubr.bf16.vlgmr.msra.gmra.mrb[0].mxu1 %v481_v18 }
 0x12c   :  { %v221_v26 = vpop.f32.mrb[0].mxu0  ;;  %v231_v27 = vpop.f32.mrb[0].mxu1 }
 0x12d   :  { %v660_v28 = vadd.f32 %v272_v24, %v221_v26  ;;  %v662_v29 = vadd.f32 %v272_v24, %v231_v27  ;;  %v223_v30 = vpop.f32.mrb[1].mxu0  ;;  %v233_v31 = vpop.f32.mrb[1].mxu1 }
 0x12e   :  { %v664_v32 = vadd.f32 %v276_v25, %v223_v30  ;;  %v666_v33 = vadd.f32 %v276_v25, %v233_v31  ;;  %v225_v34 = vpop.f32.mrb[2].mxu0  ;;  %v235_v35 = vpop.f32.mrb[2].mxu1 }
 0x12f   :  { %v287_v36 = vmul.f32 %v660_v28, %v660_v28  ;;  %v291_v37 = vmul.f32 %v662_v29, %v662_v29  ;;  %v672_v38 = vadd.f32 %v272_v24, %v225_v34  ;;  %v674_v39 = vadd.f32 %v272_v24, %v235_v35  ;;  %v227_v40 = vpop.f32.mrb[3].mxu0  ;;  %v237_v41 = vpop.f32.mrb[3].mxu1 }
 0x130   :  { %v288_v42 = vmul.f32 %v664_v32, %v664_v32  ;;  %v292_v43 = vmul.f32 %v666_v33, %v666_v33  ;;  %v680_v44 = vadd.f32 %v276_v25, %v227_v40  ;;  %v682_v45 = vadd.f32 %v276_v25, %v237_v41 }
 0x131   :  { %v295_v46 = vmul.f32 %v287_v36, %v660_v28  ;;  %v299_v47 = vmul.f32 %v291_v37, %v662_v29  ;;  %v289_v48 = vmul.f32 %v672_v38, %v672_v38  ;;  %v293_v49 = vmul.f32 %v674_v39, %v674_v39 }
 0x132   :  { %v296_v50 = vmul.f32 %v288_v42, %v664_v32  ;;  %v300_v51 = vmul.f32 %v292_v43, %v666_v33  ;;  %v290_v52 = vmul.f32 %v680_v44, %v680_v44  ;;  %v294_v53 = vmul.f32 %v682_v45, %v682_v45 }
 0x133   :  { %v303_v54 = vmul.f32 0.044715, %v295_v46  ;;  %v307_v55 = vmul.f32 0.044715, %v299_v47  ;;  %v297_v56 = vmul.f32 %v289_v48, %v672_v38  ;;  %v301_v57 = vmul.f32 %v293_v49, %v674_v39 }
 0x134   :  { %v304_v58 = vmul.f32 0.044715, %v296_v50  ;;  %v308_v59 = vmul.f32 0.044715, %v300_v51  ;;  %v298_v60 = vmul.f32 %v290_v52, %v680_v44  ;;  %v302_v61 = vmul.f32 %v294_v53, %v682_v45 }
 0x135   :  { %v311_v62 = vadd.f32 %v303_v54, %v660_v28  ;;  %v315_v63 = vadd.f32 %v307_v55, %v662_v29  ;;  %v305_v0 = vmul.f32 0.044715, %v297_v56  ;;  %v309_v1 = vmul.f32 0.044715, %v301_v57 }
 0x136   :  { %v312_v2 = vadd.f32 %v304_v58, %v664_v32  ;;  %v316_v3 = vadd.f32 %v308_v59, %v666_v33  ;;  %v306_v4 = vmul.f32 0.044715, %v298_v60  ;;  %v310_v5 = vmul.f32 0.044715, %v302_v61 }
 0x137   :  { %v319_v6 = vmul.f32 0.7978846, %v311_v62  ;;  %v323_v7 = vmul.f32 0.7978846, %v315_v63  ;;  %v313_v8 = vadd.f32 %v305_v0, %v672_v38  ;;  %v317_v9 = vadd.f32 %v309_v1, %v674_v39 }
 0x138   :  { %v320_v10 = vmul.f32 0.7978846, %v312_v2  ;;  %v324_v11 = vmul.f32 0.7978846, %v316_v3  ;;  %v314_v12 = vadd.f32 %v306_v4, %v680_v44  ;;  %v318_v13 = vadd.f32 %v310_v5, %v682_v45 }
 0x139   :  { %482 = vtanh.f32 %v319_v6  ;;  %v321_v14 = vmul.f32 0.7978846, %v313_v8  ;;  %v325_v15 = vmul.f32 0.7978846, %v317_v9 }
 0x13a   :  { %484 = vtanh.f32 %v323_v7  ;;  %v322_v16 = vmul.f32 0.7978846, %v314_v12  ;;  %v326_v17 = vmul.f32 0.7978846, %v318_v13 }
 0x13b   :  { %486 = vtanh.f32 %v320_v10 }
 0x13c   :  { %488 = vtanh.f32 %v324_v11 }
 0x13d   :  { %490 = vtanh.f32 %v321_v14 }
 0x13e   :  { %492 = vtanh.f32 %v325_v15 }
 0x13f   :  { %494 = vtanh.f32 %v322_v16 }
 0x140   :  { %496 = vtanh.f32 %v326_v17 }
 0x143   :  { %v483_v18 = vpop.eup %482 }
 0x144   :  { %v485_v19 = vpop.eup %484  ;;  %v335_v20 = vadd.f32 1.0, %v483_v18 }
 0x145   :  { %v487_v21 = vpop.eup %486  ;;  %v339_v22 = vadd.f32 1.0, %v485_v19 }
 0x146   :  { %v489_v23 = vpop.eup %488  ;;  %v343_v24 = vmul.f32 0.5, %v335_v20  ;;  %v336_v25 = vadd.f32 1.0, %v487_v21 }
 0x147   :  { %v491_v26 = vpop.eup %490  ;;  %v347_v27 = vmul.f32 0.5, %v339_v22  ;;  %v340_v30 = vadd.f32 1.0, %v489_v23 }
 0x148   :  { %v493_v31 = vpop.eup %492  ;;  %v351_v34 = vmul.f32 %v343_v24, %v660_v28  ;;  %v344_v35 = vmul.f32 0.5, %v336_v25  ;;  %v337_v36 = vadd.f32 1.0, %v491_v26 }
 0x149   :  { %v495_v37 = vpop.eup %494  ;;  %v355_v40 = vmul.f32 %v347_v27, %v662_v29  ;;  %v348_v41 = vmul.f32 0.5, %v340_v30  ;;  %v341_v42 = vadd.f32 1.0, %v493_v31 }
 0x14a   :  { %v497_v43 = vpop.eup %496  ;;  %v352_v46 = vmul.f32 %v344_v35, %v664_v32  ;;  %v345_v47 = vmul.f32 0.5, %v337_v36  ;;  %v338_v48 = vadd.f32 1.0, %v495_v37 }
 0x14b   :  { %v356_v49 = vmul.f32 %v348_v41, %v666_v33  ;;  %v349_v50 = vmul.f32 0.5, %v341_v42  ;;  %v342_v51 = vadd.f32 1.0, %v497_v43 }
 0x14c   :  { %v353_v52 = vmul.f32 %v345_v47, %v672_v38  ;;  %v346_v53 = vmul.f32 0.5, %v338_v48  ;;  %v427_v28 = vpack.c.bf16 %v352_v46, %v351_v34 }
 0x14d   :  { %v357_v54 = vmul.f32 %v349_v50, %v674_v39  ;;  %v350_v55 = vmul.f32 0.5, %v342_v51  ;;  %v429_v56 = vpack.c.bf16 %v356_v49, %v355_v40 }
 0x14e   :  { %v354_v29 = vmul.f32 %v346_v53, %v680_v44  ;;  %383 = vst [vmem:[#allocation9] sm:$0xff] %v427_v28 }
 0x14f   :  { %v358_v32 = vmul.f32 %v350_v55, %v682_v45  ;;  %385 = vst [vmem:[#allocation9 + $0x10] sm:$0xff] %v429_v56 }
 0x150   :  { %v428_v57 = vpack.c.bf16 %v354_v29, %v353_v52 }
 0x151   :  { %v430_v33 = vpack.c.bf16 %v358_v32, %v357_v54 }
 0x152   :  { %384 = vst [vmem:[#allocation9 + $0x8] sm:$0xff] %v428_v57 }
 0x153   :  { %386 = vst [vmem:[#allocation9 + $0x18] sm:$0xff] %v430_v33 }
 0x154   :  { %575 = shalt.err (!%p572_p0)
}
 0x155   :  { %s576_s29 = scalar_lea.hbm %s734_s3, 512 }
 0x156   :  { %p577_p1 = scmp.ne.s32.totalorder %s734_s3, %s576_s29  ;;  %p580_p2 = scmp.lt.u32.totalorder %s576_s29, %s734_s3 }
 0x158   :  { %p582_p3 = pnand %p580_p2, %p577_p1 }
 0x15a   :  { %585 = shalt.err (!%p582_p3)
}
 0x15b   :  { %398 = dma.vmem_to_hbm [thread:$0]  %s393_s25, 512, %s734_s3, [#allocation5], %s593_s22, %s593_s22, %s594_s23  }
 0x15c   :  { %590 = dma.done.wait [#allocation5], 512  }
 0x15d   :  { %591 = vsyncadd [#allocation5], 4294966784 }
 0x15e   :  { %402 = vsyncpa [#allocation4], 1 }
 0x15f   :  { %403 = vsyncpa [#allocation7], 1 }
 0x160   :  { %404 = vsyncpa [#allocation5], 1 }

// kernel: model_sub_forward.21
= control target key start
LH: loop header
LB: loop body
LE: loop exit
PB: predicated region body
PF: predicated region fallthrough
CT: control target
= control target key end

     0   :  { %8 = vsyncpa [#allocation4], 0  ;;  %s622_s0 = inlined_call_operand.hbm [shape: bf16[32,256], index: 0, kind: input, shape index: {}]   ;;  %s623_s1 = inlined_call_operand.hbm [shape: bf16[256,128], index: 1, kind: input, shape index: {}]   ;;  %s624_s2 = inlined_call_operand.hbm [shape: f32[1,128], index: 2, kind: input, shape index: {}]   ;;  %s625_s3 = inlined_call_operand.hbm [shape: bf16[32,128], index: 3, kind: output, shape index: {}]  }
   0x1   :  { %9 = vsyncpa [#allocation7], 0 }
   0x2   :  { %10 = vsyncpa [#allocation5], 0  ;;  %s540_s12 = smov [#allocation6]   ;;  %s446_s16 = scalar_lea.hbm %s623_s1, 2048 }
   0x3   :  { %s28_s13 = sshll.u32 %s540_s12, 4  ;;  %p447_p0 = scmp.ne.s32.totalorder %s623_s1, %s446_s16  ;;  %s29_s13 = int_to_ptr.vmem [resolvable:$true] %s28_s13 }
   0x4   :  { %p450_p1 = scmp.lt.u32.totalorder %s446_s16, %s623_s1 }
   0x6   :  { %p452_p2 = pnand %p450_p1, %p447_p0 }
   0x8   :  { %455 = shalt.err (!%p452_p2)
}
   0x9   :  { %s456_s21 = scalar_lea.vmem %s29_s13, 2048  ;;  %p461_p4 = scmp.lt.s32.totalorder %s29_s13, %s29_s13 }
   0xa   :  { %p457_p3 = scmp.ne.s32.totalorder %s29_s13, %s456_s21  ;;  %p462_p5 = scmp.lt.s32.totalorder %s456_s21, %s456_s21 }
   0xc   :  { %p463_p6 = por %p462_p5, %p461_p4 }
   0xe   :  { %p464_p7 = pnand %p463_p6, %p457_p3 }
  0x10   :  { %467 = shalt.err (!%p464_p7)
}
  0x11   :  { %s541_s22 = smov 64   ;;  %s542_s23 = smov 4  }
  0x12   :  { %34 = dma.hbm_to_vmem [thread:$0]  %s623_s1, 2048, %s29_s13, [#allocation7], %s541_s22, %s541_s22, %s542_s23  }
  0x13   :  { %s543_s26 = smov [#allocation3]   ;;  %s468_s30 = scalar_lea.hbm %s622_s0, 512 }
  0x14   :  { %s16_s27 = sshll.u32 %s543_s26, 4  ;;  %p469_p8 = scmp.ne.s32.totalorder %s622_s0, %s468_s30  ;;  %s17_s27 = int_to_ptr.vmem [resolvable:$true] %s16_s27 }
  0x15   :  { %p472_p9 = scmp.lt.u32.totalorder %s468_s30, %s622_s0 }
  0x17   :  { %p474_p10 = pnand %p472_p9, %p469_p8 }
  0x19   :  { %477 = shalt.err (!%p474_p10)
}
  0x1a   :  { %s478_s8 = scalar_lea.vmem %s17_s27, 512  ;;  %p483_p12 = scmp.lt.s32.totalorder %s17_s27, %s17_s27 }
  0x1b   :  { %p479_p11 = scmp.ne.s32.totalorder %s17_s27, %s478_s8  ;;  %p484_p13 = scmp.lt.s32.totalorder %s478_s8, %s478_s8 }
  0x1d   :  { %p485_p0 = por %p484_p13, %p483_p12 }
  0x1f   :  { %p486_p1 = pnand %p485_p0, %p479_p11 }
  0x21   :  { %489 = shalt.err (!%p486_p1)
}
  0x22   :  { %s544_s1 = smov 128   ;;  %s545_s9 = smov 8  }
  0x23   :  { %22 = dma.hbm_to_vmem [thread:$0]  %s622_s0, 512, %s17_s27, [#allocation4], %s544_s1, %s544_s1, %s545_s9  }
  0x24   :  { %s546_s12 = smov [#allocation8]   ;;  %s490_s16 = scalar_lea.hbm %s624_s2, 16 }
  0x25   :  { %s41_s13 = sshll.u32 %s546_s12, 4  ;;  %p491_p2 = scmp.ne.s32.totalorder %s624_s2, %s490_s16  ;;  %s42_s13 = int_to_ptr.vmem [resolvable:$true] %s41_s13 }
  0x26   :  { %p494_p3 = scmp.lt.u32.totalorder %s490_s16, %s624_s2 }
  0x28   :  { %p496_p4 = pnand %p494_p3, %p491_p2 }
  0x2a   :  { %499 = shalt.err (!%p496_p4)
}
  0x2b   :  { %s500_s21 = scalar_lea.vmem %s42_s13, 16  ;;  %s504_s0 = scalar_lea.vmem %s42_s13, 32 }
  0x2c   :  { %p501_p5 = scmp.ne.s32.totalorder %s42_s13, %s500_s21  ;;  %p505_p6 = scmp.lt.s32.totalorder %s42_s13, %s42_s13 }
  0x2d   :  { %p506_p7 = scmp.lt.s32.totalorder %s504_s0, %s500_s21 }
  0x2f   :  { %p507_p8 = por %p506_p7, %p505_p6 }
  0x31   :  { %p508_p9 = pnand %p507_p8, %p501_p5 }
  0x33   :  { %511 = shalt.err (!%p508_p9)
}
  0x34   :  { %44 = dma.hbm_to_vmem [thread:$0]  %s624_s2, 16, %s42_s13, [#allocation7]  }
  0x35   :  { %534 = dma.done.wait [#allocation4], 512  }
  0x36   :  { %535 = vsyncadd [#allocation4], 4294966784 }
  0x37   :  { %536 = dma.done.wait [#allocation7], 2064  }
  0x38   :  { %537 = vsyncadd [#allocation7], 4294965232  ;;  %v424_v0 = vld [vmem:[#allocation6 + $0x40] sm:$0xff]   ;;  %v426_v2 = vld [vmem:[#allocation6 + $0x48] sm:$0xff]   ;;  %s547_s2 = smov [#allocation9]  }
  0x39   :  { %v425_v1 = vld [vmem:[#allocation6] sm:$0xff]   ;;  %372 = vmatprep.subr.bf16.mxu0 %v424_v0  ;;  %400 = vmatprep.subr.bf16.mxu1 %v424_v0  ;;  %v427_v3 = vld [vmem:[#allocation6 + $0x8] sm:$0xff]   ;;  %v428_v4 = vld [vmem:[#allocation6 + $0x50] sm:$0xff]   ;;  %s319_s26 = sshll.u32 %s547_s2, 4  ;;  %s320_s26 = int_to_ptr.vmem [resolvable:$true] %s319_s26 }
  0x3a   :  { %373 = vmatpush3.bf16.msra.mxu0 %v425_v1  ;;  %408 = vmatpush3.bf16.msra.mxu1 %v425_v1  ;;  %v429_v5 = vld [vmem:[#allocation6 + $0x10] sm:$0xff]   ;;  %v430_v6 = vld [vmem:[#allocation6 + $0x58] sm:$0xff]   ;;  %v432_v8 = vld [vmem:[#allocation6 + $0x60] sm:$0xff]   ;;  %s512_s27 = scalar_lea.vmem %s320_s26, 256  ;;  %p517_p11 = scmp.lt.s32.totalorder %s320_s26, %s320_s26 }
  0x3b   :  { %374 = vmatprep.subr.bf16.mxu0 %v426_v2  ;;  %401 = vmatprep.subr.bf16.mxu1 %v426_v2  ;;  %v431_v7 = vld [vmem:[#allocation6 + $0x18] sm:$0xff]   ;;  %v433_v9 = vld [vmem:[#allocation6 + $0x20] sm:$0xff]   ;;  %v434_v10 = vld [vmem:[#allocation6 + $0x68] sm:$0xff]   ;;  %p513_p10 = scmp.ne.s32.totalorder %s320_s26, %s512_s27  ;;  %p518_p12 = scmp.lt.s32.totalorder %s512_s27, %s512_s27 }
  0x3c   :  { %v442_v11 = vld [vmem:[#allocation3 + $0x4] ss:$8 sps:$4 sm:$0xff]   ;;  %v445_v12 = vld [vmem:[#allocation3 + $0x14] ss:$8 sps:$4 sm:$0xff]   ;;  %v440_v18 = vld [vmem:[#allocation3] ss:$8 sps:$4 sm:$0xff]  }
  0x3d   :  { %v435_v13 = vld [vmem:[#allocation6 + $0x28] sm:$0xff]   ;;  %v436_v14 = vld [vmem:[#allocation6 + $0x70] sm:$0xff]   ;;  %251 = vmatprep.mubr.bf16.mxu0 %v442_v11  ;;  %259 = vmatprep.mubr.bf16.mxu1 %v445_v12  ;;  %v438_v16 = vld [vmem:[#allocation6 + $0x78] sm:$0xff]   ;;  %p519_p13 = por %p518_p12, %p517_p11 }
  0x3e   :  { %375 = vmatpush3.bf16.msra.mxu0 %v427_v3  ;;  %409 = vmatpush3.bf16.msra.mxu1 %v427_v3  ;;  %v437_v15 = vld [vmem:[#allocation6 + $0x30] sm:$0xff]   ;;  %v439_v17 = vld [vmem:[#allocation6 + $0x38] sm:$0xff]   ;;  %v352_v28 = vld [vmem:[#allocation8] ss:$0 sm:$0xff] }
  0x3f   :  { %376 = vmatprep.subr.bf16.mxu0 %v428_v4  ;;  %402 = vmatprep.subr.bf16.mxu1 %v428_v4  ;;  %v443_v19 = vld [vmem:[#allocation3 + $0x10] ss:$8 sps:$4 sm:$0xff]   ;;  %p520_p0 = pnand %p519_p13, %p513_p10 }
  0x42   :  { %377 = vmatpush3.bf16.msra.mxu0 %v429_v5  ;;  %410 = vmatpush3.bf16.msra.mxu1 %v429_v5 }
  0x43   :  { %378 = vmatprep.subr.bf16.mxu0 %v430_v6  ;;  %403 = vmatprep.subr.bf16.mxu1 %v430_v6 }
  0x46   :  { %379 = vmatpush3.bf16.msra.mxu0 %v431_v7  ;;  %411 = vmatpush3.bf16.msra.mxu1 %v431_v7 }
  0x47   :  { %380 = vmatprep.subr.bf16.mxu0 %v432_v8  ;;  %404 = vmatprep.subr.bf16.mxu1 %v432_v8 }
  0x4a   :  { %381 = vmatpush3.bf16.msra.mxu0 %v433_v9  ;;  %412 = vmatpush3.bf16.msra.mxu1 %v433_v9 }
  0x4b   :  { %382 = vmatprep.subr.bf16.mxu0 %v434_v10  ;;  %405 = vmatprep.subr.bf16.mxu1 %v434_v10 }
  0x4e   :  { %383 = vmatpush3.bf16.msra.mxu0 %v435_v13  ;;  %413 = vmatpush3.bf16.msra.mxu1 %v435_v13 }
  0x4f   :  { %384 = vmatprep.subr.bf16.mxu0 %v436_v14  ;;  %406 = vmatprep.subr.bf16.mxu1 %v436_v14 }
  0x52   :  { %385 = vmatpush3.bf16.msra.mxu0 %v437_v15  ;;  %414 = vmatpush3.bf16.msra.mxu1 %v437_v15 }
  0x53   :  { %386 = vmatprep.subr.bf16.mxu0 %v438_v16  ;;  %407 = vmatprep.subr.bf16.mxu1 %v438_v16 }
  0x56   :  { %387 = vmatpush3.bf16.msra.mxu0 %v439_v17  ;;  %415 = vmatpush3.bf16.msra.mxu1 %v439_v17 }
  0x59   :  { %252 = vmatmul.mubr.bf16.vlgmr.msra.gmra.mrb[0].mxu0 %v440_v18  ;;  %260 = vmatmul.mubr.bf16.vlgmr.msra.gmra.mrb[0].mxu1 %v443_v19 }
 0x12c   :  { %v388_v20 = vpop.f32.mrb[0].mxu0  ;;  %v394_v21 = vpop.f32.mrb[0].mxu1 }
 0x12d   :  { %v389_v22 = vpop.f32.mrb[1].mxu0  ;;  %v395_v23 = vpop.f32.mrb[1].mxu1 }
 0x12e   :  { %v390_v24 = vadd.f32 %v389_v22, %v388_v20  ;;  %v396_v25 = vadd.f32 %v395_v23, %v394_v21  ;;  %v391_v26 = vpop.f32.mrb[2].mxu0  ;;  %v397_v27 = vpop.f32.mrb[2].mxu1 }
 0x12f   :  { %v392_v29 = vpop.f32.mrb[3].mxu0  ;;  %v398_v30 = vpop.f32.mrb[3].mxu1 }
 0x130   :  { %v393_v31 = vadd.f32 %v392_v29, %v391_v26  ;;  %v399_v32 = vadd.f32 %v398_v30, %v397_v27  ;;  %v290_v33 = vadd.f32 %v390_v24, %v352_v28  ;;  %v292_v34 = vadd.f32 %v396_v25, %v352_v28 }
 0x132   :  { %v291_v35 = vadd.f32 %v393_v31, %v352_v28  ;;  %v293_v36 = vadd.f32 %v399_v32, %v352_v28 }
 0x134   :  { %v364_v37 = vpack.c.bf16 %v291_v35, %v290_v33  ;;  %v369_v38 = vpack.c.bf16 %v293_v36, %v292_v34 }
 0x136   :  { %365 = vst [vmem:[#allocation9] sm:$0xff] %v364_v37   ;;  %371 = vst [vmem:[#allocation9 + $0x8] sm:$0xff] %v369_v38  }
 0x137   :  { %523 = shalt.err (!%p520_p0)
}
 0x138   :  { %s524_s30 = scalar_lea.hbm %s625_s3, 256 }
 0x139   :  { %p525_p1 = scmp.ne.s32.totalorder %s625_s3, %s524_s30  ;;  %p528_p2 = scmp.lt.u32.totalorder %s524_s30, %s625_s3 }
 0x13b   :  { %p530_p3 = pnand %p528_p2, %p525_p1 }
 0x13d   :  { %533 = shalt.err (!%p530_p3)
}
 0x13e   :  { %325 = dma.vmem_to_hbm [thread:$0]  %s320_s26, 256, %s625_s3, [#allocation5], %s541_s22, %s541_s22, %s542_s23  }
 0x13f   :  { %538 = dma.done.wait [#allocation5], 256  }
 0x140   :  { %539 = vsyncadd [#allocation5], 4294967040 }
 0x141   :  { %329 = vsyncpa [#allocation4], 1 }
 0x142   :  { %330 = vsyncpa [#allocation7], 1 }
 0x143   :  { %331 = vsyncpa [#allocation5], 1 }

</bundles_post_ra>
